<compile_context>
chip_gen: v5e
topology: v5e:2x2
jax: 0.10.0
libtpu: 0.0.40
codegen_flags: <defaults>
</compile_context>

<pallas_src>
import functools
import math

import jax
import jax.numpy as jnp
from jax.experimental import pallas as pl
from jax.experimental.pallas import tpu as pltpu

EPS = 1e-5


# --------------------------------------------------------------------------
# Pallas kernels
# --------------------------------------------------------------------------
def _conv_act_kernel(a_ref, w_ref, b_ref, o_ref, *, act):
    """o = act(a @ w + b) -- composed conv (+ folded BNs) + bias + activation."""
    y = jnp.dot(a_ref[...], w_ref[...], preferred_element_type=jnp.float32)
    y = y + b_ref[...]
    if act == "tanh":
        y = jnp.tanh(y)
    o_ref[...] = y.astype(o_ref.dtype)


def fused_conv_matmul(patches, w, bias, act, out_dtype):
    """patches:(M,K) bf16, w:(K,N) bf16, bias:(1,N) f32 -> (M,N) out_dtype."""
    M, K = patches.shape
    N = w.shape[1]
    if M >= 256 and M % 16 == 0:
        grid_n, tm = 2, M // 2     # 2 parallel blocks -> both v7x TensorCores
    else:
        grid_n, tm = 1, M          # tiny layers: single block, no step overhead
    return pl.pallas_call(
        functools.partial(_conv_act_kernel, act=act),
        out_shape=jax.ShapeDtypeStruct((M, N), out_dtype),
        grid=(grid_n,),
        in_specs=[pl.BlockSpec((tm, K), lambda i: (i, 0)),
                  pl.BlockSpec((K, N), lambda i: (0, 0)),
                  pl.BlockSpec((1, N), lambda i: (0, 0))],
        out_specs=pl.BlockSpec((tm, N), lambda i: (i, 0)),
        compiler_params=pltpu.CompilerParams(
            dimension_semantics=("parallel",)),
    )(patches, w, bias)


def _linear_softmax_kernel(x_ref, w_ref, b_ref, o_ref):
    y = jnp.dot(x_ref[...], w_ref[...], preferred_element_type=jnp.float32)
    y = y + b_ref[...]                 # padded lanes carry -1e30 -> exp = 0
    m = jnp.max(y, axis=-1, keepdims=True)
    e = jnp.exp(y - m)
    o_ref[...] = e / jnp.sum(e, axis=-1, keepdims=True)


def linear_softmax(feat, w, b):
    """Final Linear(1344,11)+Softmax kept in f32 for parity."""
    B = feat.shape[0]
    return pl.pallas_call(
        _linear_softmax_kernel,
        out_shape=jax.ShapeDtypeStruct((B, w.shape[1]), jnp.float32),
    )(feat.astype(jnp.float32), w, b)


# --------------------------------------------------------------------------
# Conv wrapper: single-op im2col + fused Pallas matmul (+ pixel packing)
# --------------------------------------------------------------------------
def conv_block(x, plan):
    """x:(B,H,W,Cin); plan holds composed bf16 weight (block-diag if packed)."""
    B, H, W, cin = x.shape
    k, pack, cout = plan["k"], plan["pack"], plan["cout"]
    patches = jax.lax.conv_general_dilated_patches(
        x.astype(jnp.bfloat16), (k, k), (1, 1), "SAME",
        dimension_numbers=("NHWC", "HWIO", "NHWC"))
    # feature dim of patches is channel-major: idx = ci*k*k + dy*k + dx
    K = cin * k * k
    patches = patches.reshape(B * H * W // pack, pack * K)
    out = fused_conv_matmul(patches, plan["w"], plan["b"], plan["act"],
                            plan["out_dtype"])
    return out.reshape(B, H, W, cout)


# --------------------------------------------------------------------------
# Plain-JAX micro ops (pooling, channel/coord attention, SPP)
# --------------------------------------------------------------------------
def maxpool(x, k):
    B, H, W, C = x.shape
    return jnp.max(x.reshape(B, H // k, k, W // k, k, C), axis=(2, 4))


def adaptive_avgpool(x, out):
    B, H, W, C = x.shape
    return jnp.mean(x.reshape(B, out, H // out, out, W // out, C), axis=(2, 4))


def channel_attention(x, p):
    """ChannelAttention(C, reduction=4): sigmoid(fc2(tanh(fc1(avg/max)))) gate."""
    xf = x.astype(jnp.float32)
    avg = jnp.mean(xf, axis=(1, 2))
    mx = jnp.max(xf, axis=(1, 2))
    avg_out = jnp.tanh(avg @ p["w1"]) @ p["w2"]
    max_out = jnp.tanh(mx @ p["w1"]) @ p["w2"]
    return jax.nn.sigmoid(avg_out + max_out)


def coord_att(x, p):
    """CoordAtt(64, 64, groups=32) on NHWC input (tiny -> plain JAX)."""
    B, H, W, C = x.shape
    xf = x.astype(jnp.float32)
    x_h = jnp.mean(xf, axis=2)                       # (B, H, C)
    x_w = jnp.mean(xf, axis=1)                       # (B, W, C)
    y = jnp.concatenate([x_h, x_w], axis=1)          # (B, H+W, C)
    y = y @ p["w1"] + p["b1"]
    y = y * p["bn1_scale"] + p["bn1_shift"]
    y = y * (jnp.clip(y + 3.0, 0.0, 6.0) * (1.0 / 6.0))   # h-swish
    a_h = jax.nn.sigmoid(y[:, :H, :] @ p["w2"] + p["b2"])  # (B, H, C)
    a_w = jax.nn.sigmoid(y[:, H:, :] @ p["w3"] + p["b3"])  # (B, W, C)
    out = xf * a_w[:, None, :, :] * a_h[:, :, None, :]
    return out.astype(x.dtype)


# --------------------------------------------------------------------------
# Full model forward (takes PREPARED params via closure)
# --------------------------------------------------------------------------
def my_model_forward(pp, x_nchw, poolsize=(1, 2, 4)):
    x = jnp.transpose(x_nchw, (0, 2, 3, 1)).astype(jnp.float32)   # -> NHWC

    x = conv_block(x, pp["conv1"])                 # conv1 + tanh (fused)
    x = maxpool(x, 2)
    # bn32 folded into sep1 weights at prep time
    x = conv_block(x, pp["sep1"])                  # composed sep1 conv + tanh
    x = coord_att(x, pp["sep1_ca"])
    x = maxpool(x, 4)

    x = conv_block(x, pp["sep2"])                  # composed sep2 conv + tanh
    x = coord_att(x, pp["sep2_ca"])
    x = jnp.tanh(x)
    cw = channel_attention(x, pp["ca_2"])
    x = x * cw[:, None, None, :]
    # bn64_2 folded into sep3
    x = conv_block(x, pp["sep3"])                  # composed sep3 conv + tanh
    x = coord_att(x, pp["sep3_ca"])
    x = jnp.tanh(x)
    cw = channel_attention(x, pp["ca_3"])
    x = x * cw[:, None, None, :]
    # bn64_3 folded into sep4
    x = conv_block(x, pp["sep4"])                  # composed sep4 conv, no act

    # SPP layer -- flatten in NCHW order to match torch .view() semantics
    B = x.shape[0]
    xf = x.astype(jnp.float32)
    feats = []
    for ps in poolsize:
        pooled = adaptive_avgpool(xf, ps)                      # (B, ps, ps, C)
        feats.append(jnp.transpose(pooled, (0, 3, 1, 2)).reshape(B, -1))
    feat = jnp.concatenate(feats, axis=1)                      # (B, 1344)

    out = linear_softmax(feat, pp["lin_w"], pp["lin_b"])       # (B, 128)
    return out[:, :11]


# --------------------------------------------------------------------------
# Raw (PyTorch-layout) parameter init -- deterministic, fan-in scale
# --------------------------------------------------------------------------
def _conv_init(key, cout, cin, kh, kw, bias=True):
    k1, k2 = jax.random.split(key)
    bound = 1.0 / math.sqrt(cin * kh * kw)
    w = jax.random.uniform(k1, (cout, cin, kh, kw), jnp.float32, -bound, bound)
    b = (jax.random.uniform(k2, (cout,), jnp.float32, -bound, bound)
         if bias else None)
    return w, b


def _bn_init(c):
    return (jnp.ones((c,), jnp.float32), jnp.zeros((c,), jnp.float32),
            jnp.zeros((c,), jnp.float32), jnp.ones((c,), jnp.float32))


def _sep_init(key, cin, cmid, cout, k, with_ca):
    ks = jax.random.split(key, 8)
    d = {}
    d["conv_a_w"], d["conv_a_b"] = _conv_init(ks[0], cmid, cin, k, k)
    d["bn_a"] = _bn_init(cmid)
    d["conv_b_w"], d["conv_b_b"] = _conv_init(ks[1], cout, cmid, 1, 1)
    d["bn_b"] = _bn_init(cout)
    if with_ca:
        mip = max(8, cout // 32)
        ca = {}
        ca["conv1_w"], ca["conv1_b"] = _conv_init(ks[2], mip, cout, 1, 1)
        ca["bn1"] = _bn_init(mip)
        ca["conv2_w"], ca["conv2_b"] = _conv_init(ks[3], cout, mip, 1, 1)
        ca["conv3_w"], ca["conv3_b"] = _conv_init(ks[4], cout, mip, 1, 1)
        d["ca"] = ca
    return d


def _chan_att_init(key, c, r=4):
    k1, k2 = jax.random.split(key)
    w1, _ = _conv_init(k1, c // r, c, 1, 1, bias=False)
    w2, _ = _conv_init(k2, c, c // r, 1, 1, bias=False)
    return {"fc1_w": w1, "fc2_w": w2}


def init_params(key):
    keys = jax.random.split(key, 16)
    ki = iter(keys)
    p = {}
    p["conv1_w"], p["conv1_b"] = _conv_init(next(ki), 32, 3, 3, 3)
    p["bn32"] = _bn_init(32)
    p["sep1"] = _sep_init(next(ki), 32, 32, 64, 3, True)
    p["sep2"] = _sep_init(next(ki), 64, 64, 64, 3, True)
    p["sep3"] = _sep_init(next(ki), 64, 64, 64, 5, True)
    p["sep4"] = _sep_init(next(ki), 64, 64, 64, 5, False)
    p["ca_2"] = _chan_att_init(next(ki), 64)
    p["ca_3"] = _chan_att_init(next(ki), 64)
    p["bn64_2"] = _bn_init(64)
    p["bn64_3"] = _bn_init(64)
    k1, k2 = jax.random.split(next(ki))
    bound = 1.0 / math.sqrt(1344)
    p["lin_w"] = jax.random.uniform(k1, (11, 1344), jnp.float32, -bound, bound)
    p["lin_b"] = jax.random.uniform(k2, (11,), jnp.float32, -bound, bound)
    return p


# --------------------------------------------------------------------------
# One-time parameter preparation: compose conv+BN+1x1conv+BN, fold preceding
# BN affines, pre-transpose to im2col order, pixel-pack, cast to bf16.
# --------------------------------------------------------------------------
def _fold_bn(bn):
    gamma, beta, mean, var = bn
    scale = gamma / jnp.sqrt(var + EPS)
    return scale, beta - mean * scale


def _identity_affine(c):
    return jnp.ones((c,), jnp.float32), jnp.zeros((c,), jnp.float32)


def _finish_plan(weff, bias, k, cin, cout, act, pack, out_dtype):
    """weff:(cin,k,k,cout) f32 -> bf16 (pack*K, pack*cout) block-diag plan."""
    K = cin * k * k
    wflat = weff.reshape(K, cout)
    if pack > 1:
        wbig = jnp.zeros((pack * K, pack * cout), jnp.float32)
        for d in range(pack):
            wbig = wbig.at[d * K:(d + 1) * K,
                           d * cout:(d + 1) * cout].set(wflat)
        bbig = jnp.tile(bias, pack)
    else:
        wbig, bbig = wflat, bias
    return {"w": wbig.astype(jnp.bfloat16),
            "b": bbig.reshape(1, -1).astype(jnp.float32),
            "k": int(k), "cout": int(cout), "pack": int(pack),
            "act": act, "out_dtype": out_dtype}


def _conv_plan_single(w, b, in_affine, act, pack, out_dtype):
    cout, cin, k, _ = w.shape
    s_in, t_in = in_affine
    weff = jnp.einsum("oiyx,i->iyxo", w, s_in)          # im2col tap order
    bias = b + jnp.einsum("oiyx,i->o", w, t_in)
    return _finish_plan(weff, bias, k, cin, cout, act, pack, out_dtype)


def _sep_plan(sp, in_affine, act, pack, out_dtype):
    """Compose kxk conv + BN + 1x1 conv + BN (+ preceding affine) exactly."""
    Wa, ba = sp["conv_a_w"], sp["conv_a_b"]              # (Ca,Cin,k,k),(Ca,)
    sa, ta = _fold_bn(sp["bn_a"])
    Wb, bb = sp["conv_b_w"], sp["conv_b_b"]              # (Cb,Ca,1,1),(Cb,)
    sb, tb = _fold_bn(sp["bn_b"])
    s_in, t_in = in_affine
    ca_, cin, k, _ = Wa.shape
    cb = Wb.shape[0]
    Wbm = Wb.reshape(cb, ca_)
    weff = jnp.einsum("aiyx,i,a,ba,b->iyxb", Wa, s_in, sa, Wbm, sb)
    inner = jnp.einsum("aiyx,i->a", Wa, t_in) + ba       # conv_a bias (+shift)
    aff_a = inner * sa + ta                              # after BN_a
    bias = (Wbm @ aff_a + bb) * sb + tb                  # after conv_b + BN_b
    return _finish_plan(weff, bias, k, cin, cb, act, pack, out_dtype)


def _prep_ca(ca):
    mip, C = ca["conv1_w"].shape[:2]
    oup = ca["conv2_w"].shape[0]
    s1, t1 = _fold_bn(ca["bn1"])
    return {"w1": ca["conv1_w"].reshape(mip, C).T, "b1": ca["conv1_b"],
            "bn1_scale": s1, "bn1_shift": t1,
            "w2": ca["conv2_w"].reshape(oup, mip).T, "b2": ca["conv2_b"],
            "w3": ca["conv3_w"].reshape(oup, mip).T, "b3": ca["conv3_b"]}


def _prep_chan_att(cp):
    cr, c = cp["fc1_w"].shape[:2]
    return {"w1": cp["fc1_w"].reshape(cr, c).T,
            "w2": cp["fc2_w"].reshape(c, cr).T}


def prepare_params(p):
    bf16, f32 = jnp.bfloat16, jnp.float32
    pp = {}
    pp["conv1"] = _conv_plan_single(p["conv1_w"], p["conv1_b"],
                                    _identity_affine(3), "tanh",
                                    pack=4, out_dtype=bf16)
    # bn32 folded into sep1; bn64_2 into sep3; bn64_3 into sep4
    pp["sep1"] = _sep_plan(p["sep1"], _fold_bn(p["bn32"]), "tanh",
                           pack=2, out_dtype=bf16)
    pp["sep1_ca"] = _prep_ca(p["sep1"]["ca"])
    pp["sep2"] = _sep_plan(p["sep2"], _identity_affine(64), "tanh",
                           pack=1, out_dtype=f32)
    pp["sep2_ca"] = _prep_ca(p["sep2"]["ca"])
    pp["sep3"] = _sep_plan(p["sep3"], _fold_bn(p["bn64_2"]), "tanh",
                           pack=1, out_dtype=f32)
    pp["sep3_ca"] = _prep_ca(p["sep3"]["ca"])
    pp["sep4"] = _sep_plan(p["sep4"], _fold_bn(p["bn64_3"]), "none",
                           pack=1, out_dtype=f32)
    pp["ca_2"] = _prep_chan_att(p["ca_2"])
    pp["ca_3"] = _prep_chan_att(p["ca_3"])
    kin = p["lin_w"].shape[1]
    pp["lin_w"] = jnp.zeros((kin, 128), f32).at[:, :11].set(p["lin_w"].T)
    pp["lin_b"] = jnp.full((1, 128), -1e30, f32).at[0, :11].set(p["lin_b"])
    return pp


# --------------------------------------------------------------------------
if __name__ == "__main__":
    key = jax.random.PRNGKey(0)
    kp, kx = jax.random.split(key)
    raw_params = init_params(kp)
    prepared = prepare_params(raw_params)      # once, outside the jitted fwd

    # poolsize (1,2,4) -> 64*(1+4+16) = 1344 features, matching Linear(1344,11);
    # that pins the SPP input to 4x4, hence a 32x32 input image.
    x = jax.random.normal(kx, (2, 3, 32, 32), jnp.float32)   # NCHW like PyTorch

    fwd = jax.jit(functools.partial(my_model_forward, prepared,
                                    poolsize=(1, 2, 4)))
    out = fwd(x)
    out = jax.block_until_ready(out)

    assert out.shape == (2, 11)
    assert bool(jnp.all(jnp.isfinite(out)))
    assert bool(jnp.allclose(jnp.sum(out, axis=-1), 1.0, atol=1e-4))
    print("KERNEL_OK")
</pallas_src>

<mosaic_0001>
module attributes {stable_mosaic.version = 11 : i64} {
  func.func @_conv_act_kernel(%arg0: i32, %arg1: memref<256x108xbf16, #tpu.memory_space<vmem>>, %arg2: memref<108x128xbf16, #tpu.memory_space<vmem>>, %arg3: memref<1x128xf32, #tpu.memory_space<vmem>>, %arg4: memref<256x128xbf16, #tpu.memory_space<vmem>>) attributes {dimension_semantics = [#tpu.dimension_semantics<parallel>], iteration_bounds = array<i64: 2>, scalar_prefetch = 0 : i64, scratch_operands = 0 : i64, tpu.core_type = #tpu.core_type<tc>, window_params = [{transform_indices = @transform_0, window_bounds = array<i64: 256, 108>}, {pipeline_mode = #tpu.pipeline_mode<synchronous>, transform_indices = @transform_1, window_bounds = array<i64: 108, 128>}, {pipeline_mode = #tpu.pipeline_mode<synchronous>, transform_indices = @transform_2, window_bounds = array<i64: 1, 128>}, {transform_indices = @transform_3, window_bounds = array<i64: 256, 128>}]} {
    %c0 = arith.constant 0 : index
    %c0_0 = arith.constant 0 : index
    %0 = vector.load %arg1[%c0, %c0_0] : memref<256x108xbf16, #tpu.memory_space<vmem>>, vector<256x108xbf16>
    %c0_1 = arith.constant 0 : index
    %c0_2 = arith.constant 0 : index
    %1 = vector.load %arg2[%c0_1, %c0_2] : memref<108x128xbf16, #tpu.memory_space<vmem>>, vector<108x128xbf16>
    %cst = arith.constant dense<0.000000e+00> : vector<256x128xf32>
    %2 = tpu.matmul %0, %1, %cst {dimension_numbers = #tpu.dot_dimension_numbers<[1], [0], [0], [1], [0, 0, 1, 1], [], []>} : vector<256x108xbf16>, vector<108x128xbf16>, vector<256x128xf32> -> vector<256x128xf32>
    %c0_3 = arith.constant 0 : index
    %c0_4 = arith.constant 0 : index
    %3 = vector.load %arg3[%c0_3, %c0_4] : memref<1x128xf32, #tpu.memory_space<vmem>>, vector<1x128xf32>
    %4 = vector.broadcast %3 : vector<1x128xf32> to vector<256x128xf32>
    %5 = arith.addf %2, %4 : vector<256x128xf32>
    %6 = math.tanh %5 : vector<256x128xf32>
    %7 = arith.truncf %6 : vector<256x128xf32> to vector<256x128xbf16>
    %c0_5 = arith.constant 0 : index
    %c0_6 = arith.constant 0 : index
    %8 = vector.load %arg4[%c0_5, %c0_6] : memref<256x128xbf16, #tpu.memory_space<vmem>>, vector<256x128xbf16>
    tpu.vector_store %arg4[%c0_5, %c0_6], %7 {strides = array<i32>} : memref<256x128xbf16, #tpu.memory_space<vmem>>, vector<256x128xbf16>,
    return
  }
  func.func @transform_0(%arg0: i32) -> (i32, i32) {
    %c0_i32 = arith.constant 0 : i32
    %c0_i32_0 = arith.constant 0 : i32
    return %arg0, %c0_i32 : i32, i32
  }
  func.func @transform_1(%arg0: i32) -> (i32, i32) {
    %c0_i32 = arith.constant 0 : i32
    %c0_i32_0 = arith.constant 0 : i32
    %c0_i32_1 = arith.constant 0 : i32
    return %c0_i32, %c0_i32_0 : i32, i32
  }
  func.func @transform_2(%arg0: i32) -> (i32, i32) {
    %c0_i32 = arith.constant 0 : i32
    %c0_i32_0 = arith.constant 0 : i32
    %c0_i32_1 = arith.constant 0 : i32
    return %c0_i32, %c0_i32_0 : i32, i32
  }
  func.func @transform_3(%arg0: i32) -> (i32, i32) {
    %c0_i32 = arith.constant 0 : i32
    %c0_i32_0 = arith.constant 0 : i32
    return %arg0, %c0_i32 : i32, i32
  }
}

module attributes {stable_mosaic.version = 11 : i64} {
  func.func @_conv_act_kernel(%arg0: i32, %arg1: memref<128x576xbf16, #tpu.memory_space<vmem>>, %arg2: memref<576x128xbf16, #tpu.memory_space<vmem>>, %arg3: memref<1x128xf32, #tpu.memory_space<vmem>>, %arg4: memref<128x128xbf16, #tpu.memory_space<vmem>>) attributes {dimension_semantics = [#tpu.dimension_semantics<parallel>], iteration_bounds = array<i64: 2>, scalar_prefetch = 0 : i64, scratch_operands = 0 : i64, tpu.core_type = #tpu.core_type<tc>, window_params = [{transform_indices = @transform_0, window_bounds = array<i64: 128, 576>}, {pipeline_mode = #tpu.pipeline_mode<synchronous>, transform_indices = @transform_1, window_bounds = array<i64: 576, 128>}, {pipeline_mode = #tpu.pipeline_mode<synchronous>, transform_indices = @transform_2, window_bounds = array<i64: 1, 128>}, {transform_indices = @transform_3, window_bounds = array<i64: 128, 128>}]} {
    %c0 = arith.constant 0 : index
    %c0_0 = arith.constant 0 : index
    %0 = vector.load %arg1[%c0, %c0_0] : memref<128x576xbf16, #tpu.memory_space<vmem>>, vector<128x576xbf16>
    %c0_1 = arith.constant 0 : index
    %c0_2 = arith.constant 0 : index
    %1 = vector.load %arg2[%c0_1, %c0_2] : memref<576x128xbf16, #tpu.memory_space<vmem>>, vector<576x128xbf16>
    %cst = arith.constant dense<0.000000e+00> : vector<128x128xf32>
    %2 = tpu.matmul %0, %1, %cst {dimension_numbers = #tpu.dot_dimension_numbers<[1], [0], [0], [1], [0, 0, 1, 1], [], []>} : vector<128x576xbf16>, vector<576x128xbf16>, vector<128x128xf32> -> vector<128x128xf32>
    %c0_3 = arith.constant 0 : index
    %c0_4 = arith.constant 0 : index
    %3 = vector.load %arg3[%c0_3, %c0_4] : memref<1x128xf32, #tpu.memory_space<vmem>>, vector<1x128xf32>
    %4 = vector.broadcast %3 : vector<1x128xf32> to vector<128x128xf32>
    %5 = arith.addf %2, %4 : vector<128x128xf32>
    %6 = math.tanh %5 : vector<128x128xf32>
    %7 = arith.truncf %6 : vector<128x128xf32> to vector<128x128xbf16>
    %c0_5 = arith.constant 0 : index
    %c0_6 = arith.constant 0 : index
    %8 = vector.load %arg4[%c0_5, %c0_6] : memref<128x128xbf16, #tpu.memory_space<vmem>>, vector<128x128xbf16>
    tpu.vector_store %arg4[%c0_5, %c0_6], %7 {strides = array<i32>} : memref<128x128xbf16, #tpu.memory_space<vmem>>, vector<128x128xbf16>,
    return
  }
  func.func @transform_0(%arg0: i32) -> (i32, i32) {
    %c0_i32 = arith.constant 0 : i32
    %c0_i32_0 = arith.constant 0 : i32
    return %arg0, %c0_i32 : i32, i32
  }
  func.func @transform_1(%arg0: i32) -> (i32, i32) {
    %c0_i32 = arith.constant 0 : i32
    %c0_i32_0 = arith.constant 0 : i32
    %c0_i32_1 = arith.constant 0 : i32
    return %c0_i32, %c0_i32_0 : i32, i32
  }
  func.func @transform_2(%arg0: i32) -> (i32, i32) {
    %c0_i32 = arith.constant 0 : i32
    %c0_i32_0 = arith.constant 0 : i32
    %c0_i32_1 = arith.constant 0 : i32
    return %c0_i32, %c0_i32_0 : i32, i32
  }
  func.func @transform_3(%arg0: i32) -> (i32, i32) {
    %c0_i32 = arith.constant 0 : i32
    %c0_i32_0 = arith.constant 0 : i32
    return %arg0, %c0_i32 : i32, i32
  }
}

module attributes {stable_mosaic.version = 11 : i64} {
  func.func @_conv_act_kernel(%arg0: i32, %arg1: memref<32x576xbf16, #tpu.memory_space<vmem>>, %arg2: memref<576x64xbf16, #tpu.memory_space<vmem>>, %arg3: memref<1x64xf32, #tpu.memory_space<vmem>>, %arg4: memref<32x64xf32, #tpu.memory_space<vmem>>) attributes {dimension_semantics = [#tpu.dimension_semantics<parallel>], iteration_bounds = array<i64: 1>, scalar_prefetch = 0 : i64, scratch_operands = 0 : i64, tpu.core_type = #tpu.core_type<tc>, window_params = [{transform_indices = @transform_0, window_bounds = array<i64: 32, 576>}, {pipeline_mode = #tpu.pipeline_mode<synchronous>, transform_indices = @transform_1, window_bounds = array<i64: 576, 64>}, {pipeline_mode = #tpu.pipeline_mode<synchronous>, transform_indices = @transform_2, window_bounds = array<i64: 1, 64>}, {transform_indices = @transform_3, window_bounds = array<i64: 32, 64>}]} {
    %c0 = arith.constant 0 : index
    %c0_0 = arith.constant 0 : index
    %0 = vector.load %arg1[%c0, %c0_0] : memref<32x576xbf16, #tpu.memory_space<vmem>>, vector<32x576xbf16>
    %c0_1 = arith.constant 0 : index
    %c0_2 = arith.constant 0 : index
    %1 = vector.load %arg2[%c0_1, %c0_2] : memref<576x64xbf16, #tpu.memory_space<vmem>>, vector<576x64xbf16>
    %cst = arith.constant dense<0.000000e+00> : vector<32x64xf32>
    %2 = tpu.matmul %0, %1, %cst {dimension_numbers = #tpu.dot_dimension_numbers<[1], [0], [0], [1], [0, 0, 1, 1], [], []>} : vector<32x576xbf16>, vector<576x64xbf16>, vector<32x64xf32> -> vector<32x64xf32>
    %c0_3 = arith.constant 0 : index
    %c0_4 = arith.constant 0 : index
    %3 = vector.load %arg3[%c0_3, %c0_4] : memref<1x64xf32, #tpu.memory_space<vmem>>, vector<1x64xf32>
    %4 = vector.broadcast %3 : vector<1x64xf32> to vector<32x64xf32>
    %5 = arith.addf %2, %4 : vector<32x64xf32>
    %6 = math.tanh %5 : vector<32x64xf32>
    %c0_5 = arith.constant 0 : index
    %c0_6 = arith.constant 0 : index
    %7 = vector.load %arg4[%c0_5, %c0_6] : memref<32x64xf32, #tpu.memory_space<vmem>>, vector<32x64xf32>
    tpu.vector_store %arg4[%c0_5, %c0_6], %6 {strides = array<i32>} : memref<32x64xf32, #tpu.memory_space<vmem>>, vector<32x64xf32>,
    return
  }
  func.func @transform_0(%arg0: i32) -> (i32, i32) {
    %c0_i32 = arith.constant 0 : i32
    %c0_i32_0 = arith.constant 0 : i32
    return %arg0, %c0_i32 : i32, i32
  }
  func.func @transform_1(%arg0: i32) -> (i32, i32) {
    %c0_i32 = arith.constant 0 : i32
    %c0_i32_0 = arith.constant 0 : i32
    %c0_i32_1 = arith.constant 0 : i32
    return %c0_i32, %c0_i32_0 : i32, i32
  }
  func.func @transform_2(%arg0: i32) -> (i32, i32) {
    %c0_i32 = arith.constant 0 : i32
    %c0_i32_0 = arith.constant 0 : i32
    %c0_i32_1 = arith.constant 0 : i32
    return %c0_i32, %c0_i32_0 : i32, i32
  }
  func.func @transform_3(%arg0: i32) -> (i32, i32) {
    %c0_i32 = arith.constant 0 : i32
    %c0_i32_0 = arith.constant 0 : i32
    return %arg0, %c0_i32 : i32, i32
  }
}

module attributes {stable_mosaic.version = 11 : i64} {
  func.func @_conv_act_kernel(%arg0: i32, %arg1: memref<32x1600xbf16, #tpu.memory_space<vmem>>, %arg2: memref<1600x64xbf16, #tpu.memory_space<vmem>>, %arg3: memref<1x64xf32, #tpu.memory_space<vmem>>, %arg4: memref<32x64xf32, #tpu.memory_space<vmem>>) attributes {dimension_semantics = [#tpu.dimension_semantics<parallel>], iteration_bounds = array<i64: 1>, scalar_prefetch = 0 : i64, scratch_operands = 0 : i64, tpu.core_type = #tpu.core_type<tc>, window_params = [{transform_indices = @transform_0, window_bounds = array<i64: 32, 1600>}, {pipeline_mode = #tpu.pipeline_mode<synchronous>, transform_indices = @transform_1, window_bounds = array<i64: 1600, 64>}, {pipeline_mode = #tpu.pipeline_mode<synchronous>, transform_indices = @transform_2, window_bounds = array<i64: 1, 64>}, {transform_indices = @transform_3, window_bounds = array<i64: 32, 64>}]} {
    %c0 = arith.constant 0 : index
    %c0_0 = arith.constant 0 : index
    %0 = vector.load %arg1[%c0, %c0_0] : memref<32x1600xbf16, #tpu.memory_space<vmem>>, vector<32x1600xbf16>
    %c0_1 = arith.constant 0 : index
    %c0_2 = arith.constant 0 : index
    %1 = vector.load %arg2[%c0_1, %c0_2] : memref<1600x64xbf16, #tpu.memory_space<vmem>>, vector<1600x64xbf16>
    %cst = arith.constant dense<0.000000e+00> : vector<32x64xf32>
    %2 = tpu.matmul %0, %1, %cst {dimension_numbers = #tpu.dot_dimension_numbers<[1], [0], [0], [1], [0, 0, 1, 1], [], []>} : vector<32x1600xbf16>, vector<1600x64xbf16>, vector<32x64xf32> -> vector<32x64xf32>
    %c0_3 = arith.constant 0 : index
    %c0_4 = arith.constant 0 : index
    %3 = vector.load %arg3[%c0_3, %c0_4] : memref<1x64xf32, #tpu.memory_space<vmem>>, vector<1x64xf32>
    %4 = vector.broadcast %3 : vector<1x64xf32> to vector<32x64xf32>
    %5 = arith.addf %2, %4 : vector<32x64xf32>
    %6 = math.tanh %5 : vector<32x64xf32>
    %c0_5 = arith.constant 0 : index
    %c0_6 = arith.constant 0 : index
    %7 = vector.load %arg4[%c0_5, %c0_6] : memref<32x64xf32, #tpu.memory_space<vmem>>, vector<32x64xf32>
    tpu.vector_store %arg4[%c0_5, %c0_6], %6 {strides = array<i32>} : memref<32x64xf32, #tpu.memory_space<vmem>>, vector<32x64xf32>,
    return
  }
  func.func @transform_0(%arg0: i32) -> (i32, i32) {
    %c0_i32 = arith.constant 0 : i32
    %c0_i32_0 = arith.constant 0 : i32
    return %arg0, %c0_i32 : i32, i32
  }
  func.func @transform_1(%arg0: i32) -> (i32, i32) {
    %c0_i32 = arith.constant 0 : i32
    %c0_i32_0 = arith.constant 0 : i32
    %c0_i32_1 = arith.constant 0 : i32
    return %c0_i32, %c0_i32_0 : i32, i32
  }
  func.func @transform_2(%arg0: i32) -> (i32, i32) {
    %c0_i32 = arith.constant 0 : i32
    %c0_i32_0 = arith.constant 0 : i32
    %c0_i32_1 = arith.constant 0 : i32
    return %c0_i32, %c0_i32_0 : i32, i32
  }
  func.func @transform_3(%arg0: i32) -> (i32, i32) {
    %c0_i32 = arith.constant 0 : i32
    %c0_i32_0 = arith.constant 0 : i32
    return %arg0, %c0_i32 : i32, i32
  }
}

module attributes {stable_mosaic.version = 11 : i64} {
  func.func @_conv_act_kernel(%arg0: i32, %arg1: memref<32x1600xbf16, #tpu.memory_space<vmem>>, %arg2: memref<1600x64xbf16, #tpu.memory_space<vmem>>, %arg3: memref<1x64xf32, #tpu.memory_space<vmem>>, %arg4: memref<32x64xf32, #tpu.memory_space<vmem>>) attributes {dimension_semantics = [#tpu.dimension_semantics<parallel>], iteration_bounds = array<i64: 1>, scalar_prefetch = 0 : i64, scratch_operands = 0 : i64, tpu.core_type = #tpu.core_type<tc>, window_params = [{transform_indices = @transform_0, window_bounds = array<i64: 32, 1600>}, {pipeline_mode = #tpu.pipeline_mode<synchronous>, transform_indices = @transform_1, window_bounds = array<i64: 1600, 64>}, {pipeline_mode = #tpu.pipeline_mode<synchronous>, transform_indices = @transform_2, window_bounds = array<i64: 1, 64>}, {transform_indices = @transform_3, window_bounds = array<i64: 32, 64>}]} {
    %c0 = arith.constant 0 : index
    %c0_0 = arith.constant 0 : index
    %0 = vector.load %arg1[%c0, %c0_0] : memref<32x1600xbf16, #tpu.memory_space<vmem>>, vector<32x1600xbf16>
    %c0_1 = arith.constant 0 : index
    %c0_2 = arith.constant 0 : index
    %1 = vector.load %arg2[%c0_1, %c0_2] : memref<1600x64xbf16, #tpu.memory_space<vmem>>, vector<1600x64xbf16>
    %cst = arith.constant dense<0.000000e+00> : vector<32x64xf32>
    %2 = tpu.matmul %0, %1, %cst {dimension_numbers = #tpu.dot_dimension_numbers<[1], [0], [0], [1], [0, 0, 1, 1], [], []>} : vector<32x1600xbf16>, vector<1600x64xbf16>, vector<32x64xf32> -> vector<32x64xf32>
    %c0_3 = arith.constant 0 : index
    %c0_4 = arith.constant 0 : index
    %3 = vector.load %arg3[%c0_3, %c0_4] : memref<1x64xf32, #tpu.memory_space<vmem>>, vector<1x64xf32>
    %4 = vector.broadcast %3 : vector<1x64xf32> to vector<32x64xf32>
    %5 = arith.addf %2, %4 : vector<32x64xf32>
    %c0_5 = arith.constant 0 : index
    %c0_6 = arith.constant 0 : index
    %6 = vector.load %arg4[%c0_5, %c0_6] : memref<32x64xf32, #tpu.memory_space<vmem>>, vector<32x64xf32>
    tpu.vector_store %arg4[%c0_5, %c0_6], %5 {strides = array<i32>} : memref<32x64xf32, #tpu.memory_space<vmem>>, vector<32x64xf32>,
    return
  }
  func.func @transform_0(%arg0: i32) -> (i32, i32) {
    %c0_i32 = arith.constant 0 : i32
    %c0_i32_0 = arith.constant 0 : i32
    return %arg0, %c0_i32 : i32, i32
  }
  func.func @transform_1(%arg0: i32) -> (i32, i32) {
    %c0_i32 = arith.constant 0 : i32
    %c0_i32_0 = arith.constant 0 : i32
    %c0_i32_1 = arith.constant 0 : i32
    return %c0_i32, %c0_i32_0 : i32, i32
  }
  func.func @transform_2(%arg0: i32) -> (i32, i32) {
    %c0_i32 = arith.constant 0 : i32
    %c0_i32_0 = arith.constant 0 : i32
    %c0_i32_1 = arith.constant 0 : i32
    return %c0_i32, %c0_i32_0 : i32, i32
  }
  func.func @transform_3(%arg0: i32) -> (i32, i32) {
    %c0_i32 = arith.constant 0 : i32
    %c0_i32_0 = arith.constant 0 : i32
    return %arg0, %c0_i32 : i32, i32
  }
}

module attributes {stable_mosaic.version = 11 : i64} {
  func.func @_linear_softmax_kernel(%arg0: memref<2x1344xf32, #tpu.memory_space<vmem>>, %arg1: memref<1344x128xf32, #tpu.memory_space<vmem>>, %arg2: memref<1x128xf32, #tpu.memory_space<vmem>>, %arg3: memref<2x128xf32, #tpu.memory_space<vmem>>) attributes {dimension_semantics = [], scalar_prefetch = 0 : i64, scratch_operands = 0 : i64, tpu.core_type = #tpu.core_type<tc>} {
    %c0 = arith.constant 0 : index
    %c0_0 = arith.constant 0 : index
    %0 = vector.load %arg0[%c0, %c0_0] : memref<2x1344xf32, #tpu.memory_space<vmem>>, vector<2x1344xf32>
    %c0_1 = arith.constant 0 : index
    %c0_2 = arith.constant 0 : index
    %1 = vector.load %arg1[%c0_1, %c0_2] : memref<1344x128xf32, #tpu.memory_space<vmem>>, vector<1344x128xf32>
    %cst = arith.constant dense<0.000000e+00> : vector<2x128xf32>
    %2 = tpu.matmul %0, %1, %cst {dimension_numbers = #tpu.dot_dimension_numbers<[1], [0], [0], [1], [0, 0, 1, 1], [], []>} : vector<2x1344xf32>, vector<1344x128xf32>, vector<2x128xf32> -> vector<2x128xf32>
    %c0_3 = arith.constant 0 : index
    %c0_4 = arith.constant 0 : index
    %3 = vector.load %arg2[%c0_3, %c0_4] : memref<1x128xf32, #tpu.memory_space<vmem>>, vector<1x128xf32>
    %4 = vector.broadcast %3 : vector<1x128xf32> to vector<2x128xf32>
    %5 = arith.addf %2, %4 : vector<2x128xf32>
    %cst_5 = arith.constant dense<0xFF800000> : vector<2xf32>
    %6 = vector.multi_reduction <maximumf>, %5, %cst_5 [1] : vector<2x128xf32> to vector<2xf32>
    %7 = vector.shape_cast %6 : vector<2xf32> to vector<2x1xf32>
    %8 = vector.broadcast %7 : vector<2x1xf32> to vector<2x128xf32>
    %9 = arith.subf %5, %8 : vector<2x128xf32>
    %10 = math.exp %9 : vector<2x128xf32>
    %cst_6 = arith.constant dense<0.000000e+00> : vector<2xf32>
    %11 = vector.multi_reduction <add>, %10, %cst_6 [1] : vector<2x128xf32> to vector<2xf32>
    %12 = vector.shape_cast %11 : vector<2xf32> to vector<2x1xf32>
    %13 = vector.broadcast %12 : vector<2x1xf32> to vector<2x128xf32>
    %14 = arith.divf %10, %13 : vector<2x128xf32>
    %c0_7 = arith.constant 0 : index
    %c0_8 = arith.constant 0 : index
    %15 = vector.load %arg3[%c0_7, %c0_8] : memref<2x128xf32, #tpu.memory_space<vmem>>, vector<2x128xf32>
    tpu.vector_store %arg3[%c0_7, %c0_8], %14 {strides = array<i32>} : memref<2x128xf32, #tpu.memory_space<vmem>>, vector<2x128xf32>,
    return
  }
}

</mosaic_0001>

<bundles_post_ra>
// kernel: reverse.1
= control target key start
LH: loop header
LB: loop body
LE: loop exit
PB: predicated region body
PF: predicated region fallthrough
CT: control target
= control target key end

     0   :  { %s2022_s6 = smov 0   ;;  %s2024_s7 = smov 0   ;;  %s2295_s0 = inlined_call_operand.vmem [shape: bf16[5,5,64,1600], index: 0, kind: input, shape index: {}]   ;;  %s2296_s1 = inlined_call_operand.vmem [shape: bf16[5,5,64,1600], index: 1, kind: output, shape index: {}]  }
   0x1   :  { %s2026_s8 = smov 0   ;;  %s2028_s9 = smov 0  }
   0x2   :  { %s2030_s10 = smov 0   ;;  %s2032_s11 = smov 0  }
   0x3   :  { %s2034_s12 = smov 0   ;;  %s2036_s13 = smov 0  }
   0x4   :  { %s2038_s14 = smov 0   ;;  %s2040_s15 = smov 0  }
   0x5   :  { %s2042_s16 = smov 0   ;;  %s2044_s17 = smov 0  }
   0x6   :  { %s2046_s18 = smov 0  }
   0x7 LB: > { %s65_s19 = sadd.s32 1, %s2002_s16  ;;  %s73_s20 = sadd.s32 1, %s2006_s17  ;;  %s2010_s18 = sphi %s2046_s18, %s7_s18   ;;  %s2006_s17 = sphi %s2044_s17, %s2310_s17   ;;  %s2002_s16 = sphi %s2042_s16, %s2309_s16   ;;  %s1998_s15 = sphi %s2040_s15, %s2308_s15   ;;  %s1994_s14 = sphi %s2038_s14, %s2307_s14   ;;  %s1990_s13 = sphi %s2036_s13, %s2306_s13   ;;  %s1986_s12 = sphi %s2034_s12, %s2305_s12   ;;  %s1982_s11 = sphi %s2032_s11, %s2304_s11   ;;  %s1978_s10 = sphi %s2030_s10, %s2303_s10   ;;  %s1974_s9 = sphi %s2028_s9, %s2302_s9   ;;  %s1970_s8 = sphi %s2026_s8, %s2301_s8   ;;  %s1966_s7 = sphi %s2024_s7, %s2300_s7   ;;  %s1962_s6 = sphi %s2022_s6, %s2299_s6  }
   0x8   : > { %p67_p0 = scmp.ge.s32.totalorder %s65_s19, 4  ;;  %p1294_p1 = scmp.ge.s32.totalorder %s2010_s18, 5 }
   0x9   : > { %p115_p2 = scmp.lt.s32.totalorder %s2010_s18, 25 }
   0xa   : > { %s2312_s19 = smov (%p67_p0, %s65_s19), 0  ;;  %s2314_s20 = smov (!%p67_p0, %s73_s20), %s2006_s17 }
   0xb   : > { %p116_p3 = pnand %p1294_p1, %p115_p2  ;;  %p75_p4 = scmp.ge.s32.totalorder %s2314_s20, 5 }
   0xc   : > { %s164_s21 = ssub.s32 (!%p116_p3), 4, %s1966_s7  ;;  %s1295_s22 = sshll.u32 (!%p116_p3), %s1962_s6, 1 }
   0xd   : > { %s2316_s20 = smov (%p75_p4, %s2314_s20), 0  ;;  %119 = sbr.rel (%p116_p3) target bundleno = 96 (0x60), region = 20 }
   0xe   : > { %p169_p5 = scmp.lt.s32.totalorder (!%p116_p3), %s164_s21, 4  ;;  %p173_p6 = scmp.lt.s32.totalorder (!%p116_p3), %s1295_s22, 7 }
   0xf   : > { %p193_p7 = scmp.lt.s32.totalorder (!%p116_p3), %s1966_s7, 4 }
  0x12   : > { %s2318_s21 = smov (!%p169_p5, %s164_s21), 4  ;;  %s2320_s22 = smov (!%p173_p6, %s1295_s22), 7 }
  0x13   : > { %s1802_s23 = smul.u32 520, %s2318_s21  ;;  %s2322_s7 = smov (!%p193_p7, %s1966_s7), 4 }
  0x14   : > { %s1801_s24 = smul.u32 13, %s2320_s22 }
  0x15   : > { %s1803_s27 = smul.u32 520, %s2322_s7 }
  0x16   : > { %s182_s25 = sadd.s32 %s1802_s23, %s1801_s24 }
  0x17   : > { %s1296_s26 = sshll.u32 %s182_s25, 2  ;;  %s206_s2 = sadd.s32 %s1803_s27, %s1801_s24 }
  0x18   : > { %s2103_s30 = scalar_lea.vmem %s2295_s0, %s1296_s26  ;;  %s1298_s3 = sshll.u32 %s206_s2, 2 }
  0x19   : > { %v1741_v0 = vld [vmem:[%s2103_s30 + $0x680] sm:$0xff]  ;;  %s2111_s6 = scalar_lea.vmem %s2296_s1, %s1298_s3  ;;  %v1746_v5 = vld [vmem:[%s2103_s30 + $0x6b4] sm:$0xff]  ;;  %v1751_v10 = vld [vmem:[%s2103_s30 + $0x688] sm:$0xff] }
  0x1a   : > { %v1742_v1 = vld [vmem:[%s2103_s30 + $0x4e0] sm:$0xff]  ;;  %1314 = vst [vmem:[%s2111_s6] sm:$0xff] %v1741_v0  ;;  %v1747_v6 = vld [vmem:[%s2103_s30 + $0x514] sm:$0xff]  ;;  %v1752_v11 = vld [vmem:[%s2103_s30 + $0x4e8] sm:$0xff] }
  0x1b   : > { %v1743_v2 = vld [vmem:[%s2103_s30 + $0x340] sm:$0xff]  ;;  %1320 = vst [vmem:[%s2111_s6 + $0x1a0] sm:$0xff] %v1742_v1  ;;  %v1748_v7 = vld [vmem:[%s2103_s30 + $0x374] sm:$0xff]  ;;  %v1753_v12 = vld [vmem:[%s2103_s30 + $0x348] sm:$0xff] }
  0x1c   : > { %v1744_v3 = vld [vmem:[%s2103_s30 + $0x1a0] sm:$0xff]  ;;  %1326 = vst [vmem:[%s2111_s6 + $0x340] sm:$0xff] %v1743_v2  ;;  %v1749_v8 = vld [vmem:[%s2103_s30 + $0x1d4] sm:$0xff]  ;;  %v1754_v13 = vld [vmem:[%s2103_s30 + $0x1a8] sm:$0xff] }
  0x1d   : > { %v1745_v4 = vld [vmem:[%s2103_s30] sm:$0xff]  ;;  %1332 = vst [vmem:[%s2111_s6 + $0x4e0] sm:$0xff] %v1744_v3  ;;  %v1750_v9 = vld [vmem:[%s2103_s30 + $0x34] sm:$0xff]  ;;  %v1755_v14 = vld [vmem:[%s2103_s30 + $0x8] sm:$0xff] }
  0x1e   : > { %1338 = vst [vmem:[%s2111_s6 + $0x680] sm:$0xff] %v1745_v4  ;;  %v1756_v15 = vld [vmem:[%s2103_s30 + $0x6bc] sm:$0xff]  ;;  %v1761_v20 = vld [vmem:[%s2103_s30 + $0x690] sm:$0xff]  ;;  %v1766_v25 = vld [vmem:[%s2103_s30 + $0x6c4] sm:$0xff] }
  0x1f   : > { %1344 = vst [vmem:[%s2111_s6 + $0x34] sm:$0xff] %v1746_v5  ;;  %v1757_v16 = vld [vmem:[%s2103_s30 + $0x51c] sm:$0xff]  ;;  %v1762_v21 = vld [vmem:[%s2103_s30 + $0x4f0] sm:$0xff]  ;;  %v1767_v26 = vld [vmem:[%s2103_s30 + $0x524] sm:$0xff] }
  0x20   : > { %1350 = vst [vmem:[%s2111_s6 + $0x1d4] sm:$0xff] %v1747_v6  ;;  %v1758_v17 = vld [vmem:[%s2103_s30 + $0x37c] sm:$0xff]  ;;  %v1763_v22 = vld [vmem:[%s2103_s30 + $0x350] sm:$0xff]  ;;  %v1768_v27 = vld [vmem:[%s2103_s30 + $0x384] sm:$0xff] }
  0x21   : > { %1356 = vst [vmem:[%s2111_s6 + $0x374] sm:$0xff] %v1748_v7  ;;  %v1759_v18 = vld [vmem:[%s2103_s30 + $0x1dc] sm:$0xff]  ;;  %v1764_v23 = vld [vmem:[%s2103_s30 + $0x1b0] sm:$0xff]  ;;  %v1769_v28 = vld [vmem:[%s2103_s30 + $0x1e4] sm:$0xff] }
  0x22   : > { %1362 = vst [vmem:[%s2111_s6 + $0x514] sm:$0xff] %v1749_v8  ;;  %v1760_v19 = vld [vmem:[%s2103_s30 + $0x3c] sm:$0xff]  ;;  %v1765_v24 = vld [vmem:[%s2103_s30 + $0x10] sm:$0xff]  ;;  %v1770_v29 = vld [vmem:[%s2103_s30 + $0x44] sm:$0xff] }
  0x23   : > { %1368 = vst [vmem:[%s2111_s6 + $0x6b4] sm:$0xff] %v1750_v9  ;;  %v1771_v30 = vld [vmem:[%s2103_s30 + $0x698] sm:$0xff]  ;;  %v1776_v35 = vld [vmem:[%s2103_s30 + $0x6cc] sm:$0xff]  ;;  %v1781_v40 = vld [vmem:[%s2103_s30 + $0x6a0] sm:$0xff] }
  0x24   : > { %1384 = vst [vmem:[%s2111_s6 + $0x8] sm:$0xff] %v1751_v10  ;;  %v1772_v31 = vld [vmem:[%s2103_s30 + $0x4f8] sm:$0xff]  ;;  %v1777_v36 = vld [vmem:[%s2103_s30 + $0x52c] sm:$0xff]  ;;  %v1782_v41 = vld [vmem:[%s2103_s30 + $0x500] sm:$0xff] }
  0x25   : > { %1390 = vst [vmem:[%s2111_s6 + $0x1a8] sm:$0xff] %v1752_v11  ;;  %v1773_v32 = vld [vmem:[%s2103_s30 + $0x358] sm:$0xff]  ;;  %v1778_v37 = vld [vmem:[%s2103_s30 + $0x38c] sm:$0xff]  ;;  %v1783_v42 = vld [vmem:[%s2103_s30 + $0x360] sm:$0xff] }
  0x26   : > { %1396 = vst [vmem:[%s2111_s6 + $0x348] sm:$0xff] %v1753_v12  ;;  %v1774_v33 = vld [vmem:[%s2103_s30 + $0x1b8] sm:$0xff]  ;;  %v1779_v38 = vld [vmem:[%s2103_s30 + $0x1ec] sm:$0xff]  ;;  %v1784_v43 = vld [vmem:[%s2103_s30 + $0x1c0] sm:$0xff] }
  0x27   : > { %1402 = vst [vmem:[%s2111_s6 + $0x4e8] sm:$0xff] %v1754_v13  ;;  %v1775_v34 = vld [vmem:[%s2103_s30 + $0x18] sm:$0xff]  ;;  %v1780_v39 = vld [vmem:[%s2103_s30 + $0x4c] sm:$0xff]  ;;  %v1785_v44 = vld [vmem:[%s2103_s30 + $0x20] sm:$0xff] }
  0x28   : > { %1408 = vst [vmem:[%s2111_s6 + $0x688] sm:$0xff] %v1755_v14  ;;  %v1786_v45 = vld [vmem:[%s2103_s30 + $0x6d4] sm:$0xff]  ;;  %v1791_v50 = vld [vmem:[%s2103_s30 + $0x6a8] sm:$0xff]  ;;  %v1796_v55 = vld [vmem:[%s2103_s30 + $0x6dc] sm:$0xff] }
  0x29   : > { %1414 = vst [vmem:[%s2111_s6 + $0x3c] sm:$0xff] %v1756_v15  ;;  %v1787_v46 = vld [vmem:[%s2103_s30 + $0x534] sm:$0xff]  ;;  %v1792_v51 = vld [vmem:[%s2103_s30 + $0x508] sm:$0xff]  ;;  %v1797_v56 = vld [vmem:[%s2103_s30 + $0x53c] sm:$0xff] }
  0x2a   : > { %1420 = vst [vmem:[%s2111_s6 + $0x1dc] sm:$0xff] %v1757_v16  ;;  %v1788_v47 = vld [vmem:[%s2103_s30 + $0x394] sm:$0xff]  ;;  %v1793_v52 = vld [vmem:[%s2103_s30 + $0x368] sm:$0xff]  ;;  %v1798_v57 = vld [vmem:[%s2103_s30 + $0x39c] sm:$0xff] }
  0x2b   : > { %1426 = vst [vmem:[%s2111_s6 + $0x37c] sm:$0xff] %v1758_v17  ;;  %v1789_v48 = vld [vmem:[%s2103_s30 + $0x1f4] sm:$0xff]  ;;  %v1794_v53 = vld [vmem:[%s2103_s30 + $0x1c8] sm:$0xff]  ;;  %v1799_v58 = vld [vmem:[%s2103_s30 + $0x1fc] sm:$0xff] }
  0x2c   : > { %1432 = vst [vmem:[%s2111_s6 + $0x51c] sm:$0xff] %v1759_v18  ;;  %v1790_v49 = vld [vmem:[%s2103_s30 + $0x54] sm:$0xff]  ;;  %v1795_v54 = vld [vmem:[%s2103_s30 + $0x28] sm:$0xff]  ;;  %v1800_v59 = vld [vmem:[%s2103_s30 + $0x5c] sm:$0xff] }
  0x2d   : > { %1438 = vst [vmem:[%s2111_s6 + $0x6bc] sm:$0xff] %v1760_v19  ;;  %v1719_v60 = vld [vmem:[%s2103_s30 + $0x6b0] sm:$0xf]  ;;  %v1729_v1 = vld [vmem:[%s2103_s30 + $0x6e4] sm:$0xf] }
  0x2e   : > { %1454 = vst [vmem:[%s2111_s6 + $0x10] sm:$0xff] %v1761_v20  ;;  %v1721_v61 = vld [vmem:[%s2103_s30 + $0x510] sm:$0xf]  ;;  %v1731_v2 = vld [vmem:[%s2103_s30 + $0x544] sm:$0xf] }
  0x2f   : > { %1460 = vst [vmem:[%s2111_s6 + $0x1b0] sm:$0xff] %v1762_v21  ;;  %v1723_v62 = vld [vmem:[%s2103_s30 + $0x370] sm:$0xf]  ;;  %v1733_v3 = vld [vmem:[%s2103_s30 + $0x3a4] sm:$0xf] }
  0x30   : > { %1466 = vst [vmem:[%s2111_s6 + $0x350] sm:$0xff] %v1763_v22  ;;  %v1725_v63 = vld [vmem:[%s2103_s30 + $0x1d0] sm:$0xf]  ;;  %v1735_v4 = vld [vmem:[%s2103_s30 + $0x204] sm:$0xf] }
  0x31   : > { %1472 = vst [vmem:[%s2111_s6 + $0x4f0] sm:$0xff] %v1764_v23  ;;  %v1727_v0 = vld [vmem:[%s2103_s30 + $0x30] sm:$0xf]  ;;  %v1737_v5 = vld [vmem:[%s2103_s30 + $0x64] sm:$0xf] }
  0x32   : > { %1478 = vst [vmem:[%s2111_s6 + $0x690] sm:$0xff] %v1765_v24 }
  0x33   : > { %1484 = vst [vmem:[%s2111_s6 + $0x44] sm:$0xff] %v1766_v25 }
  0x34   : > { %1490 = vst [vmem:[%s2111_s6 + $0x1e4] sm:$0xff] %v1767_v26 }
  0x35   : > { %1496 = vst [vmem:[%s2111_s6 + $0x384] sm:$0xff] %v1768_v27 }
  0x36   : > { %1502 = vst [vmem:[%s2111_s6 + $0x524] sm:$0xff] %v1769_v28 }
  0x37   : > { %1508 = vst [vmem:[%s2111_s6 + $0x6c4] sm:$0xff] %v1770_v29 }
  0x38   : > { %1524 = vst [vmem:[%s2111_s6 + $0x18] sm:$0xff] %v1771_v30 }
  0x39   : > { %1530 = vst [vmem:[%s2111_s6 + $0x1b8] sm:$0xff] %v1772_v31 }
  0x3a   : > { %1536 = vst [vmem:[%s2111_s6 + $0x358] sm:$0xff] %v1773_v32 }
  0x3b   : > { %1542 = vst [vmem:[%s2111_s6 + $0x4f8] sm:$0xff] %v1774_v33 }
  0x3c   : > { %1548 = vst [vmem:[%s2111_s6 + $0x698] sm:$0xff] %v1775_v34 }
  0x3d   : > { %1554 = vst [vmem:[%s2111_s6 + $0x4c] sm:$0xff] %v1776_v35 }
  0x3e   : > { %1560 = vst [vmem:[%s2111_s6 + $0x1ec] sm:$0xff] %v1777_v36 }
  0x3f   : > { %1566 = vst [vmem:[%s2111_s6 + $0x38c] sm:$0xff] %v1778_v37 }
  0x40   : > { %1572 = vst [vmem:[%s2111_s6 + $0x52c] sm:$0xff] %v1779_v38 }
  0x41   : > { %1578 = vst [vmem:[%s2111_s6 + $0x6cc] sm:$0xff] %v1780_v39 }
  0x42   : > { %1594 = vst [vmem:[%s2111_s6 + $0x20] sm:$0xff] %v1781_v40 }
  0x43   : > { %1600 = vst [vmem:[%s2111_s6 + $0x1c0] sm:$0xff] %v1782_v41 }
  0x44   : > { %1606 = vst [vmem:[%s2111_s6 + $0x360] sm:$0xff] %v1783_v42 }
  0x45   : > { %1612 = vst [vmem:[%s2111_s6 + $0x500] sm:$0xff] %v1784_v43 }
  0x46   : > { %1618 = vst [vmem:[%s2111_s6 + $0x6a0] sm:$0xff] %v1785_v44 }
  0x47   : > { %1624 = vst [vmem:[%s2111_s6 + $0x54] sm:$0xff] %v1786_v45 }
  0x48   : > { %1630 = vst [vmem:[%s2111_s6 + $0x1f4] sm:$0xff] %v1787_v46 }
  0x49   : > { %1636 = vst [vmem:[%s2111_s6 + $0x394] sm:$0xff] %v1788_v47 }
  0x4a   : > { %1642 = vst [vmem:[%s2111_s6 + $0x534] sm:$0xff] %v1789_v48 }
  0x4b   : > { %1648 = vst [vmem:[%s2111_s6 + $0x6d4] sm:$0xff] %v1790_v49 }
  0x4c   : > { %1664 = vst [vmem:[%s2111_s6 + $0x28] sm:$0xff] %v1791_v50 }
  0x4d   : > { %1670 = vst [vmem:[%s2111_s6 + $0x1c8] sm:$0xff] %v1792_v51 }
  0x4e   : > { %1676 = vst [vmem:[%s2111_s6 + $0x368] sm:$0xff] %v1793_v52 }
  0x4f   : > { %1682 = vst [vmem:[%s2111_s6 + $0x508] sm:$0xff] %v1794_v53 }
  0x50   : > { %1688 = vst [vmem:[%s2111_s6 + $0x6a8] sm:$0xff] %v1795_v54 }
  0x51   : > { %1694 = vst [vmem:[%s2111_s6 + $0x5c] sm:$0xff] %v1796_v55 }
  0x52   : > { %1700 = vst [vmem:[%s2111_s6 + $0x1fc] sm:$0xff] %v1797_v56 }
  0x53   : > { %1706 = vst [vmem:[%s2111_s6 + $0x39c] sm:$0xff] %v1798_v57 }
  0x54   : > { %1712 = vst [vmem:[%s2111_s6 + $0x53c] sm:$0xff] %v1799_v58 }
  0x55   : > { %1718 = vst [vmem:[%s2111_s6 + $0x6dc] sm:$0xff] %v1800_v59 }
  0x56   : > { %1720 = vst [vmem:[%s2111_s6 + $0x30] sm:$0xf] %v1719_v60 }
  0x57   : > { %1722 = vst [vmem:[%s2111_s6 + $0x1d0] sm:$0xf] %v1721_v61 }
  0x58   : > { %1724 = vst [vmem:[%s2111_s6 + $0x370] sm:$0xf] %v1723_v62 }
  0x59   : > { %1726 = vst [vmem:[%s2111_s6 + $0x510] sm:$0xf] %v1725_v63 }
  0x5a   : > { %1728 = vst [vmem:[%s2111_s6 + $0x6b0] sm:$0xf] %v1727_v0 }
  0x5b   : > { %1730 = vst [vmem:[%s2111_s6 + $0x64] sm:$0xf] %v1729_v1 }
  0x5c   : > { %1732 = vst [vmem:[%s2111_s6 + $0x204] sm:$0xf] %v1731_v2 }
  0x5d   : > { %1734 = vst [vmem:[%s2111_s6 + $0x3a4] sm:$0xf] %v1733_v3 }
  0x5e   : > { %1736 = vst [vmem:[%s2111_s6 + $0x544] sm:$0xf] %v1735_v4 }
  0x5f   : > { %1738 = vst [vmem:[%s2111_s6 + $0x6e4] sm:$0xf] %v1737_v5 }
  0x60 PF: > { %s7_s18 = sadd.s32 1, %s2010_s18   ;;  %s2299_s6 = smov %s1970_s8 }
  0x61   : > { %p2251_p8 = scmp.ge.s32.totalorder %s7_s18, 30   ;;  %s2300_s7 = smov %s1974_s9 }
  0x62   : > { %s2301_s8 = smov %s1978_s10  ;;  %s2302_s9 = smov %s1982_s11 }
  0x63   : > { %s2303_s10 = smov %s1986_s12  ;;  %s2304_s11 = smov %s1990_s13 }
  0x64   : > { %s2305_s12 = smov %s1994_s14  ;;  %s2306_s13 = smov %s1998_s15 }
  0x65   : > { %s2307_s14 = smov %s2002_s16  ;;  %s2308_s15 = smov %s2006_s17 }
  0x66   : > { %s2309_s16 = smov %s2312_s19  ;;  %s2310_s17 = smov %s2316_s20 }
  0x67   :  { %6 = sbr.rel (!%p2251_p8) target bundleno = 7 (0x7), region = 359 }

// kernel: my_model_forward.6
= control target key start
LH: loop header
LB: loop body
LE: loop exit
PB: predicated region body
PF: predicated region fallthrough
CT: control target
= control target key end

     0   :  { %s999_s12 = smov 0   ;;  %s1136_s0 = inlined_call_operand.vmem [shape: bf16[512,108], index: 0, kind: input, shape index: {}]   ;;  %s1137_s1 = inlined_call_operand.vmem [shape: bf16[108,128], index: 1, kind: input, shape index: {}]   ;;  %s1138_s2 = inlined_call_operand.vmem [shape: f32[1,128], index: 2, kind: input, shape index: {}]   ;;  %s1139_s3 = inlined_call_operand.vmem [shape: bf16[512,128], index: 3, kind: output, shape index: {}]  }
   0x1 LB: > { %s640_s13 = sadd.s32 4294967295, %s977_s12   ;;  %p644_p0 = scmp.ge.s32.totalorder %s977_s12, 1  ;;  %s977_s12 = sphi %s999_s12, %s13_s12  }
   0x2   : > { %p138_p1 = scmp.lt.s32.totalorder %s977_s12, 3 }
   0x4   : > { %p139_p2 = pnand %p644_p0, %p138_p1 }
   0x5   : > { %s645_s22 = sshll.u32 (!%p139_p2), %s640_s13, 5 }
   0x6   : > { %142 = sbr.rel (%p139_p2) target bundleno = 244 (0xf4), region = 32  ;;  %p163_p3 = scmp.lt.s32.totalorder (!%p139_p2), %s645_s22, 63 }
   0xb   : > { %v739_v0 = vld [vmem:[%s1137_s1 + $0x30] sm:$0xf]  ;;  %v781_v1 = vld [vmem:[%s1137_s1 + $0x30] sm:$0x30]  ;;  %vm395_vm0 = vcmask 1045504   ;;  %v780_v4 = vld [vmem:[%s1137_s1 + $0x28] sm:$0xff] }
   0xc   : > { %v740_v2 = vor.u32 %v781_v1, %v739_v0  ;;  %v779_v5 = vld [vmem:[%s1137_s1 + $0x20] sm:$0xff]  ;;  %v778_v6 = vld [vmem:[%s1137_s1 + $0x18] sm:$0xff]  ;;  %v777_v7 = vld [vmem:[%s1137_s1 + $0x10] sm:$0xff]  ;;  %s1141_s22 = smov (!%p163_p3, %s645_s22), 63  ;;  %vm346_vm1 = vcmask 883712  }
   0xd   : > { %v776_v8 = vld [vmem:[%s1137_s1 + $0x8] sm:$0xff]  ;;  %s646_s29 = sshll.u32 %s1141_s22, 2  ;;  %v775_v9 = vld [vmem:[%s1137_s1] sm:$0xff] }
   0xe   : > { %v397_v3 = vsel %vm395_vm0, %v740_v2, 0  ;;  %s1039_s7 = scalar_lea.vmem %s1136_s0, %s646_s29  ;;  %v1076_v28 = vld [vmem:[%s1138_s2] ss:$0 sm:$0xff]  ;;  %s1091_s13 = scalar_lea.vmem %s1139_s3, %s646_s29 }
   0xf   : > { %400 = vmatpush.bf16.msra.mxu0 %v397_v3  ;;  %877 = vmatpush.bf16.msra.mxu1 %v397_v3  ;;  %v759_v10 = vld [vmem:[%s1039_s7] sm:$0xff]  ;;  %v760_v14 = vld [vmem:[%s1039_s7 + $0x8] sm:$0xff]  ;;  %v761_v18 = vld [vmem:[%s1039_s7 + $0x10] sm:$0xff] }
  0x10   : > { %878 = vmatpush.bf16.msra.mxu2 %v397_v3  ;;  %879 = vmatpush.bf16.msra.mxu3 %v397_v3  ;;  %v763_v11 = vld [vmem:[%s1039_s7 + $0x20] sm:$0xff]  ;;  %v764_v15 = vld [vmem:[%s1039_s7 + $0x28] sm:$0xff]  ;;  %v765_v19 = vld [vmem:[%s1039_s7 + $0x30] sm:$0xff] }
  0x11   : > { %v767_v12 = vld [vmem:[%s1039_s7 + $0x40] sm:$0xff]  ;;  %v768_v16 = vld [vmem:[%s1039_s7 + $0x48] sm:$0xff]  ;;  %v769_v20 = vld [vmem:[%s1039_s7 + $0x50] sm:$0xff] }
  0x12   : > { %v771_v13 = vld [vmem:[%s1039_s7 + $0x60] sm:$0xff]  ;;  %v772_v17 = vld [vmem:[%s1039_s7 + $0x68] sm:$0xff]  ;;  %v773_v21 = vld [vmem:[%s1039_s7 + $0x70] sm:$0xff] }
  0x13   : > { %401 = vmatpush.bf16.msra.mxu0 %v780_v4  ;;  %880 = vmatpush.bf16.msra.mxu1 %v780_v4  ;;  %v762_v22 = vld [vmem:[%s1039_s7 + $0x18] sm:$0xff] }
  0x14   : > { %881 = vmatpush.bf16.msra.mxu2 %v780_v4  ;;  %882 = vmatpush.bf16.msra.mxu3 %v780_v4  ;;  %v766_v23 = vld [vmem:[%s1039_s7 + $0x38] sm:$0xff] }
  0x15   : > { %v770_v24 = vld [vmem:[%s1039_s7 + $0x58] sm:$0xff] }
  0x16   : > { %v774_v25 = vld [vmem:[%s1039_s7 + $0x78] sm:$0xff] }
  0x17   : > { %402 = vmatpush.bf16.msra.mxu0 %v779_v5  ;;  %883 = vmatpush.bf16.msra.mxu1 %v779_v5 }
  0x18   : > { %884 = vmatpush.bf16.msra.mxu2 %v779_v5  ;;  %885 = vmatpush.bf16.msra.mxu3 %v779_v5 }
  0x1b   : > { %403 = vmatpush.bf16.msra.mxu0 %v778_v6  ;;  %886 = vmatpush.bf16.msra.mxu1 %v778_v6 }
  0x1c   : > { %887 = vmatpush.bf16.msra.mxu2 %v778_v6  ;;  %888 = vmatpush.bf16.msra.mxu3 %v778_v6 }
  0x1f   : > { %404 = vmatpush.bf16.msra.mxu0 %v777_v7  ;;  %889 = vmatpush.bf16.msra.mxu1 %v777_v7 }
  0x20   : > { %890 = vmatpush.bf16.msra.mxu2 %v777_v7  ;;  %891 = vmatpush.bf16.msra.mxu3 %v777_v7 }
  0x23   : > { %405 = vmatpush.bf16.msra.mxu0 %v776_v8  ;;  %892 = vmatpush.bf16.msra.mxu1 %v776_v8 }
  0x24   : > { %893 = vmatpush.bf16.msra.mxu2 %v776_v8  ;;  %894 = vmatpush.bf16.msra.mxu3 %v776_v8 }
  0x27   : > { %406 = vmatpush.bf16.msra.mxu0 %v775_v9  ;;  %895 = vmatpush.bf16.msra.mxu1 %v775_v9 }
  0x28   : > { %896 = vmatpush.bf16.msra.mxu2 %v775_v9  ;;  %897 = vmatpush.bf16.msra.mxu3 %v775_v9 }
  0x2a   : > { %741 = vmatmul.msk.bf16.vlgmr.msra.gmra.mxu0 %vm346_vm1, %v759_v10  ;;  %745 = vmatmul.msk.bf16.vlgmr.msra.gmra.mxu1 %vm346_vm1, %v763_v11 }
  0x2b   : > { %749 = vmatmul.msk.bf16.vlgmr.msra.gmra.mxu2 %vm346_vm1, %v767_v12  ;;  %753 = vmatmul.msk.bf16.vlgmr.msra.gmra.mxu3 %vm346_vm1, %v771_v13 }
  0x3a   : > { %742 = vmatmul.msk.bf16.gmra.mxu0 %vm346_vm1, %v760_v14  ;;  %746 = vmatmul.msk.bf16.gmra.mxu1 %vm346_vm1, %v764_v15 }
  0x3b   : > { %750 = vmatmul.msk.bf16.gmra.mxu2 %vm346_vm1, %v768_v16  ;;  %754 = vmatmul.msk.bf16.gmra.mxu3 %vm346_vm1, %v772_v17 }
  0x4a   : > { %743 = vmatmul.msk.bf16.gmra.mxu0 %vm346_vm1, %v761_v18  ;;  %747 = vmatmul.msk.bf16.gmra.mxu1 %vm346_vm1, %v765_v19 }
  0x4b   : > { %751 = vmatmul.msk.bf16.gmra.mxu2 %vm346_vm1, %v769_v20  ;;  %755 = vmatmul.msk.bf16.gmra.mxu3 %vm346_vm1, %v773_v21 }
  0x5a   : > { %744 = vmatmul.msk.bf16.gmra.mxu0 %vm346_vm1, %v762_v22  ;;  %748 = vmatmul.msk.bf16.gmra.mxu1 %vm346_vm1, %v766_v23 }
  0x5b   : > { %752 = vmatmul.msk.bf16.gmra.mxu2 %vm346_vm1, %v770_v24  ;;  %756 = vmatmul.msk.bf16.gmra.mxu3 %vm346_vm1, %v774_v25 }
  0xa7   : > { %v408_v26 = vpop.f32.mrf.mxu0  ;;  %v428_v27 = vpop.f32.mrf.mxu1 }
  0xa8   : > { %v409_v29 = vadd.f32 %v1076_v28, %v408_v26  ;;  %v429_v30 = vadd.f32 %v1076_v28, %v428_v27 }
  0xaa   : > { %907 = vtanh.f32 %v409_v29 }
  0xab   : > { %909 = vtanh.f32 %v429_v30 }
  0xae   : > { %v448_v31 = vpop.f32.mrf.mxu2  ;;  %v468_v32 = vpop.f32.mrf.mxu3 }
  0xaf   : > { %v410_v33 = vpop.f32.mrf.mxu0  ;;  %v430_v34 = vpop.f32.mrf.mxu1  ;;  %v449_v37 = vadd.f32 %v1076_v28, %v448_v31  ;;  %v469_v38 = vadd.f32 %v1076_v28, %v468_v32 }
  0xb0   : > { %v411_v35 = vadd.f32 %v1076_v28, %v410_v33  ;;  %v431_v36 = vadd.f32 %v1076_v28, %v430_v34  ;;  %v908_v41 = vpop.eup %907 }
  0xb1   : > { %v910_v46 = vpop.eup %909 }
  0xb2   : > { %911 = vtanh.f32 %v411_v35 }
  0xb3   : > { %913 = vtanh.f32 %v431_v36 }
  0xb4   : > { %915 = vtanh.f32 %v449_v37 }
  0xb5   : > { %917 = vtanh.f32 %v469_v38 }
  0xb6   : > { %v450_v39 = vpop.f32.mrf.mxu2  ;;  %v470_v40 = vpop.f32.mrf.mxu3 }
  0xb7   : > { %v451_v42 = vadd.f32 %v1076_v28, %v450_v39  ;;  %v471_v43 = vadd.f32 %v1076_v28, %v470_v40  ;;  %v413_v44 = vpop.f32.mrf.mxu0  ;;  %v433_v45 = vpop.f32.mrf.mxu1 }
  0xb8   : > { %v912_v47 = vpop.eup %911  ;;  %v414_v52 = vadd.f32 %v1076_v28, %v413_v44  ;;  %v434_v54 = vadd.f32 %v1076_v28, %v433_v45 }
  0xb9   : > { %919 = vtanh.f32 %v451_v42  ;;  %v914_v48 = vpop.eup %913  ;;  %v785_v49 = vpack.c.bf16 %v912_v47, %v908_v41 }
  0xba   : > { %921 = vtanh.f32 %v471_v43  ;;  %v805_v50 = vpack.c.bf16 %v914_v48, %v910_v46  ;;  %v916_v51 = vpop.eup %915 }
  0xbb   : > { %786 = vst [vmem:[%s1091_s13] sm:$0xff] %v785_v49   ;;  %v918_v53 = vpop.eup %917  ;;  %923 = vtanh.f32 %v414_v52 }
  0xbc   : > { %865 = vst [vmem:[%s1091_s13 + $0x20] sm:$0xff] %v805_v50   ;;  %925 = vtanh.f32 %v434_v54 }
  0xbe   : > { %v453_v55 = vpop.f32.mrf.mxu2  ;;  %v473_v56 = vpop.f32.mrf.mxu3 }
  0xbf   : > { %v920_v57 = vpop.eup %919  ;;  %v415_v58 = vpop.f32.mrf.mxu0  ;;  %v454_v1 = vadd.f32 %v1076_v28, %v453_v55  ;;  %v474_v2 = vadd.f32 %v1076_v28, %v473_v56 }
  0xc0   : > { %v435_v59 = vpop.f32.mrf.mxu1  ;;  %v922_v60 = vpop.eup %921  ;;  %v825_v61 = vpack.c.bf16 %v920_v57, %v916_v51  ;;  %v416_v62 = vadd.f32 %v1076_v28, %v415_v58 }
  0xc1   : > { %v436_v63 = vadd.f32 %v1076_v28, %v435_v59  ;;  %v845_v0 = vpack.c.bf16 %v922_v60, %v918_v53  ;;  %v924_v5 = vpop.eup %923 }
  0xc2   : > { %869 = vst [vmem:[%s1091_s13 + $0x40] sm:$0xff] %v825_v61   ;;  %927 = vtanh.f32 %v416_v62  ;;  %v926_v10 = vpop.eup %925 }
  0xc3   : > { %873 = vst [vmem:[%s1091_s13 + $0x60] sm:$0xff] %v845_v0   ;;  %929 = vtanh.f32 %v436_v63 }
  0xc4   : > { %931 = vtanh.f32 %v454_v1 }
  0xc5   : > { %933 = vtanh.f32 %v474_v2 }
  0xc6   : > { %v455_v3 = vpop.f32.mrf.mxu2  ;;  %v475_v4 = vpop.f32.mrf.mxu3 }
  0xc7   : > { %v456_v6 = vadd.f32 %v1076_v28, %v455_v3  ;;  %v476_v7 = vadd.f32 %v1076_v28, %v475_v4  ;;  %v418_v8 = vpop.f32.mrf.mxu0 }
  0xc8   : > { %v438_v9 = vpop.f32.mrf.mxu1  ;;  %v928_v11 = vpop.eup %927  ;;  %v419_v16 = vadd.f32 %v1076_v28, %v418_v8 }
  0xc9   : > { %935 = vtanh.f32 %v456_v6  ;;  %v930_v12 = vpop.eup %929  ;;  %v790_v13 = vpack.c.bf16 %v928_v11, %v924_v5  ;;  %v439_v18 = vadd.f32 %v1076_v28, %v438_v9 }
  0xca   : > { %937 = vtanh.f32 %v476_v7  ;;  %v810_v14 = vpack.c.bf16 %v930_v12, %v926_v10  ;;  %v932_v15 = vpop.eup %931 }
  0xcb   : > { %862 = vst [vmem:[%s1091_s13 + $0x8] sm:$0xff] %v790_v13   ;;  %v934_v17 = vpop.eup %933  ;;  %939 = vtanh.f32 %v419_v16 }
  0xcc   : > { %866 = vst [vmem:[%s1091_s13 + $0x28] sm:$0xff] %v810_v14   ;;  %941 = vtanh.f32 %v439_v18 }
  0xce   : > { %v458_v19 = vpop.f32.mrf.mxu2  ;;  %v478_v20 = vpop.f32.mrf.mxu3 }
  0xcf   : > { %v936_v21 = vpop.eup %935  ;;  %v420_v22 = vpop.f32.mrf.mxu0  ;;  %v459_v30 = vadd.f32 %v1076_v28, %v458_v19  ;;  %v479_v31 = vadd.f32 %v1076_v28, %v478_v20 }
  0xd0   : > { %v440_v23 = vpop.f32.mrf.mxu1  ;;  %v938_v24 = vpop.eup %937  ;;  %v830_v25 = vpack.c.bf16 %v936_v21, %v932_v15  ;;  %v421_v26 = vadd.f32 %v1076_v28, %v420_v22 }
  0xd1   : > { %v441_v27 = vadd.f32 %v1076_v28, %v440_v23  ;;  %v850_v29 = vpack.c.bf16 %v938_v24, %v934_v17  ;;  %v940_v34 = vpop.eup %939 }
  0xd2   : > { %870 = vst [vmem:[%s1091_s13 + $0x48] sm:$0xff] %v830_v25   ;;  %943 = vtanh.f32 %v421_v26  ;;  %v942_v39 = vpop.eup %941 }
  0xd3   : > { %874 = vst [vmem:[%s1091_s13 + $0x68] sm:$0xff] %v850_v29   ;;  %945 = vtanh.f32 %v441_v27 }
  0xd4   : > { %947 = vtanh.f32 %v459_v30 }
  0xd5   : > { %949 = vtanh.f32 %v479_v31 }
  0xd6   : > { %v460_v32 = vpop.f32.mrf.mxu2  ;;  %v480_v33 = vpop.f32.mrf.mxu3 }
  0xd7   : > { %v461_v35 = vadd.f32 %v1076_v28, %v460_v32  ;;  %v481_v36 = vadd.f32 %v1076_v28, %v480_v33  ;;  %v423_v37 = vpop.f32.mrf.mxu0 }
  0xd8   : > { %v443_v38 = vpop.f32.mrf.mxu1  ;;  %v944_v40 = vpop.eup %943  ;;  %v424_v45 = vadd.f32 %v1076_v28, %v423_v37 }
  0xd9   : > { %951 = vtanh.f32 %v461_v35  ;;  %v946_v41 = vpop.eup %945  ;;  %v795_v42 = vpack.c.bf16 %v944_v40, %v940_v34  ;;  %v444_v47 = vadd.f32 %v1076_v28, %v443_v38 }
  0xda   : > { %953 = vtanh.f32 %v481_v36  ;;  %v815_v43 = vpack.c.bf16 %v946_v41, %v942_v39  ;;  %v948_v44 = vpop.eup %947 }
  0xdb   : > { %863 = vst [vmem:[%s1091_s13 + $0x10] sm:$0xff] %v795_v42   ;;  %v950_v46 = vpop.eup %949  ;;  %955 = vtanh.f32 %v424_v45 }
  0xdc   : > { %867 = vst [vmem:[%s1091_s13 + $0x30] sm:$0xff] %v815_v43   ;;  %957 = vtanh.f32 %v444_v47 }
  0xde   : > { %v463_v48 = vpop.f32.mrf.mxu2  ;;  %v483_v49 = vpop.f32.mrf.mxu3 }
  0xdf   : > { %v952_v50 = vpop.eup %951  ;;  %v425_v51 = vpop.f32.mrf.mxu0  ;;  %v464_v58 = vadd.f32 %v1076_v28, %v463_v48  ;;  %v484_v59 = vadd.f32 %v1076_v28, %v483_v49 }
  0xe0   : > { %v445_v52 = vpop.f32.mrf.mxu1  ;;  %v954_v53 = vpop.eup %953  ;;  %v835_v54 = vpack.c.bf16 %v952_v50, %v948_v44  ;;  %v426_v55 = vadd.f32 %v1076_v28, %v425_v51 }
  0xe1   : > { %v446_v56 = vadd.f32 %v1076_v28, %v445_v52  ;;  %v855_v57 = vpack.c.bf16 %v954_v53, %v950_v46  ;;  %v956_v62 = vpop.eup %955 }
  0xe2   : > { %871 = vst [vmem:[%s1091_s13 + $0x50] sm:$0xff] %v835_v54   ;;  %959 = vtanh.f32 %v426_v55  ;;  %v958_v1 = vpop.eup %957 }
  0xe3   : > { %875 = vst [vmem:[%s1091_s13 + $0x70] sm:$0xff] %v855_v57   ;;  %961 = vtanh.f32 %v446_v56 }
  0xe4   : > { %963 = vtanh.f32 %v464_v58 }
  0xe5   : > { %965 = vtanh.f32 %v484_v59 }
  0xe6   : > { %v465_v60 = vpop.f32.mrf.mxu2  ;;  %v485_v61 = vpop.f32.mrf.mxu3 }
  0xe7   : > { %v466_v63 = vadd.f32 %v1076_v28, %v465_v60  ;;  %v486_v0 = vadd.f32 %v1076_v28, %v485_v61 }
  0xe8   : > { %v960_v2 = vpop.eup %959 }
  0xe9   : > { %967 = vtanh.f32 %v466_v63  ;;  %v962_v3 = vpop.eup %961  ;;  %v800_v4 = vpack.c.bf16 %v960_v2, %v956_v62 }
  0xea   : > { %969 = vtanh.f32 %v486_v0  ;;  %v820_v5 = vpack.c.bf16 %v962_v3, %v958_v1  ;;  %v964_v6 = vpop.eup %963 }
  0xeb   : > { %864 = vst [vmem:[%s1091_s13 + $0x18] sm:$0xff] %v800_v4   ;;  %v966_v7 = vpop.eup %965 }
  0xec   : > { %868 = vst [vmem:[%s1091_s13 + $0x38] sm:$0xff] %v820_v5  }
  0xef   : > { %v968_v8 = vpop.eup %967 }
  0xf0   : > { %v970_v9 = vpop.eup %969  ;;  %v840_v10 = vpack.c.bf16 %v968_v8, %v964_v6 }
  0xf1   : > { %v860_v11 = vpack.c.bf16 %v970_v9, %v966_v7 }
  0xf2   : > { %872 = vst [vmem:[%s1091_s13 + $0x58] sm:$0xff] %v840_v10  }
  0xf3   : > { %876 = vst [vmem:[%s1091_s13 + $0x78] sm:$0xff] %v860_v11  }
  0xf4 PF: > { %s13_s12 = sadd.s32 1, %s977_s12  }
  0xf5   : > { %p10_p4 = scmp.ge.s32.totalorder %s13_s12, 4  }
  0xf7   :  { %12 = sbr.rel (!%p10_p4) target bundleno = 1 (0x1), region = 62 }

// kernel: my_model_forward.7
= control target key start
LH: loop header
LB: loop body
LE: loop exit
PB: predicated region body
PF: predicated region fallthrough
CT: control target
= control target key end

     0   :  { %s1632_s12 = smov 0   ;;  %s1918_s0 = inlined_call_operand.vmem [shape: bf16[256,576], index: 0, kind: input, shape index: {}]   ;;  %s1919_s1 = inlined_call_operand.vmem [shape: bf16[576,128], index: 1, kind: input, shape index: {}]   ;;  %s1920_s2 = inlined_call_operand.vmem [shape: f32[1,128], index: 2, kind: input, shape index: {}]   ;;  %s1921_s3 = inlined_call_operand.vmem [shape: bf16[256,128], index: 3, kind: output, shape index: {}]  }
   0x1 LB: > { %s1092_s13 = sadd.s32 4294967295, %s1610_s12   ;;  %p1096_p0 = scmp.ge.s32.totalorder %s1610_s12, 1  ;;  %s1610_s12 = sphi %s1632_s12, %s13_s12  }
   0x2   : > { %p139_p1 = scmp.lt.s32.totalorder %s1610_s12, 3 }
   0x4   : > { %p140_p2 = pnand %p1096_p0, %p139_p1 }
   0x5   : > { %s1097_s20 = sshll.u32 (!%p140_p2), %s1092_s13, 4 }
   0x6   : > { %143 = sbr.rel (%p140_p2) target bundleno = 343 (0x157), region = 32  ;;  %p165_p3 = scmp.lt.s32.totalorder (!%p140_p2), %s1097_s20, 31 }
   0xb   : > { %v1462_v0 = vld [vmem:[%s1919_s1 + $0x38] sm:$0xff]  ;;  %v1461_v1 = vld [vmem:[%s1919_s1 + $0x30] sm:$0xff]  ;;  %v1460_v2 = vld [vmem:[%s1919_s1 + $0x28] sm:$0xff]  ;;  %s1923_s20 = smov (!%p165_p3, %s1097_s20), 31  ;;  %vm718_vm0 = vcmask 523264  }
   0xc   : > { %1538 = vmatpush.bf16.msra.mxu1 %v1462_v0  ;;  %1539 = vmatpush.bf16.msra.mxu2 %v1462_v0  ;;  %v1459_v3 = vld [vmem:[%s1919_s1 + $0x20] sm:$0xff]  ;;  %v1458_v4 = vld [vmem:[%s1919_s1 + $0x18] sm:$0xff]  ;;  %v1457_v5 = vld [vmem:[%s1919_s1 + $0x10] sm:$0xff]  ;;  %s1562_s27 = smul.u32 20, %s1923_s20 }
   0xd   : > { %1540 = vmatpush.bf16.msra.mxu3 %v1462_v0  ;;  %743 = vmatpush.bf16.msra.mxu0 %v1462_v0  ;;  %v1456_v6 = vld [vmem:[%s1919_s1 + $0x8] sm:$0xff]  ;;  %v1455_v7 = vld [vmem:[%s1919_s1] sm:$0xff]  ;;  %v1478_v16 = vld [vmem:[%s1919_s1 + $0xb8] sm:$0xff] }
   0xe   : > { %s1667_s5 = scalar_lea.vmem %s1918_s0, %s1562_s27  ;;  %v1470_v17 = vld [vmem:[%s1919_s1 + $0x78] sm:$0xff]  ;;  %v1477_v24 = vld [vmem:[%s1919_s1 + $0xb0] sm:$0xff]  ;;  %v1476_v28 = vld [vmem:[%s1919_s1 + $0xa8] sm:$0xff] }
   0xf   : > { %v1143_v8 = vld [vmem:[%s1667_s5 + $0x50] sm:$0xf]  ;;  %v1427_v9 = vld [vmem:[%s1667_s5 + $0x60] sm:$0xf0]  ;;  %v1183_v10 = vld [vmem:[%s1667_s5 + $0xa0] sm:$0xf] }
  0x10   : > { %1541 = vmatpush.bf16.msra.mxu1 %v1461_v1  ;;  %1542 = vmatpush.bf16.msra.mxu2 %v1461_v1  ;;  %v1437_v11 = vld [vmem:[%s1667_s5 + $0xb0] sm:$0xf0]  ;;  %v1223_v12 = vld [vmem:[%s1667_s5 + $0xf0] sm:$0xf]  ;;  %v1447_v13 = vld [vmem:[%s1667_s5 + $0x100] sm:$0xf0]  ;;  %v1144_v18 = vor.u32 %v1427_v9, %v1143_v8 }
  0x11   : > { %1543 = vmatpush.bf16.msra.mxu3 %v1461_v1  ;;  %744 = vmatpush.bf16.msra.mxu0 %v1461_v1  ;;  %v1103_v14 = vld [vmem:[%s1667_s5] sm:$0xf]  ;;  %v1417_v15 = vld [vmem:[%s1667_s5 + $0x10] sm:$0xf0]  ;;  %v1184_v19 = vor.u32 %v1437_v11, %v1183_v10  ;;  %v1224_v20 = vor.u32 %v1447_v13, %v1223_v12  ;;  %v1486_v22 = vld [vmem:[%s1919_s1 + $0xf8] sm:$0xff] }
  0x12   : > { %v1104_v21 = vor.u32 %v1417_v15, %v1103_v14  ;;  %v1490_v23 = vld [vmem:[%s1919_s1 + $0x118] sm:$0xff]  ;;  %v1469_v25 = vld [vmem:[%s1919_s1 + $0x70] sm:$0xff]  ;;  %v1468_v29 = vld [vmem:[%s1919_s1 + $0x68] sm:$0xff] }
  0x13   : > { %v1485_v26 = vld [vmem:[%s1919_s1 + $0xf0] sm:$0xff]  ;;  %v1484_v30 = vld [vmem:[%s1919_s1 + $0xe8] sm:$0xff]  ;;  %v1475_v32 = vld [vmem:[%s1919_s1 + $0xa0] sm:$0xff] }
  0x14   : > { %1544 = vmatpush.bf16.msra.mxu1 %v1460_v2  ;;  %1545 = vmatpush.bf16.msra.mxu2 %v1460_v2  ;;  %v1489_v27 = vld [vmem:[%s1919_s1 + $0x110] sm:$0xff]  ;;  %v1488_v31 = vld [vmem:[%s1919_s1 + $0x108] sm:$0xff]  ;;  %v1467_v33 = vld [vmem:[%s1919_s1 + $0x60] sm:$0xff] }
  0x15   : > { %1546 = vmatpush.bf16.msra.mxu3 %v1460_v2  ;;  %745 = vmatpush.bf16.msra.mxu0 %v1460_v2  ;;  %v1483_v34 = vld [vmem:[%s1919_s1 + $0xe0] sm:$0xff]  ;;  %v1163_v35 = vld [vmem:[%s1667_s5 + $0x78] sm:$0xf]  ;;  %v1432_v36 = vld [vmem:[%s1667_s5 + $0x88] sm:$0xf0] }
  0x16   : > { %v1203_v37 = vld [vmem:[%s1667_s5 + $0xc8] sm:$0xf]  ;;  %v1442_v38 = vld [vmem:[%s1667_s5 + $0xd8] sm:$0xf0]  ;;  %v1243_v39 = vld [vmem:[%s1667_s5 + $0x118] sm:$0xf]  ;;  %v1164_v46 = vor.u32 %v1432_v36, %v1163_v35 }
  0x17   : > { %v1452_v40 = vld [vmem:[%s1667_s5 + $0x128] sm:$0xf0]  ;;  %v1123_v41 = vld [vmem:[%s1667_s5 + $0x28] sm:$0xf]  ;;  %v1422_v42 = vld [vmem:[%s1667_s5 + $0x38] sm:$0xf0]  ;;  %v1204_v47 = vor.u32 %v1442_v38, %v1203_v37 }
  0x18   : > { %1547 = vmatpush.bf16.msra.mxu1 %v1459_v3  ;;  %1548 = vmatpush.bf16.msra.mxu2 %v1459_v3  ;;  %v1487_v43 = vld [vmem:[%s1919_s1 + $0x100] sm:$0xff]  ;;  %v1474_v44 = vld [vmem:[%s1919_s1 + $0x98] sm:$0xff]  ;;  %v1244_v48 = vor.u32 %v1452_v40, %v1243_v39  ;;  %v1124_v49 = vor.u32 %v1422_v42, %v1123_v41  ;;  %v1473_v51 = vld [vmem:[%s1919_s1 + $0x90] sm:$0xff] }
  0x19   : > { %1549 = vmatpush.bf16.msra.mxu3 %v1459_v3  ;;  %746 = vmatpush.bf16.msra.mxu0 %v1459_v3  ;;  %v1466_v45 = vld [vmem:[%s1919_s1 + $0x58] sm:$0xff]  ;;  %v1465_v52 = vld [vmem:[%s1919_s1 + $0x50] sm:$0xff]  ;;  %v1472_v54 = vld [vmem:[%s1919_s1 + $0x88] sm:$0xff] }
  0x1a   : > { %v1482_v50 = vld [vmem:[%s1919_s1 + $0xd8] sm:$0xff]  ;;  %v1481_v53 = vld [vmem:[%s1919_s1 + $0xd0] sm:$0xff]  ;;  %v1464_v55 = vld [vmem:[%s1919_s1 + $0x48] sm:$0xff] }
  0x1b   : > { %v1480_v56 = vld [vmem:[%s1919_s1 + $0xc8] sm:$0xff]  ;;  %v1471_v57 = vld [vmem:[%s1919_s1 + $0x80] sm:$0xff]  ;;  %v1105_v61 = vld [vmem:[%s1667_s5 + $0x14] sm:$0xf0] }
  0x1c   : > { %1550 = vmatpush.bf16.msra.mxu1 %v1458_v4  ;;  %1551 = vmatpush.bf16.msra.mxu2 %v1458_v4  ;;  %v1463_v58 = vld [vmem:[%s1919_s1 + $0x40] sm:$0xff]  ;;  %v1111_v62 = vld [vmem:[%s1667_s5 + $0x8] sm:$0xf]  ;;  %v1418_v63 = vld [vmem:[%s1667_s5 + $0x18] sm:$0xf0] }
  0x1d   : > { %1552 = vmatpush.bf16.msra.mxu3 %v1458_v4  ;;  %747 = vmatpush.bf16.msra.mxu0 %v1458_v4  ;;  %v1479_v59 = vld [vmem:[%s1919_s1 + $0xc0] sm:$0xff]  ;;  %v1416_v0 = vld [vmem:[%s1667_s5 + $0xc] sm:$0xf]  ;;  %v1119_v2 = vld [vmem:[%s1667_s5 + $0x10] sm:$0xf] }
  0x1e   : > { %v1415_v60 = vld [vmem:[%s1667_s5 + $0x4] sm:$0xf]  ;;  %v1113_v1 = vld [vmem:[%s1667_s5 + $0x1c] sm:$0xf0]  ;;  %v1420_v8 = vld [vmem:[%s1667_s5 + $0x2c] sm:$0xf] }
  0x1f   : > { %v1419_v3 = vld [vmem:[%s1667_s5 + $0x20] sm:$0xf0]  ;;  %v1108_v4 = vor.u32 %v1415_v60, %v1105_v61  ;;  %v1125_v9 = vld [vmem:[%s1667_s5 + $0x3c] sm:$0xf0]  ;;  %v1131_v10 = vld [vmem:[%s1667_s5 + $0x30] sm:$0xf] }
  0x20   : > { %1553 = vmatpush.bf16.msra.mxu1 %v1457_v5  ;;  %1554 = vmatpush.bf16.msra.mxu2 %v1457_v5  ;;  %v1423_v11 = vld [vmem:[%s1667_s5 + $0x40] sm:$0xf0]  ;;  %v1421_v12 = vld [vmem:[%s1667_s5 + $0x34] sm:$0xf]  ;;  %v1133_v13 = vld [vmem:[%s1667_s5 + $0x44] sm:$0xf0] }
  0x21   : > { %1555 = vmatpush.bf16.msra.mxu3 %v1457_v5  ;;  %748 = vmatpush.bf16.msra.mxu0 %v1457_v5  ;;  %v1112_v5 = vor.u32 %v1418_v63, %v1111_v62  ;;  %v1139_v14 = vld [vmem:[%s1667_s5 + $0x38] sm:$0xf]  ;;  %v1424_v15 = vld [vmem:[%s1667_s5 + $0x48] sm:$0xf0]  ;;  %v1433_v35 = vld [vmem:[%s1667_s5 + $0x90] sm:$0xf0] }
  0x22   : > { %v1431_v36 = vld [vmem:[%s1667_s5 + $0x84] sm:$0xf]  ;;  %v1173_v37 = vld [vmem:[%s1667_s5 + $0x94] sm:$0xf0]  ;;  %v1179_v38 = vld [vmem:[%s1667_s5 + $0x88] sm:$0xf] }
  0x23   : > { %v1434_v39 = vld [vmem:[%s1667_s5 + $0x98] sm:$0xf0]  ;;  %v1176_v42 = vor.u32 %v1431_v36, %v1173_v37  ;;  %v1441_v60 = vld [vmem:[%s1667_s5 + $0xd4] sm:$0xf]  ;;  %v1213_v61 = vld [vmem:[%s1667_s5 + $0xe4] sm:$0xf0] }
  0x24   : > { %1556 = vmatpush.bf16.msra.mxu1 %v1456_v6  ;;  %1557 = vmatpush.bf16.msra.mxu2 %v1456_v6  ;;  %v1219_v62 = vld [vmem:[%s1667_s5 + $0xd8] sm:$0xf]  ;;  %v1444_v63 = vld [vmem:[%s1667_s5 + $0xe8] sm:$0xf0] }
  0x25   : > { %1558 = vmatpush.bf16.msra.mxu3 %v1456_v6  ;;  %749 = vmatpush.bf16.msra.mxu0 %v1456_v6  ;;  %v1116_v6 = vor.u32 %v1416_v0, %v1113_v1 }
  0x28   : > { %1559 = vmatpush.bf16.msra.mxu1 %v1455_v7  ;;  %1560 = vmatpush.bf16.msra.mxu2 %v1455_v7 }
  0x29   : > { %1561 = vmatpush.bf16.msra.mxu3 %v1455_v7  ;;  %750 = vmatpush.bf16.msra.mxu0 %v1455_v7  ;;  %v1120_v7 = vor.u32 %v1419_v3, %v1119_v2  ;;  %v1216_v2 = vor.u32 %v1441_v60, %v1213_v61  ;;  %v1220_v3 = vor.u32 %v1444_v63, %v1219_v62 }
  0x2b   : > { %761 = vmatmul.bf16.vlgmr.msra.gmra.mxu1 %v1144_v18  ;;  %771 = vmatmul.bf16.vlgmr.msra.gmra.mxu2 %v1184_v19  ;;  %v1136_v18 = vor.u32 %v1421_v12, %v1133_v13  ;;  %v1140_v19 = vor.u32 %v1424_v15, %v1139_v14 }
  0x2c   : > { %841 = vmatpush.bf16.msrb.mxu2 %v1478_v16  ;;  %792 = vmatpush.bf16.msrb.mxu1 %v1470_v17  ;;  %v1128_v16 = vor.u32 %v1420_v8, %v1125_v9  ;;  %v1132_v17 = vor.u32 %v1423_v11, %v1131_v10  ;;  %v1446_v8 = vld [vmem:[%s1667_s5 + $0xfc] sm:$0xf]  ;;  %v1233_v9 = vld [vmem:[%s1667_s5 + $0x10c] sm:$0xf0]  ;;  %v1239_v10 = vld [vmem:[%s1667_s5 + $0x100] sm:$0xf] }
  0x2d   : > { %781 = vmatmul.bf16.vlgmr.msra.gmra.mxu3 %v1224_v20  ;;  %751 = vmatmul.bf16.vlgmr.msra.gmra.mxu0 %v1104_v21  ;;  %v1425_v20 = vld [vmem:[%s1667_s5 + $0x54] sm:$0xf]  ;;  %v1145_v21 = vld [vmem:[%s1667_s5 + $0x64] sm:$0xf0]  ;;  %v1236_v15 = vor.u32 %v1446_v8, %v1233_v9 }
  0x2e   : > { %890 = vmatpush.bf16.msrb.mxu3 %v1486_v22  ;;  %943 = vmatpush.bf16.msrb.mxu0 %v1490_v23  ;;  %v1151_v22 = vld [vmem:[%s1667_s5 + $0x58] sm:$0xf]  ;;  %v1428_v23 = vld [vmem:[%s1667_s5 + $0x68] sm:$0xf0]  ;;  %v1449_v11 = vld [vmem:[%s1667_s5 + $0x110] sm:$0xf0] }
  0x30   : > { %842 = vmatpush.bf16.msrb.mxu2 %v1477_v24  ;;  %793 = vmatpush.bf16.msrb.mxu1 %v1469_v25  ;;  %v1426_v24 = vld [vmem:[%s1667_s5 + $0x5c] sm:$0xf]  ;;  %v1153_v25 = vld [vmem:[%s1667_s5 + $0x6c] sm:$0xf0] }
  0x32   : > { %891 = vmatpush.bf16.msrb.mxu3 %v1485_v26  ;;  %944 = vmatpush.bf16.msrb.mxu0 %v1489_v27  ;;  %v1159_v26 = vld [vmem:[%s1667_s5 + $0x60] sm:$0xf]  ;;  %v1429_v27 = vld [vmem:[%s1667_s5 + $0x70] sm:$0xf0] }
  0x34   : > { %843 = vmatpush.bf16.msrb.mxu2 %v1476_v28  ;;  %794 = vmatpush.bf16.msrb.mxu1 %v1468_v29  ;;  %v1148_v28 = vor.u32 %v1425_v20, %v1145_v21  ;;  %v1152_v29 = vor.u32 %v1428_v23, %v1151_v22 }
  0x36   : > { %892 = vmatpush.bf16.msrb.mxu3 %v1484_v30  ;;  %945 = vmatpush.bf16.msrb.mxu0 %v1488_v31  ;;  %v1156_v30 = vor.u32 %v1426_v24, %v1153_v25  ;;  %v1160_v31 = vor.u32 %v1429_v27, %v1159_v26  ;;  %v1450_v25 = vld [vmem:[%s1667_s5 + $0x11c] sm:$0xf]  ;;  %v1245_v26 = vld [vmem:[%s1667_s5 + $0x12c] sm:$0xf0]  ;;  %v1251_v27 = vld [vmem:[%s1667_s5 + $0x120] sm:$0xf] }
  0x37   : > { %v1248_v36 = vor.u32 %v1450_v25, %v1245_v26 }
  0x38   : > { %844 = vmatpush.bf16.msrb.mxu2 %v1475_v32  ;;  %795 = vmatpush.bf16.msrb.mxu1 %v1467_v33  ;;  %v1430_v32 = vld [vmem:[%s1667_s5 + $0x7c] sm:$0xf]  ;;  %v1165_v33 = vld [vmem:[%s1667_s5 + $0x8c] sm:$0xf0] }
  0x39   : > { %v1168_v40 = vor.u32 %v1430_v32, %v1165_v33  ;;  %v1454_v32 = vld [vmem:[%s1667_s5 + $0x138] sm:$0xf0] }
  0x3a   : > { %893 = vmatpush.bf16.msrb.mxu3 %v1483_v34  ;;  %946 = vmatpush.bf16.msrb.mxu0 %v1487_v43  ;;  %v1171_v34 = vld [vmem:[%s1667_s5 + $0x80] sm:$0xf]  ;;  %v1180_v43 = vor.u32 %v1434_v39, %v1179_v38 }
  0x3b   : > { %766 = vmatmul.bf16.gmra.mxu1 %v1164_v46  ;;  %776 = vmatmul.bf16.gmra.mxu2 %v1204_v47  ;;  %v1172_v41 = vor.u32 %v1433_v35, %v1171_v34  ;;  %v1191_v46 = vld [vmem:[%s1667_s5 + $0xa8] sm:$0xf]  ;;  %v1438_v47 = vld [vmem:[%s1667_s5 + $0xb8] sm:$0xf0] }
  0x3c   : > { %845 = vmatpush.bf16.msrb.mxu2 %v1474_v44  ;;  %796 = vmatpush.bf16.msrb.mxu1 %v1466_v45  ;;  %v1435_v44 = vld [vmem:[%s1667_s5 + $0xa4] sm:$0xf]  ;;  %v1185_v45 = vld [vmem:[%s1667_s5 + $0xb4] sm:$0xf0] }
  0x3d   : > { %786 = vmatmul.bf16.gmra.mxu3 %v1244_v48  ;;  %756 = vmatmul.bf16.gmra.mxu0 %v1124_v49  ;;  %v1436_v48 = vld [vmem:[%s1667_s5 + $0xac] sm:$0xf]  ;;  %v1193_v49 = vld [vmem:[%s1667_s5 + $0xbc] sm:$0xf0] }
  0x3e   : > { %894 = vmatpush.bf16.msrb.mxu3 %v1482_v50  ;;  %v1199_v50 = vld [vmem:[%s1667_s5 + $0xb0] sm:$0xf] }
  0x40   : > { %846 = vmatpush.bf16.msrb.mxu2 %v1473_v51  ;;  %797 = vmatpush.bf16.msrb.mxu1 %v1465_v52  ;;  %v1439_v51 = vld [vmem:[%s1667_s5 + $0xc0] sm:$0xf0]  ;;  %v1188_v52 = vor.u32 %v1435_v44, %v1185_v45 }
  0x42   : > { %895 = vmatpush.bf16.msrb.mxu3 %v1481_v53  ;;  %v1192_v53 = vor.u32 %v1438_v47, %v1191_v46 }
  0x44   : > { %847 = vmatpush.bf16.msrb.mxu2 %v1472_v54  ;;  %798 = vmatpush.bf16.msrb.mxu1 %v1464_v55  ;;  %v1196_v54 = vor.u32 %v1436_v48, %v1193_v49  ;;  %v1200_v55 = vor.u32 %v1439_v51, %v1199_v50 }
  0x46   : > { %896 = vmatpush.bf16.msrb.mxu3 %v1480_v56  ;;  %v1440_v56 = vld [vmem:[%s1667_s5 + $0xcc] sm:$0xf] }
  0x48   : > { %848 = vmatpush.bf16.msrb.mxu2 %v1471_v57  ;;  %799 = vmatpush.bf16.msrb.mxu1 %v1463_v58  ;;  %v1205_v57 = vld [vmem:[%s1667_s5 + $0xdc] sm:$0xf0]  ;;  %v1211_v58 = vld [vmem:[%s1667_s5 + $0xd0] sm:$0xf] }
  0x49   : > { %v1208_v0 = vor.u32 %v1440_v56, %v1205_v57 }
  0x4a   : > { %897 = vmatpush.bf16.msrb.mxu3 %v1479_v59  ;;  %v1443_v59 = vld [vmem:[%s1667_s5 + $0xe0] sm:$0xf0] }
  0x4b   : > { %800 = vmatmul.bf16.vlgmr.msrb.gmra.mxu1 %v1108_v4  ;;  %849 = vmatmul.bf16.vlgmr.msrb.gmra.mxu2 %v1112_v5  ;;  %v1212_v1 = vor.u32 %v1443_v59, %v1211_v58  ;;  %v1445_v4 = vld [vmem:[%s1667_s5 + $0xf4] sm:$0xf]  ;;  %v1225_v5 = vld [vmem:[%s1667_s5 + $0x104] sm:$0xf0] }
  0x4c   : > { %v1228_v12 = vor.u32 %v1445_v4, %v1225_v5 }
  0x4d   : > { %898 = vmatmul.bf16.vlgmr.msrb.gmra.mxu3 %v1116_v6  ;;  %1405 = vmatmul.msk.bf16.vlgmr.msrb.gmra.mxu0 %vm718_vm0, %v1120_v7  ;;  %v1231_v6 = vld [vmem:[%s1667_s5 + $0xf8] sm:$0xf]  ;;  %v1448_v7 = vld [vmem:[%s1667_s5 + $0x108] sm:$0xf0] }
  0x4e   : > { %v1232_v13 = vor.u32 %v1448_v7, %v1231_v6 }
  0x5b   : > { %805 = vmatmul.bf16.gmra.mxu1 %v1128_v16  ;;  %854 = vmatmul.bf16.gmra.mxu2 %v1132_v17  ;;  %v1240_v16 = vor.u32 %v1449_v11, %v1239_v10 }
  0x5d   : > { %903 = vmatmul.bf16.gmra.mxu3 %v1136_v18  ;;  %1406 = vmatmul.msk.bf16.gmra.mxu0 %vm718_vm0, %v1140_v19  ;;  %v1840_v18 = vld [vmem:[%s1920_s2] ss:$0 sm:$0xff] }
  0x6b   : > { %810 = vmatmul.bf16.gmra.mxu1 %v1148_v28  ;;  %859 = vmatmul.bf16.gmra.mxu2 %v1152_v29  ;;  %v1453_v28 = vld [vmem:[%s1667_s5 + $0x130] sm:$0xf0]  ;;  %v1451_v29 = vld [vmem:[%s1667_s5 + $0x124] sm:$0xf] }
  0x6c   : > { %v1252_v37 = vor.u32 %v1453_v28, %v1251_v27 }
  0x6d   : > { %908 = vmatmul.bf16.gmra.mxu3 %v1156_v30  ;;  %1407 = vmatmul.msk.bf16.gmra.mxu0 %vm718_vm0, %v1160_v31  ;;  %v1253_v30 = vld [vmem:[%s1667_s5 + $0x134] sm:$0xf0]  ;;  %v1259_v31 = vld [vmem:[%s1667_s5 + $0x128] sm:$0xf]  ;;  %s1100_s5 = sshll.u32 %s1923_s20, 2 }
  0x6e   : > { %s1889_s22 = scalar_lea.vmem %s1921_s3, %s1100_s5 }
  0x7b   : > { %815 = vmatmul.bf16.gmra.mxu1 %v1168_v40  ;;  %864 = vmatmul.bf16.gmra.mxu2 %v1172_v41  ;;  %v1256_v40 = vor.u32 %v1451_v29, %v1253_v30  ;;  %v1260_v41 = vor.u32 %v1454_v32, %v1259_v31 }
  0x7d   : > { %913 = vmatmul.bf16.gmra.mxu3 %v1176_v42  ;;  %1408 = vmatmul.msk.bf16.gmra.mxu0 %vm718_vm0, %v1180_v43 }
  0x8b   : > { %820 = vmatmul.bf16.gmra.mxu1 %v1188_v52  ;;  %869 = vmatmul.bf16.gmra.mxu2 %v1192_v53 }
  0x8d   : > { %918 = vmatmul.bf16.gmra.mxu3 %v1196_v54  ;;  %1409 = vmatmul.msk.bf16.gmra.mxu0 %vm718_vm0, %v1200_v55 }
  0x9b   : > { %825 = vmatmul.bf16.gmra.mxu1 %v1208_v0  ;;  %874 = vmatmul.bf16.gmra.mxu2 %v1212_v1 }
  0x9d   : > { %923 = vmatmul.bf16.gmra.mxu3 %v1216_v2  ;;  %1410 = vmatmul.msk.bf16.gmra.mxu0 %vm718_vm0, %v1220_v3 }
  0xa8   : > { %v1834_v14 = vpop.f32.mrf.mxu1 }
  0xaa   : > { %v752_v17 = vpop.f32.mrf.mxu0 }
  0xab   : > { %830 = vmatmul.bf16.gmra.mxu1 %v1228_v12  ;;  %879 = vmatmul.bf16.gmra.mxu2 %v1232_v13  ;;  %v753_v55 = vadd.f32 %v1840_v18, %v752_v17 }
  0xad   : > { %928 = vmatmul.bf16.gmra.mxu3 %v1236_v15  ;;  %1411 = vmatmul.msk.bf16.gmra.mxu0 %vm718_vm0, %v1240_v16 }
  0xae   : > { %v772_v19 = vpop.f32.mrf.mxu2 }
  0xaf   : > { %v1843_v20 = vadd.f32 %v1840_v18, %v772_v19 }
  0xb0   : > { %v782_v21 = vpop.f32.mrf.mxu3  ;;  %v1848_v23 = vpop.f32.mrf.mxu1 }
  0xb1   : > { %v1846_v22 = vadd.f32 %v1840_v18, %v782_v21 }
  0xb2   : > { %v754_v24 = vpop.f32.mrf.mxu0 }
  0xb3   : > { %v755_v62 = vadd.f32 %v1840_v18, %v754_v24 }
  0xb6   : > { %v774_v33 = vpop.f32.mrf.mxu2 }
  0xb7   : > { %v1859_v34 = vadd.f32 %v1840_v18, %v774_v33 }
  0xb8   : > { %v784_v35 = vpop.f32.mrf.mxu3  ;;  %v1864_v39 = vpop.f32.mrf.mxu1 }
  0xb9   : > { %v1862_v38 = vadd.f32 %v1840_v18, %v784_v35 }
  0xba   : > { %v757_v42 = vpop.f32.mrf.mxu0 }
  0xbb   : > { %835 = vmatmul.bf16.gmra.mxu1 %v1248_v36  ;;  %884 = vmatmul.bf16.gmra.mxu2 %v1252_v37  ;;  %v758_v9 = vadd.f32 %v1840_v18, %v757_v42  ;;  %v763_v36 = vadd.f32 %v1840_v18, %v1834_v14 }
  0xbd   : > { %933 = vmatmul.bf16.gmra.mxu3 %v1256_v40  ;;  %1412 = vmatmul.msk.bf16.gmra.mxu0 %vm718_vm0, %v1260_v41 }
  0xbe   : > { %v777_v43 = vpop.f32.mrf.mxu2 }
  0xbf   : > { %v1868_v44 = vadd.f32 %v1840_v18, %v777_v43 }
  0xc0   : > { %v787_v45 = vpop.f32.mrf.mxu3  ;;  %v1873_v47 = vpop.f32.mrf.mxu1 }
  0xc1   : > { %v1871_v46 = vadd.f32 %v1840_v18, %v787_v45 }
  0xc2   : > { %v759_v48 = vpop.f32.mrf.mxu0 }
  0xc3   : > { %v760_v21 = vadd.f32 %v1840_v18, %v759_v48 }
  0xc6   : > { %v779_v49 = vpop.f32.mrf.mxu2 }
  0xc7   : > { %v1876_v50 = vadd.f32 %v1840_v18, %v779_v49 }
  0xc8   : > { %v789_v51 = vpop.f32.mrf.mxu3  ;;  %v801_v53 = vpop.f32.mrf.mxu1 }
  0xc9   : > { %v1879_v52 = vadd.f32 %v1840_v18, %v789_v51  ;;  %v802_v56 = vadd.f32 %v801_v53, %v753_v55  ;;  %v765_v51 = vadd.f32 %v1840_v18, %v1848_v23 }
  0xca   : > { %v948_v54 = vpop.f32.mrf.mxu0 }
  0xce   : > { %v850_v57 = vpop.f32.mrf.mxu2 }
  0xcf   : > { %v851_v59 = vadd.f32 %v850_v57, %v802_v56 }
  0xd0   : > { %v899_v58 = vpop.f32.mrf.mxu3  ;;  %v803_v60 = vpop.f32.mrf.mxu1 }
  0xd1   : > { %v900_v63 = vadd.f32 %v899_v58, %v851_v59  ;;  %v804_v0 = vadd.f32 %v803_v60, %v755_v62 }
  0xd2   : > { %v950_v61 = vpop.f32.mrf.mxu0 }
  0xd3   : > { %v949_v4 = vadd.f32 %v948_v54, %v900_v63  ;;  %v768_v63 = vadd.f32 %v1840_v18, %v1864_v39 }
  0xd5   : > { %1572 = vtanh.f32 %v949_v4 }
  0xd6   : > { %v852_v1 = vpop.f32.mrf.mxu2 }
  0xd7   : > { %v853_v2 = vadd.f32 %v852_v1, %v804_v0 }
  0xd8   : > { %v901_v3 = vpop.f32.mrf.mxu3  ;;  %v806_v5 = vpop.f32.mrf.mxu1 }
  0xd9   : > { %v902_v6 = vadd.f32 %v901_v3, %v853_v2  ;;  %v807_v10 = vadd.f32 %v806_v5, %v758_v9 }
  0xda   : > { %v953_v7 = vpop.f32.mrf.mxu0 }
  0xdb   : > { %v951_v8 = vadd.f32 %v950_v61, %v902_v6  ;;  %v1573_v17 = vpop.eup %1572 }
  0xdd   : > { %1574 = vtanh.f32 %v951_v8 }
  0xde   : > { %v855_v11 = vpop.f32.mrf.mxu2 }
  0xdf   : > { %v856_v13 = vadd.f32 %v855_v11, %v807_v10 }
  0xe0   : > { %v904_v12 = vpop.f32.mrf.mxu3  ;;  %v808_v15 = vpop.f32.mrf.mxu1 }
  0xe1   : > { %v905_v25 = vadd.f32 %v904_v12, %v856_v13  ;;  %v809_v26 = vadd.f32 %v808_v15, %v760_v21 }
  0xe2   : > { %v955_v16 = vpop.f32.mrf.mxu0 }
  0xe3   : > { %v1575_v19 = vpop.eup %1574  ;;  %v954_v30 = vadd.f32 %v953_v7, %v905_v25  ;;  %v770_v7 = vadd.f32 %v1840_v18, %v1873_v47 }
  0xe4   : > { %v1494_v24 = vpack.c.bf16 %v1575_v19, %v1573_v17 }
  0xe5   : > { %1576 = vtanh.f32 %v954_v30 }
  0xe6   : > { %1495 = vst [vmem:[%s1889_s22] sm:$0xff] %v1494_v24   ;;  %v857_v27 = vpop.f32.mrf.mxu2 }
  0xe7   : > { %v858_v28 = vadd.f32 %v857_v27, %v809_v26 }
  0xe8   : > { %v906_v29 = vpop.f32.mrf.mxu3  ;;  %v811_v31 = vpop.f32.mrf.mxu1 }
  0xe9   : > { %v907_v32 = vadd.f32 %v906_v29, %v858_v28  ;;  %v812_v37 = vadd.f32 %v811_v31, %v763_v36 }
  0xea   : > { %v958_v33 = vpop.f32.mrf.mxu0 }
  0xeb   : > { %v956_v35 = vadd.f32 %v955_v16, %v907_v32  ;;  %v1577_v48 = vpop.eup %1576 }
  0xed   : > { %1578 = vtanh.f32 %v956_v35 }
  0xee   : > { %v860_v40 = vpop.f32.mrf.mxu2 }
  0xef   : > { %v861_v42 = vadd.f32 %v860_v40, %v812_v37 }
  0xf0   : > { %v909_v41 = vpop.f32.mrf.mxu3  ;;  %v813_v43 = vpop.f32.mrf.mxu1 }
  0xf1   : > { %v910_v54 = vadd.f32 %v909_v41, %v861_v42  ;;  %v814_v55 = vadd.f32 %v813_v43, %v765_v51 }
  0xf2   : > { %v960_v45 = vpop.f32.mrf.mxu0 }
  0xf3   : > { %v1579_v49 = vpop.eup %1578  ;;  %v959_v58 = vadd.f32 %v958_v33, %v910_v54 }
  0xf4   : > { %v1499_v53 = vpack.c.bf16 %v1579_v49, %v1577_v48 }
  0xf5   : > { %1580 = vtanh.f32 %v959_v58 }
  0xf6   : > { %1531 = vst [vmem:[%s1889_s22 + $0x8] sm:$0xff] %v1499_v53   ;;  %v862_v56 = vpop.f32.mrf.mxu2 }
  0xf7   : > { %v863_v57 = vadd.f32 %v862_v56, %v814_v55 }
  0xf8   : > { %v911_v14 = vpop.f32.mrf.mxu3  ;;  %v816_v59 = vpop.f32.mrf.mxu1 }
  0xf9   : > { %v912_v60 = vadd.f32 %v911_v14, %v863_v57  ;;  %v817_v0 = vadd.f32 %v816_v59, %v768_v63 }
  0xfa   : > { %v963_v61 = vpop.f32.mrf.mxu0 }
  0xfb   : > { %v961_v62 = vadd.f32 %v960_v45, %v912_v60  ;;  %v1581_v5 = vpop.eup %1580 }
  0xfd   : > { %1582 = vtanh.f32 %v961_v62 }
  0xfe   : > { %v865_v23 = vpop.f32.mrf.mxu2 }
  0xff   : > { %v866_v2 = vadd.f32 %v865_v23, %v817_v0 }
 0x100   : > { %v914_v1 = vpop.f32.mrf.mxu3  ;;  %v818_v3 = vpop.f32.mrf.mxu1 }
 0x101   : > { %v915_v9 = vadd.f32 %v914_v1, %v866_v2  ;;  %v819_v10 = vadd.f32 %v818_v3, %v770_v7 }
 0x102   : > { %v965_v4 = vpop.f32.mrf.mxu0 }
 0x103   : > { %v1583_v6 = vpop.eup %1582  ;;  %v964_v13 = vadd.f32 %v963_v61, %v915_v9 }
 0x104   : > { %v1504_v8 = vpack.c.bf16 %v1583_v6, %v1581_v5 }
 0x105   : > { %1584 = vtanh.f32 %v964_v13 }
 0x106   : > { %1532 = vst [vmem:[%s1889_s22 + $0x10] sm:$0xff] %v1504_v8   ;;  %v867_v11 = vpop.f32.mrf.mxu2 }
 0x107   : > { %v868_v12 = vadd.f32 %v867_v11, %v819_v10 }
 0x108   : > { %v916_v39 = vpop.f32.mrf.mxu3  ;;  %v821_v15 = vpop.f32.mrf.mxu1 }
 0x109   : > { %v917_v16 = vadd.f32 %v916_v39, %v868_v12  ;;  %v822_v21 = vadd.f32 %v821_v15, %v1843_v20 }
 0x10a   : > { %v968_v17 = vpop.f32.mrf.mxu0 }
 0x10b   : > { %v966_v19 = vadd.f32 %v965_v4, %v917_v16  ;;  %v1585_v27 = vpop.eup %1584 }
 0x10d   : > { %1586 = vtanh.f32 %v966_v19 }
 0x10e   : > { %v870_v24 = vpop.f32.mrf.mxu2 }
 0x10f   : > { %v871_v18 = vadd.f32 %v870_v24, %v822_v21 }
 0x110   : > { %v919_v25 = vpop.f32.mrf.mxu3  ;;  %v823_v47 = vpop.f32.mrf.mxu1 }
 0x111   : > { %v920_v30 = vadd.f32 %v919_v25, %v871_v18  ;;  %v824_v31 = vadd.f32 %v823_v47, %v1859_v34 }
 0x112   : > { %v970_v26 = vpop.f32.mrf.mxu0 }
 0x113   : > { %v1587_v28 = vpop.eup %1586  ;;  %v969_v36 = vadd.f32 %v968_v17, %v920_v30 }
 0x114   : > { %v1509_v29 = vpack.c.bf16 %v1587_v28, %v1585_v27 }
 0x115   : > { %1588 = vtanh.f32 %v969_v36 }
 0x116   : > { %1533 = vst [vmem:[%s1889_s22 + $0x18] sm:$0xff] %v1509_v29   ;;  %v872_v32 = vpop.f32.mrf.mxu2 }
 0x117   : > { %v873_v33 = vadd.f32 %v872_v32, %v824_v31 }
 0x118   : > { %v921_v35 = vpop.f32.mrf.mxu3  ;;  %v826_v37 = vpop.f32.mrf.mxu1 }
 0x119   : > { %v922_v40 = vadd.f32 %v921_v35, %v873_v33  ;;  %v827_v42 = vadd.f32 %v826_v37, %v1868_v44 }
 0x11a   : > { %v973_v20 = vpop.f32.mrf.mxu0 }
 0x11b   : > { %v971_v41 = vadd.f32 %v970_v26, %v922_v40  ;;  %v1589_v51 = vpop.eup %1588 }
 0x11d   : > { %1590 = vtanh.f32 %v971_v41 }
 0x11e   : > { %v875_v43 = vpop.f32.mrf.mxu2 }
 0x11f   : > { %v876_v48 = vadd.f32 %v875_v43, %v827_v42 }
 0x120   : > { %v924_v45 = vpop.f32.mrf.mxu3  ;;  %v828_v49 = vpop.f32.mrf.mxu1 }
 0x121   : > { %v925_v55 = vadd.f32 %v924_v45, %v876_v48  ;;  %v829_v56 = vadd.f32 %v828_v49, %v1876_v50 }
 0x122   : > { %v975_v34 = vpop.f32.mrf.mxu0 }
 0x123   : > { %v1591_v53 = vpop.eup %1590  ;;  %v974_v59 = vadd.f32 %v973_v20, %v925_v55 }
 0x124   : > { %v1514_v54 = vpack.c.bf16 %v1591_v53, %v1589_v51 }
 0x125   : > { %1592 = vtanh.f32 %v974_v59 }
 0x126   : > { %1534 = vst [vmem:[%s1889_s22 + $0x20] sm:$0xff] %v1514_v54   ;;  %v877_v57 = vpop.f32.mrf.mxu2 }
 0x127   : > { %v878_v14 = vadd.f32 %v877_v57, %v829_v56 }
 0x128   : > { %v926_v58 = vpop.f32.mrf.mxu3  ;;  %v831_v60 = vpop.f32.mrf.mxu1 }
 0x129   : > { %v927_v61 = vadd.f32 %v926_v58, %v878_v14  ;;  %v832_v63 = vadd.f32 %v831_v60, %v1846_v22 }
 0x12a   : > { %v978_v62 = vpop.f32.mrf.mxu0 }
 0x12b   : > { %v976_v44 = vadd.f32 %v975_v34, %v927_v61  ;;  %v1593_v3 = vpop.eup %1592 }
 0x12d   : > { %1594 = vtanh.f32 %v976_v44 }
 0x12e   : > { %v880_v0 = vpop.f32.mrf.mxu2 }
 0x12f   : > { %v881_v1 = vadd.f32 %v880_v0, %v832_v63 }
 0x130   : > { %v929_v23 = vpop.f32.mrf.mxu3  ;;  %v833_v2 = vpop.f32.mrf.mxu1 }
 0x131   : > { %v930_v5 = vadd.f32 %v929_v23, %v881_v1  ;;  %v834_v6 = vadd.f32 %v833_v2, %v1862_v38 }
 0x132   : > { %v980_v7 = vpop.f32.mrf.mxu0 }
 0x133   : > { %v1595_v50 = vpop.eup %1594  ;;  %v979_v11 = vadd.f32 %v978_v62, %v930_v5 }
 0x134   : > { %v1519_v4 = vpack.c.bf16 %v1595_v50, %v1593_v3 }
 0x135   : > { %1596 = vtanh.f32 %v979_v11 }
 0x136   : > { %1535 = vst [vmem:[%s1889_s22 + $0x28] sm:$0xff] %v1519_v4   ;;  %v882_v8 = vpop.f32.mrf.mxu2 }
 0x137   : > { %v883_v9 = vadd.f32 %v882_v8, %v834_v6 }
 0x138   : > { %v931_v10 = vpop.f32.mrf.mxu3  ;;  %v836_v12 = vpop.f32.mrf.mxu1 }
 0x139   : > { %v932_v39 = vadd.f32 %v931_v10, %v883_v9  ;;  %v837_v13 = vadd.f32 %v836_v12, %v1871_v46 }
 0x13a   : > { %v983_v17 = vpop.f32.mrf.mxu0 }
 0x13b   : > { %v981_v22 = vadd.f32 %v980_v7, %v932_v39  ;;  %v1597_v21 = vpop.eup %1596 }
 0x13d   : > { %1598 = vtanh.f32 %v981_v22 }
 0x13e   : > { %v885_v15 = vpop.f32.mrf.mxu2 }
 0x13f   : > { %v886_v19 = vadd.f32 %v885_v15, %v837_v13 }
 0x140   : > { %v934_v16 = vpop.f32.mrf.mxu3  ;;  %v838_v38 = vpop.f32.mrf.mxu1 }
 0x141   : > { %v935_v18 = vadd.f32 %v934_v16, %v886_v19  ;;  %v839_v47 = vadd.f32 %v838_v38, %v1879_v52 }
 0x142   : > { %v985_v31 = vpop.f32.mrf.mxu0 }
 0x143   : > { %v1599_v24 = vpop.eup %1598  ;;  %v984_v28 = vadd.f32 %v983_v17, %v935_v18 }
 0x144   : > { %v1524_v25 = vpack.c.bf16 %v1599_v24, %v1597_v21 }
 0x145   : > { %1600 = vtanh.f32 %v984_v28 }
 0x146   : > { %1536 = vst [vmem:[%s1889_s22 + $0x30] sm:$0xff] %v1524_v25   ;;  %v887_v26 = vpop.f32.mrf.mxu2 }
 0x147   : > { %v888_v27 = vadd.f32 %v887_v26, %v839_v47 }
 0x148   : > { %v936_v29 = vpop.f32.mrf.mxu3 }
 0x149   : > { %v937_v30 = vadd.f32 %v936_v29, %v888_v27 }
 0x14b   : > { %v986_v46 = vadd.f32 %v985_v31, %v937_v30  ;;  %v1601_v32 = vpop.eup %1600 }
 0x14d   : > { %1602 = vtanh.f32 %v986_v46 }
 0x153   : > { %v1603_v33 = vpop.eup %1602 }
 0x154   : > { %v1529_v35 = vpack.c.bf16 %v1603_v33, %v1601_v32 }
 0x156   : > { %1537 = vst [vmem:[%s1889_s22 + $0x38] sm:$0xff] %v1529_v35  }
 0x157 PF: > { %s13_s12 = sadd.s32 1, %s1610_s12  }
 0x158   : > { %p10_p4 = scmp.ge.s32.totalorder %s13_s12, 4  }
 0x15a   :  { %12 = sbr.rel (!%p10_p4) target bundleno = 1 (0x1), region = 62 }

// kernel: my_model_forward.8
= control target key start
LH: loop header
LB: loop body
LE: loop exit
PB: predicated region body
PF: predicated region fallthrough
CT: control target
= control target key end

     0   :  { %vm369_vm0 = vcmask 523264   ;;  %s937_s1 = inlined_call_operand.vmem [shape: bf16[576,64], index: 1, kind: input, shape index: {}]   ;;  %s938_s2 = inlined_call_operand.vmem [shape: f32[1,64], index: 2, kind: input, shape index: {}]   ;;  %s939_s0 = inlined_call_operand.vmem [shape: bf16[32,576], index: 0, kind: input, shape index: {}]   ;;  %s940_s3 = inlined_call_operand.vmem [shape: f32[32,64], index: 3, kind: output, shape index: {}]  }
   0x1   :  { %v686_v0 = vld [vmem:[%s937_s1 + $0x38] sm:$0xff]  ;;  %v685_v4 = vld [vmem:[%s937_s1 + $0x30] sm:$0xff]  ;;  %v684_v8 = vld [vmem:[%s937_s1 + $0x28] sm:$0xff] }
   0x2   :  { %v694_v1 = vld [vmem:[%s937_s1 + $0x78] sm:$0xff]  ;;  %376 = vmatpush.bf16.msra.mxu0 %v686_v0  ;;  %v693_v5 = vld [vmem:[%s937_s1 + $0x70] sm:$0xff]  ;;  %v692_v9 = vld [vmem:[%s937_s1 + $0x68] sm:$0xff] }
   0x3   :  { %v702_v2 = vld [vmem:[%s937_s1 + $0xb8] sm:$0xff]  ;;  %395 = vmatpush.bf16.msra.mxu1 %v694_v1  ;;  %v701_v6 = vld [vmem:[%s937_s1 + $0xb0] sm:$0xff]  ;;  %v700_v10 = vld [vmem:[%s937_s1 + $0xa8] sm:$0xff] }
   0x4   :  { %v710_v3 = vld [vmem:[%s937_s1 + $0xf8] sm:$0xff]  ;;  %414 = vmatpush.bf16.msra.mxu2 %v702_v2  ;;  %v709_v7 = vld [vmem:[%s937_s1 + $0xf0] sm:$0xff]  ;;  %v708_v11 = vld [vmem:[%s937_s1 + $0xe8] sm:$0xff] }
   0x5   :  { %433 = vmatpush.bf16.msra.mxu3 %v710_v3  ;;  %v683_v12 = vld [vmem:[%s937_s1 + $0x20] sm:$0xff]  ;;  %v682_v16 = vld [vmem:[%s937_s1 + $0x18] sm:$0xff]  ;;  %v681_v20 = vld [vmem:[%s937_s1 + $0x10] sm:$0xff] }
   0x6   :  { %377 = vmatpush.bf16.msra.mxu0 %v685_v4  ;;  %v691_v13 = vld [vmem:[%s937_s1 + $0x60] sm:$0xff]  ;;  %v690_v17 = vld [vmem:[%s937_s1 + $0x58] sm:$0xff]  ;;  %v689_v21 = vld [vmem:[%s937_s1 + $0x50] sm:$0xff] }
   0x7   :  { %396 = vmatpush.bf16.msra.mxu1 %v693_v5  ;;  %v699_v14 = vld [vmem:[%s937_s1 + $0xa0] sm:$0xff]  ;;  %v698_v18 = vld [vmem:[%s937_s1 + $0x98] sm:$0xff]  ;;  %v697_v22 = vld [vmem:[%s937_s1 + $0x90] sm:$0xff] }
   0x8   :  { %415 = vmatpush.bf16.msra.mxu2 %v701_v6  ;;  %v707_v15 = vld [vmem:[%s937_s1 + $0xe0] sm:$0xff]  ;;  %v706_v19 = vld [vmem:[%s937_s1 + $0xd8] sm:$0xff]  ;;  %v705_v23 = vld [vmem:[%s937_s1 + $0xd0] sm:$0xff] }
   0x9   :  { %434 = vmatpush.bf16.msra.mxu3 %v709_v7  ;;  %v680_v24 = vld [vmem:[%s937_s1 + $0x8] sm:$0xff]  ;;  %v679_v28 = vld [vmem:[%s937_s1] sm:$0xff]  ;;  %v671_v33 = vld [vmem:[%s939_s0 + $0x10] sm:$0xf0] }
   0xa   :  { %378 = vmatpush.bf16.msra.mxu0 %v684_v8  ;;  %v688_v25 = vld [vmem:[%s937_s1 + $0x48] sm:$0xff]  ;;  %v687_v29 = vld [vmem:[%s937_s1 + $0x40] sm:$0xff]  ;;  %v487_v35 = vld [vmem:[%s939_s0 + $0x14] sm:$0xf0] }
   0xb   :  { %397 = vmatpush.bf16.msra.mxu1 %v692_v9  ;;  %v696_v26 = vld [vmem:[%s937_s1 + $0x88] sm:$0xff]  ;;  %v695_v30 = vld [vmem:[%s937_s1 + $0x80] sm:$0xff]  ;;  %v672_v37 = vld [vmem:[%s939_s0 + $0x18] sm:$0xf0] }
   0xc   :  { %416 = vmatpush.bf16.msra.mxu2 %v700_v10  ;;  %v704_v27 = vld [vmem:[%s937_s1 + $0xc8] sm:$0xff]  ;;  %v703_v31 = vld [vmem:[%s937_s1 + $0xc0] sm:$0xff]  ;;  %v714_v40 = vld [vmem:[%s937_s1 + $0x118] sm:$0xff] }
   0xd   :  { %435 = vmatpush.bf16.msra.mxu3 %v708_v11  ;;  %v485_v32 = vld [vmem:[%s939_s0] sm:$0xf]  ;;  %v669_v34 = vld [vmem:[%s939_s0 + $0x4] sm:$0xf]  ;;  %v493_v36 = vld [vmem:[%s939_s0 + $0x8] sm:$0xf] }
   0xe   :  { %379 = vmatpush.bf16.msra.mxu0 %v683_v12  ;;  %v670_v38 = vld [vmem:[%s939_s0 + $0xc] sm:$0xf]  ;;  %v495_v39 = vld [vmem:[%s939_s0 + $0x1c] sm:$0xf0]  ;;  %v486_v41 = vor.u32 %v671_v33, %v485_v32  ;;  %v490_v42 = vor.u32 %v669_v34, %v487_v35  ;;  %v494_v43 = vor.u32 %v672_v37, %v493_v36  ;;  %v713_v45 = vld [vmem:[%s937_s1 + $0x110] sm:$0xff] }
   0xf   :  { %398 = vmatpush.bf16.msra.mxu1 %v691_v13  ;;  %v498_v44 = vor.u32 %v670_v38, %v495_v39  ;;  %v712_v46 = vld [vmem:[%s937_s1 + $0x108] sm:$0xff]  ;;  %v711_v47 = vld [vmem:[%s937_s1 + $0x100] sm:$0xff]  ;;  %v676_v49 = vld [vmem:[%s939_s0 + $0x38] sm:$0xf0] }
  0x10   :  { %417 = vmatpush.bf16.msra.mxu2 %v699_v14  ;;  %v505_v48 = vld [vmem:[%s939_s0 + $0x28] sm:$0xf]  ;;  %v674_v50 = vld [vmem:[%s939_s0 + $0x2c] sm:$0xf]  ;;  %v507_v51 = vld [vmem:[%s939_s0 + $0x3c] sm:$0xf0] }
  0x11   :  { %436 = vmatpush.bf16.msra.mxu3 %v707_v15  ;;  %v513_v52 = vld [vmem:[%s939_s0 + $0x30] sm:$0xf]  ;;  %v677_v53 = vld [vmem:[%s939_s0 + $0x40] sm:$0xf0]  ;;  %v675_v54 = vld [vmem:[%s939_s0 + $0x34] sm:$0xf]  ;;  %v506_v56 = vor.u32 %v676_v49, %v505_v48  ;;  %v510_v57 = vor.u32 %v674_v50, %v507_v51 }
  0x12   :  { %380 = vmatpush.bf16.msra.mxu0 %v682_v16  ;;  %v515_v55 = vld [vmem:[%s939_s0 + $0x44] sm:$0xf0]  ;;  %v514_v58 = vor.u32 %v677_v53, %v513_v52  ;;  %v501_v60 = vld [vmem:[%s939_s0 + $0x10] sm:$0xf]  ;;  %v673_v61 = vld [vmem:[%s939_s0 + $0x20] sm:$0xf0] }
  0x13   :  { %399 = vmatpush.bf16.msra.mxu1 %v690_v17  ;;  %v518_v59 = vor.u32 %v675_v54, %v515_v55  ;;  %v521_v62 = vld [vmem:[%s939_s0 + $0x38] sm:$0xf]  ;;  %v678_v63 = vld [vmem:[%s939_s0 + $0x48] sm:$0xf0]  ;;  %v502_v0 = vor.u32 %v673_v61, %v501_v60  ;;  %v719_v11 = vld [vmem:[%s938_s2] ss:$0 sm:$0xff] }
  0x14   :  { %418 = vmatpush.bf16.msra.mxu2 %v698_v18  ;;  %v522_v1 = vor.u32 %v678_v63, %v521_v62 }
  0x15   :  { %437 = vmatpush.bf16.msra.mxu3 %v706_v19 }
  0x16   :  { %381 = vmatpush.bf16.msra.mxu0 %v681_v20 }
  0x17   :  { %400 = vmatpush.bf16.msra.mxu1 %v689_v21 }
  0x18   :  { %419 = vmatpush.bf16.msra.mxu2 %v697_v22 }
  0x19   :  { %438 = vmatpush.bf16.msra.mxu3 %v705_v23 }
  0x1a   :  { %382 = vmatpush.bf16.msra.mxu0 %v680_v24 }
  0x1b   :  { %401 = vmatpush.bf16.msra.mxu1 %v688_v25 }
  0x1c   :  { %420 = vmatpush.bf16.msra.mxu2 %v696_v26 }
  0x1d   :  { %439 = vmatpush.bf16.msra.mxu3 %v704_v27 }
  0x1e   :  { %383 = vmatpush.bf16.msra.mxu0 %v679_v28 }
  0x1f   :  { %402 = vmatpush.bf16.msra.mxu1 %v687_v29 }
  0x20   :  { %421 = vmatpush.bf16.msra.mxu2 %v695_v30 }
  0x21   :  { %440 = vmatpush.bf16.msra.mxu3 %v703_v31  ;;  %384 = vmatmul.bf16.vlgmr.msra.gmra.mxu0 %v486_v41 }
  0x22   :  { %456 = vmatpush.bf16.msrb.mxu0 %v714_v40  ;;  %403 = vmatmul.bf16.vlgmr.msra.gmra.mxu1 %v490_v42 }
  0x23   :  { %715 = vmatpush.bf16.msrb.mxu1 %v714_v40  ;;  %422 = vmatmul.bf16.vlgmr.msra.gmra.mxu2 %v494_v43 }
  0x24   :  { %441 = vmatmul.bf16.vlgmr.msra.gmra.mxu3 %v498_v44 }
  0x26   :  { %457 = vmatpush.bf16.msrb.mxu0 %v713_v45 }
  0x27   :  { %716 = vmatpush.bf16.msrb.mxu1 %v713_v45 }
  0x2a   :  { %458 = vmatpush.bf16.msrb.mxu0 %v712_v46 }
  0x2b   :  { %717 = vmatpush.bf16.msrb.mxu1 %v712_v46 }
  0x2e   :  { %459 = vmatpush.bf16.msrb.mxu0 %v711_v47 }
  0x2f   :  { %718 = vmatpush.bf16.msrb.mxu1 %v711_v47 }
  0x31   :  { %389 = vmatmul.bf16.gmra.mxu0 %v506_v56 }
  0x32   :  { %408 = vmatmul.bf16.gmra.mxu1 %v510_v57 }
  0x33   :  { %427 = vmatmul.bf16.gmra.mxu2 %v514_v58 }
  0x34   :  { %446 = vmatmul.bf16.gmra.mxu3 %v518_v59 }
  0x41   :  { %667 = vmatmul.msk.bf16.vlgmr.msrb.gmra.mxu0 %vm369_vm0, %v502_v0 }
  0x42   :  { %668 = vmatmul.msk.bf16.vlgmr.msrb.gmra.mxu1 %vm369_vm0, %v522_v1 }
  0x9e   :  { %v385_v2 = vpop.f32.mrf.mxu0 }
  0x9f   :  { %v404_v3 = vpop.f32.mrf.mxu1  ;;  %v386_v13 = vadd.f32 %v719_v11, %v385_v2 }
  0xa1   :  { %v405_v18 = vadd.f32 %v404_v3, %v386_v13 }
  0xa6   :  { %v423_v4 = vpop.f32.mrf.mxu2  ;;  %v387_v6 = vpop.f32.mrf.mxu0 }
  0xa7   :  { %v442_v5 = vpop.f32.mrf.mxu3  ;;  %v406_v7 = vpop.f32.mrf.mxu1  ;;  %v424_v20 = vadd.f32 %v423_v4, %v405_v18  ;;  %v388_v23 = vadd.f32 %v719_v11, %v387_v6 }
  0xa9   :  { %v443_v25 = vadd.f32 %v442_v5, %v424_v20  ;;  %v407_v30 = vadd.f32 %v406_v7, %v388_v23 }
  0xae   :  { %v425_v8 = vpop.f32.mrf.mxu2  ;;  %v390_v9 = vpop.f32.mrf.mxu0 }
  0xaf   :  { %v409_v10 = vpop.f32.mrf.mxu1  ;;  %v444_v12 = vpop.f32.mrf.mxu3  ;;  %v391_v14 = vadd.f32 %v719_v11, %v390_v9  ;;  %v426_v34 = vadd.f32 %v425_v8, %v407_v30 }
  0xb1   :  { %v410_v19 = vadd.f32 %v409_v10, %v391_v14  ;;  %v445_v37 = vadd.f32 %v444_v12, %v426_v34 }
  0xb6   :  { %v428_v15 = vpop.f32.mrf.mxu2  ;;  %v392_v16 = vpop.f32.mrf.mxu0 }
  0xb7   :  { %v411_v17 = vpop.f32.mrf.mxu1  ;;  %v429_v21 = vadd.f32 %v428_v15, %v410_v19  ;;  %v447_v22 = vpop.f32.mrf.mxu3  ;;  %v393_v24 = vadd.f32 %v719_v11, %v392_v16 }
  0xb9   :  { %v448_v26 = vadd.f32 %v447_v22, %v429_v21  ;;  %v412_v31 = vadd.f32 %v411_v17, %v393_v24 }
  0xbe   :  { %v430_v27 = vpop.f32.mrf.mxu2  ;;  %v461_v28 = vpop.f32.mrf.mxu0 }
  0xbf   :  { %v466_v29 = vpop.f32.mrf.mxu1  ;;  %v462_v32 = vadd.f32 %v461_v28, %v443_v25  ;;  %v431_v35 = vadd.f32 %v430_v27, %v412_v31  ;;  %v449_v36 = vpop.f32.mrf.mxu3 }
  0xc0   :  { %v467_v33 = vadd.f32 %v466_v29, %v448_v26 }
  0xc1   :  { %720 = vtanh.f32 %v462_v32  ;;  %v450_v38 = vadd.f32 %v449_v36, %v431_v35 }
  0xc2   :  { %722 = vtanh.f32 %v467_v33 }
  0xc6   :  { %v463_v39 = vpop.f32.mrf.mxu0 }
  0xc7   :  { %v468_v40 = vpop.f32.mrf.mxu1  ;;  %v721_v41 = vpop.eup %720  ;;  %v464_v42 = vadd.f32 %v463_v39, %v445_v37 }
  0xc8   :  { %v469_v43 = vadd.f32 %v468_v40, %v450_v38  ;;  %v723_v44 = vpop.eup %722  ;;  %475 = vst.msk [vmem:[%s940_s3] sm:$0xff] %vm369_vm0, %v721_v41 }
  0xc9   :  { %477 = vst.msk [vmem:[%s940_s3 + $0x10] sm:$0xff] %vm369_vm0, %v723_v44  ;;  %724 = vtanh.f32 %v464_v42 }
  0xca   :  { %726 = vtanh.f32 %v469_v43 }
  0xcf   :  { %v725_v45 = vpop.eup %724 }
  0xd0   :  { %v727_v46 = vpop.eup %726  ;;  %476 = vst.msk [vmem:[%s940_s3 + $0x8] sm:$0xff] %vm369_vm0, %v725_v45 }
  0xd1   :  { %478 = vst.msk [vmem:[%s940_s3 + $0x18] sm:$0xff] %vm369_vm0, %v727_v46 }

// kernel: my_model_forward.9
= control target key start
LH: loop header
LB: loop body
LE: loop exit
PB: predicated region body
PF: predicated region fallthrough
CT: control target
= control target key end

     0   :  { %vm977_vm0 = vcmask 523264   ;;  %s2385_s1 = inlined_call_operand.vmem [shape: bf16[1600,64], index: 1, kind: input, shape index: {}]   ;;  %s2386_s0 = inlined_call_operand.vmem [shape: bf16[32,1600], index: 0, kind: input, shape index: {}]   ;;  %s2387_s2 = inlined_call_operand.vmem [shape: f32[1,64], index: 2, kind: input, shape index: {}]   ;;  %s2388_s3 = inlined_call_operand.vmem [shape: f32[32,64], index: 3, kind: output, shape index: {}]  }
   0x1   :  { %v1782_v0 = vld [vmem:[%s2385_s1 + $0x38] sm:$0xff]  ;;  %v1781_v4 = vld [vmem:[%s2385_s1 + $0x30] sm:$0xff]  ;;  %v1780_v8 = vld [vmem:[%s2385_s1 + $0x28] sm:$0xff] }
   0x2   :  { %v1790_v1 = vld [vmem:[%s2385_s1 + $0x78] sm:$0xff]  ;;  %984 = vmatpush.bf16.msra.mxu0 %v1782_v0  ;;  %v1789_v5 = vld [vmem:[%s2385_s1 + $0x70] sm:$0xff]  ;;  %v1788_v9 = vld [vmem:[%s2385_s1 + $0x68] sm:$0xff] }
   0x3   :  { %v1798_v2 = vld [vmem:[%s2385_s1 + $0xb8] sm:$0xff]  ;;  %1003 = vmatpush.bf16.msra.mxu1 %v1790_v1  ;;  %v1797_v6 = vld [vmem:[%s2385_s1 + $0xb0] sm:$0xff]  ;;  %v1796_v10 = vld [vmem:[%s2385_s1 + $0xa8] sm:$0xff] }
   0x4   :  { %v1806_v3 = vld [vmem:[%s2385_s1 + $0xf8] sm:$0xff]  ;;  %1022 = vmatpush.bf16.msra.mxu2 %v1798_v2  ;;  %v1805_v7 = vld [vmem:[%s2385_s1 + $0xf0] sm:$0xff]  ;;  %v1804_v11 = vld [vmem:[%s2385_s1 + $0xe8] sm:$0xff] }
   0x5   :  { %1041 = vmatpush.bf16.msra.mxu3 %v1806_v3  ;;  %v1779_v12 = vld [vmem:[%s2385_s1 + $0x20] sm:$0xff]  ;;  %v1778_v16 = vld [vmem:[%s2385_s1 + $0x18] sm:$0xff]  ;;  %v1777_v20 = vld [vmem:[%s2385_s1 + $0x10] sm:$0xff] }
   0x6   :  { %985 = vmatpush.bf16.msra.mxu0 %v1781_v4  ;;  %v1787_v13 = vld [vmem:[%s2385_s1 + $0x60] sm:$0xff]  ;;  %v1786_v17 = vld [vmem:[%s2385_s1 + $0x58] sm:$0xff]  ;;  %v1785_v21 = vld [vmem:[%s2385_s1 + $0x50] sm:$0xff] }
   0x7   :  { %1004 = vmatpush.bf16.msra.mxu1 %v1789_v5  ;;  %v1795_v14 = vld [vmem:[%s2385_s1 + $0xa0] sm:$0xff]  ;;  %v1794_v18 = vld [vmem:[%s2385_s1 + $0x98] sm:$0xff]  ;;  %v1793_v22 = vld [vmem:[%s2385_s1 + $0x90] sm:$0xff] }
   0x8   :  { %1023 = vmatpush.bf16.msra.mxu2 %v1797_v6  ;;  %v1803_v15 = vld [vmem:[%s2385_s1 + $0xe0] sm:$0xff]  ;;  %v1802_v19 = vld [vmem:[%s2385_s1 + $0xd8] sm:$0xff]  ;;  %v1801_v23 = vld [vmem:[%s2385_s1 + $0xd0] sm:$0xff] }
   0x9   :  { %1042 = vmatpush.bf16.msra.mxu3 %v1805_v7  ;;  %v1776_v24 = vld [vmem:[%s2385_s1 + $0x8] sm:$0xff]  ;;  %v1775_v28 = vld [vmem:[%s2385_s1] sm:$0xff]  ;;  %v1755_v33 = vld [vmem:[%s2386_s0 + $0x30] sm:$0xf0] }
   0xa   :  { %986 = vmatpush.bf16.msra.mxu0 %v1780_v8  ;;  %v1784_v25 = vld [vmem:[%s2385_s1 + $0x48] sm:$0xff]  ;;  %v1783_v29 = vld [vmem:[%s2385_s1 + $0x40] sm:$0xff]  ;;  %v1247_v35 = vld [vmem:[%s2386_s0 + $0x34] sm:$0xf0] }
   0xb   :  { %1005 = vmatpush.bf16.msra.mxu1 %v1788_v9  ;;  %v1792_v26 = vld [vmem:[%s2385_s1 + $0x88] sm:$0xff]  ;;  %v1791_v30 = vld [vmem:[%s2385_s1 + $0x80] sm:$0xff]  ;;  %v1756_v37 = vld [vmem:[%s2386_s0 + $0x38] sm:$0xf0] }
   0xc   :  { %1024 = vmatpush.bf16.msra.mxu2 %v1796_v10  ;;  %v1800_v27 = vld [vmem:[%s2385_s1 + $0xc8] sm:$0xff]  ;;  %v1799_v31 = vld [vmem:[%s2385_s1 + $0xc0] sm:$0xff]  ;;  %v1814_v40 = vld [vmem:[%s2385_s1 + $0x138] sm:$0xff] }
   0xd   :  { %1043 = vmatpush.bf16.msra.mxu3 %v1804_v11  ;;  %v1245_v32 = vld [vmem:[%s2386_s0] sm:$0xf]  ;;  %v1749_v34 = vld [vmem:[%s2386_s0 + $0x4] sm:$0xf]  ;;  %v1253_v36 = vld [vmem:[%s2386_s0 + $0x8] sm:$0xf] }
   0xe   :  { %987 = vmatpush.bf16.msra.mxu0 %v1779_v12  ;;  %v1750_v38 = vld [vmem:[%s2386_s0 + $0xc] sm:$0xf]  ;;  %v1255_v39 = vld [vmem:[%s2386_s0 + $0x3c] sm:$0xf0]  ;;  %v1822_v41 = vld [vmem:[%s2385_s1 + $0x178] sm:$0xff]  ;;  %v1246_v42 = vor.u32 %v1755_v33, %v1245_v32  ;;  %v1250_v43 = vor.u32 %v1749_v34, %v1247_v35  ;;  %v1254_v44 = vor.u32 %v1756_v37, %v1253_v36 }
   0xf   :  { %1006 = vmatpush.bf16.msra.mxu1 %v1787_v13  ;;  %v1258_v45 = vor.u32 %v1750_v38, %v1255_v39  ;;  %v1830_v46 = vld [vmem:[%s2385_s1 + $0x1b8] sm:$0xff]  ;;  %v1813_v48 = vld [vmem:[%s2385_s1 + $0x130] sm:$0xff]  ;;  %v1812_v52 = vld [vmem:[%s2385_s1 + $0x128] sm:$0xff] }
  0x10   :  { %1025 = vmatpush.bf16.msra.mxu2 %v1795_v14  ;;  %v1838_v47 = vld [vmem:[%s2385_s1 + $0x1f8] sm:$0xff]  ;;  %v1821_v49 = vld [vmem:[%s2385_s1 + $0x170] sm:$0xff]  ;;  %v1820_v53 = vld [vmem:[%s2385_s1 + $0x168] sm:$0xff] }
  0x11   :  { %1044 = vmatpush.bf16.msra.mxu3 %v1803_v15  ;;  %v1829_v50 = vld [vmem:[%s2385_s1 + $0x1b0] sm:$0xff]  ;;  %v1828_v54 = vld [vmem:[%s2385_s1 + $0x1a8] sm:$0xff]  ;;  %v1811_v56 = vld [vmem:[%s2385_s1 + $0x120] sm:$0xff] }
  0x12   :  { %988 = vmatpush.bf16.msra.mxu0 %v1778_v16  ;;  %v1837_v51 = vld [vmem:[%s2385_s1 + $0x1f0] sm:$0xff]  ;;  %v1836_v55 = vld [vmem:[%s2385_s1 + $0x1e8] sm:$0xff]  ;;  %v1819_v57 = vld [vmem:[%s2385_s1 + $0x160] sm:$0xff] }
  0x13   :  { %1007 = vmatpush.bf16.msra.mxu1 %v1786_v17  ;;  %v1827_v58 = vld [vmem:[%s2385_s1 + $0x1a0] sm:$0xff]  ;;  %v1297_v60 = vld [vmem:[%s2386_s0 + $0x68] sm:$0xf]  ;;  %v1768_v61 = vld [vmem:[%s2386_s0 + $0x98] sm:$0xf0] }
  0x14   :  { %1026 = vmatpush.bf16.msra.mxu2 %v1794_v18  ;;  %v1835_v59 = vld [vmem:[%s2385_s1 + $0x1e0] sm:$0xff]  ;;  %v1762_v62 = vld [vmem:[%s2386_s0 + $0x6c] sm:$0xf]  ;;  %v1305_v0 = vld [vmem:[%s2386_s0 + $0x70] sm:$0xf]  ;;  %v1298_v6 = vor.u32 %v1768_v61, %v1297_v60 }
  0x15   :  { %1045 = vmatpush.bf16.msra.mxu3 %v1802_v19  ;;  %v1299_v63 = vld [vmem:[%s2386_s0 + $0x9c] sm:$0xf0]  ;;  %v1769_v1 = vld [vmem:[%s2386_s0 + $0xa0] sm:$0xf0]  ;;  %v1763_v2 = vld [vmem:[%s2386_s0 + $0x74] sm:$0xf] }
  0x16   :  { %989 = vmatpush.bf16.msra.mxu0 %v1777_v20  ;;  %v1307_v3 = vld [vmem:[%s2386_s0 + $0xa4] sm:$0xf0]  ;;  %v1810_v4 = vld [vmem:[%s2385_s1 + $0x118] sm:$0xff]  ;;  %v1302_v7 = vor.u32 %v1762_v62, %v1299_v63  ;;  %v1306_v8 = vor.u32 %v1769_v1, %v1305_v0  ;;  %v1809_v12 = vld [vmem:[%s2385_s1 + $0x110] sm:$0xff] }
  0x17   :  { %1008 = vmatpush.bf16.msra.mxu1 %v1785_v21  ;;  %v1818_v5 = vld [vmem:[%s2385_s1 + $0x158] sm:$0xff]  ;;  %v1310_v9 = vor.u32 %v1763_v2, %v1307_v3  ;;  %v1817_v13 = vld [vmem:[%s2385_s1 + $0x150] sm:$0xff]  ;;  %v1808_v16 = vld [vmem:[%s2385_s1 + $0x108] sm:$0xff] }
  0x18   :  { %1027 = vmatpush.bf16.msra.mxu2 %v1793_v22  ;;  %v1826_v10 = vld [vmem:[%s2385_s1 + $0x198] sm:$0xff]  ;;  %v1825_v14 = vld [vmem:[%s2385_s1 + $0x190] sm:$0xff]  ;;  %v1816_v17 = vld [vmem:[%s2385_s1 + $0x148] sm:$0xff] }
  0x19   :  { %1046 = vmatpush.bf16.msra.mxu3 %v1801_v23  ;;  %v1834_v11 = vld [vmem:[%s2385_s1 + $0x1d8] sm:$0xff]  ;;  %v1833_v15 = vld [vmem:[%s2385_s1 + $0x1d0] sm:$0xff]  ;;  %v1824_v18 = vld [vmem:[%s2385_s1 + $0x188] sm:$0xff] }
  0x1a   :  { %990 = vmatpush.bf16.msra.mxu0 %v1776_v24  ;;  %v1832_v19 = vld [vmem:[%s2385_s1 + $0x1c8] sm:$0xff]  ;;  %v1807_v20 = vld [vmem:[%s2385_s1 + $0x100] sm:$0xff]  ;;  %v1261_v22 = vld [vmem:[%s2386_s0 + $0x10] sm:$0xf] }
  0x1b   :  { %1009 = vmatpush.bf16.msra.mxu1 %v1784_v25  ;;  %v1815_v21 = vld [vmem:[%s2385_s1 + $0x140] sm:$0xff]  ;;  %v1752_v32 = vld [vmem:[%s2386_s0 + $0x1c] sm:$0xf]  ;;  %v1271_v33 = vld [vmem:[%s2386_s0 + $0x4c] sm:$0xf0] }
  0x1c   :  { %1028 = vmatpush.bf16.msra.mxu2 %v1792_v26  ;;  %v1823_v23 = vld [vmem:[%s2385_s1 + $0x180] sm:$0xff]  ;;  %v1846_v26 = vld [vmem:[%s2385_s1 + $0x238] sm:$0xff]  ;;  %v1274_v39 = vor.u32 %v1752_v32, %v1271_v33  ;;  %v1329_v32 = vld [vmem:[%s2386_s0 + $0x88] sm:$0xf] }
  0x1d   :  { %1047 = vmatpush.bf16.msra.mxu3 %v1800_v27  ;;  %v1831_v24 = vld [vmem:[%s2385_s1 + $0x1c0] sm:$0xff]  ;;  %v1854_v27 = vld [vmem:[%s2385_s1 + $0x278] sm:$0xff] }
  0x1e   :  { %991 = vmatpush.bf16.msra.mxu0 %v1775_v28  ;;  %v1757_v25 = vld [vmem:[%s2386_s0 + $0x40] sm:$0xf0]  ;;  %v1751_v28 = vld [vmem:[%s2386_s0 + $0x14] sm:$0xf]  ;;  %v1862_v34 = vld [vmem:[%s2385_s1 + $0x2b8] sm:$0xff] }
  0x1f   :  { %1010 = vmatpush.bf16.msra.mxu1 %v1783_v29  ;;  %v1263_v29 = vld [vmem:[%s2386_s0 + $0x44] sm:$0xf0]  ;;  %v1870_v35 = vld [vmem:[%s2385_s1 + $0x2f8] sm:$0xff]  ;;  %v1262_v36 = vor.u32 %v1757_v25, %v1261_v22 }
  0x20   :  { %1029 = vmatpush.bf16.msra.mxu2 %v1791_v30  ;;  %v1269_v30 = vld [vmem:[%s2386_s0 + $0x18] sm:$0xf]  ;;  %v1266_v37 = vor.u32 %v1751_v28, %v1263_v29  ;;  %v1760_v22 = vld [vmem:[%s2386_s0 + $0x58] sm:$0xf0]  ;;  %v1873_v29 = vld [vmem:[%s2385_s1 + $0x310] sm:$0xff] }
  0x21   :  { %1048 = vmatpush.bf16.msra.mxu3 %v1799_v31  ;;  %992 = vmatmul.bf16.vlgmr.msra.gmra.mxu0 %v1246_v42  ;;  %v1758_v31 = vld [vmem:[%s2386_s0 + $0x48] sm:$0xf0]  ;;  %v1861_v42 = vld [vmem:[%s2385_s1 + $0x2b0] sm:$0xff]  ;;  %v1842_v60 = vld [vmem:[%s2385_s1 + $0x218] sm:$0xff] }
  0x22   :  { %1060 = vmatpush.bf16.msrb.mxu0 %v1814_v40  ;;  %1011 = vmatmul.bf16.vlgmr.msra.gmra.mxu1 %v1250_v43  ;;  %v1270_v38 = vor.u32 %v1758_v31, %v1269_v30  ;;  %v1845_v40 = vld [vmem:[%s2385_s1 + $0x230] sm:$0xff]  ;;  %v1850_v61 = vld [vmem:[%s2385_s1 + $0x258] sm:$0xff]  ;;  %v1872_v30 = vld [vmem:[%s2385_s1 + $0x308] sm:$0xff] }
  0x23   :  { %1079 = vmatpush.bf16.msrb.mxu1 %v1822_v41  ;;  %1030 = vmatmul.bf16.vlgmr.msra.gmra.mxu2 %v1254_v44  ;;  %v1853_v41 = vld [vmem:[%s2385_s1 + $0x270] sm:$0xff]  ;;  %v1844_v44 = vld [vmem:[%s2385_s1 + $0x228] sm:$0xff]  ;;  %v1858_v62 = vld [vmem:[%s2385_s1 + $0x298] sm:$0xff] }
  0x24   :  { %1049 = vmatmul.bf16.vlgmr.msra.gmra.mxu3 %v1258_v45  ;;  %1098 = vmatpush.bf16.msrb.mxu2 %v1830_v46  ;;  %v1869_v43 = vld [vmem:[%s2385_s1 + $0x2f0] sm:$0xff]  ;;  %v1852_v45 = vld [vmem:[%s2385_s1 + $0x268] sm:$0xff]  ;;  %v1866_v63 = vld [vmem:[%s2385_s1 + $0x2d8] sm:$0xff] }
  0x25   :  { %1117 = vmatpush.bf16.msrb.mxu3 %v1838_v47  ;;  %v1860_v46 = vld [vmem:[%s2385_s1 + $0x2a8] sm:$0xff]  ;;  %v1871_v31 = vld [vmem:[%s2385_s1 + $0x300] sm:$0xff]  ;;  %v1772_v33 = vld [vmem:[%s2386_s0 + $0xb8] sm:$0xf0] }
  0x26   :  { %1061 = vmatpush.bf16.msrb.mxu0 %v1813_v48  ;;  %v1868_v47 = vld [vmem:[%s2385_s1 + $0x2e8] sm:$0xff]  ;;  %v1843_v48 = vld [vmem:[%s2385_s1 + $0x220] sm:$0xff] }
  0x27   :  { %1080 = vmatpush.bf16.msrb.mxu1 %v1821_v49  ;;  %v1851_v49 = vld [vmem:[%s2385_s1 + $0x260] sm:$0xff] }
  0x28   :  { %1099 = vmatpush.bf16.msrb.mxu2 %v1829_v50  ;;  %v1859_v50 = vld [vmem:[%s2385_s1 + $0x2a0] sm:$0xff] }
  0x29   :  { %1118 = vmatpush.bf16.msrb.mxu3 %v1837_v51  ;;  %v1867_v51 = vld [vmem:[%s2385_s1 + $0x2e0] sm:$0xff] }
  0x2a   :  { %1062 = vmatpush.bf16.msrb.mxu0 %v1812_v52  ;;  %v1313_v52 = vld [vmem:[%s2386_s0 + $0x78] sm:$0xf] }
  0x2b   :  { %1081 = vmatpush.bf16.msrb.mxu1 %v1820_v53  ;;  %v1770_v53 = vld [vmem:[%s2386_s0 + $0xa8] sm:$0xf0] }
  0x2c   :  { %1100 = vmatpush.bf16.msrb.mxu2 %v1828_v54  ;;  %v1764_v54 = vld [vmem:[%s2386_s0 + $0x7c] sm:$0xf]  ;;  %v1314_v0 = vor.u32 %v1770_v53, %v1313_v52 }
  0x2d   :  { %1119 = vmatpush.bf16.msrb.mxu3 %v1836_v55  ;;  %v1315_v55 = vld [vmem:[%s2386_s0 + $0xac] sm:$0xf0] }
  0x2e   :  { %1063 = vmatpush.bf16.msrb.mxu0 %v1811_v56  ;;  %v1321_v56 = vld [vmem:[%s2386_s0 + $0x80] sm:$0xf]  ;;  %v1318_v1 = vor.u32 %v1764_v54, %v1315_v55 }
  0x2f   :  { %1082 = vmatpush.bf16.msrb.mxu1 %v1819_v57  ;;  %v1771_v57 = vld [vmem:[%s2386_s0 + $0xb0] sm:$0xf0] }
  0x30   :  { %1101 = vmatpush.bf16.msrb.mxu2 %v1827_v58  ;;  %v1765_v58 = vld [vmem:[%s2386_s0 + $0x84] sm:$0xf]  ;;  %v1322_v2 = vor.u32 %v1771_v57, %v1321_v56 }
  0x31   :  { %1120 = vmatpush.bf16.msrb.mxu3 %v1835_v59  ;;  %997 = vmatmul.bf16.gmra.mxu0 %v1298_v6  ;;  %v1323_v59 = vld [vmem:[%s2386_s0 + $0xb4] sm:$0xf0]  ;;  %v1857_v6 = vld [vmem:[%s2385_s1 + $0x290] sm:$0xff] }
  0x32   :  { %1064 = vmatpush.bf16.msrb.mxu0 %v1810_v4  ;;  %1016 = vmatmul.bf16.gmra.mxu1 %v1302_v7  ;;  %v1326_v3 = vor.u32 %v1765_v58, %v1323_v59  ;;  %v1841_v4 = vld [vmem:[%s2385_s1 + $0x210] sm:$0xff] }
  0x33   :  { %1083 = vmatpush.bf16.msrb.mxu1 %v1818_v5  ;;  %1035 = vmatmul.bf16.gmra.mxu2 %v1306_v8  ;;  %v1849_v5 = vld [vmem:[%s2385_s1 + $0x250] sm:$0xff]  ;;  %v1840_v8 = vld [vmem:[%s2385_s1 + $0x208] sm:$0xff] }
  0x34   :  { %1054 = vmatmul.bf16.gmra.mxu3 %v1310_v9  ;;  %1102 = vmatpush.bf16.msrb.mxu2 %v1826_v10  ;;  %v1865_v7 = vld [vmem:[%s2385_s1 + $0x2d0] sm:$0xff]  ;;  %v1848_v9 = vld [vmem:[%s2385_s1 + $0x248] sm:$0xff] }
  0x35   :  { %1121 = vmatpush.bf16.msrb.mxu3 %v1834_v11  ;;  %v1856_v10 = vld [vmem:[%s2385_s1 + $0x288] sm:$0xff] }
  0x36   :  { %1065 = vmatpush.bf16.msrb.mxu0 %v1809_v12  ;;  %v1864_v11 = vld [vmem:[%s2385_s1 + $0x2c8] sm:$0xff]  ;;  %v1839_v12 = vld [vmem:[%s2385_s1 + $0x200] sm:$0xff] }
  0x37   :  { %1084 = vmatpush.bf16.msrb.mxu1 %v1817_v13  ;;  %v1847_v13 = vld [vmem:[%s2385_s1 + $0x240] sm:$0xff] }
  0x38   :  { %1103 = vmatpush.bf16.msrb.mxu2 %v1825_v14  ;;  %v1855_v14 = vld [vmem:[%s2385_s1 + $0x280] sm:$0xff] }
  0x39   :  { %1122 = vmatpush.bf16.msrb.mxu3 %v1833_v15  ;;  %v1863_v15 = vld [vmem:[%s2385_s1 + $0x2c0] sm:$0xff] }
  0x3a   :  { %1066 = vmatpush.bf16.msrb.mxu0 %v1808_v16  ;;  %v1277_v16 = vld [vmem:[%s2386_s0 + $0x20] sm:$0xf] }
  0x3b   :  { %1085 = vmatpush.bf16.msrb.mxu1 %v1816_v17  ;;  %v1759_v17 = vld [vmem:[%s2386_s0 + $0x50] sm:$0xf0] }
  0x3c   :  { %1104 = vmatpush.bf16.msrb.mxu2 %v1824_v18  ;;  %v1874_v18 = vld [vmem:[%s2385_s1 + $0x318] sm:$0xff]  ;;  %v1278_v25 = vor.u32 %v1759_v17, %v1277_v16 }
  0x3d   :  { %1123 = vmatpush.bf16.msrb.mxu3 %v1832_v19  ;;  %v1753_v19 = vld [vmem:[%s2386_s0 + $0x24] sm:$0xf] }
  0x3e   :  { %1067 = vmatpush.bf16.msrb.mxu0 %v1807_v20  ;;  %v1279_v20 = vld [vmem:[%s2386_s0 + $0x54] sm:$0xf0] }
  0x3f   :  { %1086 = vmatpush.bf16.msrb.mxu1 %v1815_v21  ;;  %v1285_v21 = vld [vmem:[%s2386_s0 + $0x28] sm:$0xf] }
  0x40   :  { %1105 = vmatpush.bf16.msrb.mxu2 %v1823_v23  ;;  %v1754_v23 = vld [vmem:[%s2386_s0 + $0x2c] sm:$0xf] }
  0x41   :  { %1124 = vmatpush.bf16.msrb.mxu3 %v1831_v24  ;;  %1068 = vmatmul.bf16.vlgmr.msrb.gmra.mxu0 %v1262_v36  ;;  %v1287_v24 = vld [vmem:[%s2386_s0 + $0x5c] sm:$0xf0]  ;;  %v1337_v36 = vld [vmem:[%s2386_s0 + $0x90] sm:$0xf] }
  0x42   :  { %1136 = vmatpush.bf16.msra.mxu0 %v1846_v26  ;;  %1087 = vmatmul.bf16.vlgmr.msrb.gmra.mxu1 %v1266_v37  ;;  %v1282_v26 = vor.u32 %v1753_v19, %v1279_v20  ;;  %v1290_v28 = vor.u32 %v1754_v23, %v1287_v24  ;;  %v1773_v37 = vld [vmem:[%s2386_s0 + $0xc0] sm:$0xf0] }
  0x43   :  { %1155 = vmatpush.bf16.msra.mxu1 %v1854_v27  ;;  %1106 = vmatmul.bf16.vlgmr.msrb.gmra.mxu2 %v1270_v38  ;;  %v1286_v27 = vor.u32 %v1760_v22, %v1285_v21  ;;  %v1767_v38 = vld [vmem:[%s2386_s0 + $0x94] sm:$0xf] }
  0x44   :  { %1174 = vmatpush.bf16.msra.mxu2 %v1862_v34  ;;  %1125 = vmatmul.bf16.vlgmr.msrb.gmra.mxu3 %v1274_v39  ;;  %v1766_v34 = vld [vmem:[%s2386_s0 + $0x8c] sm:$0xf]  ;;  %v1339_v39 = vld [vmem:[%s2386_s0 + $0xc4] sm:$0xf0] }
  0x45   :  { %1193 = vmatpush.bf16.msra.mxu3 %v1870_v35  ;;  %v1331_v35 = vld [vmem:[%s2386_s0 + $0xbc] sm:$0xf0] }
  0x46   :  { %1137 = vmatpush.bf16.msra.mxu0 %v1845_v40  ;;  %v1330_v40 = vor.u32 %v1772_v33, %v1329_v32 }
  0x47   :  { %1156 = vmatpush.bf16.msra.mxu1 %v1853_v41  ;;  %v1334_v41 = vor.u32 %v1766_v34, %v1331_v35 }
  0x48   :  { %1175 = vmatpush.bf16.msra.mxu2 %v1861_v42  ;;  %v1338_v42 = vor.u32 %v1773_v37, %v1337_v36 }
  0x49   :  { %1194 = vmatpush.bf16.msra.mxu3 %v1869_v43  ;;  %v1342_v43 = vor.u32 %v1767_v38, %v1339_v39 }
  0x4a   :  { %1138 = vmatpush.bf16.msra.mxu0 %v1844_v44  ;;  %v1293_v44 = vld [vmem:[%s2386_s0 + $0x30] sm:$0xf] }
  0x4b   :  { %1157 = vmatpush.bf16.msra.mxu1 %v1852_v45  ;;  %v1761_v45 = vld [vmem:[%s2386_s0 + $0x60] sm:$0xf0] }
  0x4c   :  { %1176 = vmatpush.bf16.msra.mxu2 %v1860_v46  ;;  %v1345_v46 = vld [vmem:[%s2386_s0 + $0x98] sm:$0xf] }
  0x4d   :  { %1195 = vmatpush.bf16.msra.mxu3 %v1868_v47  ;;  %v1774_v47 = vld [vmem:[%s2386_s0 + $0xc8] sm:$0xf0] }
  0x4e   :  { %1139 = vmatpush.bf16.msra.mxu0 %v1843_v48  ;;  %v1294_v48 = vor.u32 %v1761_v45, %v1293_v44 }
  0x4f   :  { %1158 = vmatpush.bf16.msra.mxu1 %v1851_v49  ;;  %v1346_v49 = vor.u32 %v1774_v47, %v1345_v46 }
  0x50   :  { %1177 = vmatpush.bf16.msra.mxu2 %v1859_v50  ;;  %v1879_v50 = vld [vmem:[%s2387_s2] ss:$0 sm:$0xff] }
  0x51   :  { %1196 = vmatpush.bf16.msra.mxu3 %v1867_v51  ;;  %1073 = vmatmul.bf16.gmra.mxu0 %v1314_v0 }
  0x52   :  { %1140 = vmatpush.bf16.msra.mxu0 %v1842_v60  ;;  %1092 = vmatmul.bf16.gmra.mxu1 %v1318_v1 }
  0x53   :  { %1159 = vmatpush.bf16.msra.mxu1 %v1850_v61  ;;  %1111 = vmatmul.bf16.gmra.mxu2 %v1322_v2 }
  0x54   :  { %1178 = vmatpush.bf16.msra.mxu2 %v1858_v62  ;;  %1130 = vmatmul.bf16.gmra.mxu3 %v1326_v3 }
  0x55   :  { %1197 = vmatpush.bf16.msra.mxu3 %v1866_v63 }
  0x56   :  { %1141 = vmatpush.bf16.msra.mxu0 %v1841_v4 }
  0x57   :  { %1160 = vmatpush.bf16.msra.mxu1 %v1849_v5 }
  0x58   :  { %1179 = vmatpush.bf16.msra.mxu2 %v1857_v6 }
  0x59   :  { %1198 = vmatpush.bf16.msra.mxu3 %v1865_v7 }
  0x5a   :  { %1142 = vmatpush.bf16.msra.mxu0 %v1840_v8 }
  0x5b   :  { %1161 = vmatpush.bf16.msra.mxu1 %v1848_v9 }
  0x5c   :  { %1180 = vmatpush.bf16.msra.mxu2 %v1856_v10 }
  0x5d   :  { %1199 = vmatpush.bf16.msra.mxu3 %v1864_v11 }
  0x5e   :  { %1143 = vmatpush.bf16.msra.mxu0 %v1839_v12 }
  0x5f   :  { %1162 = vmatpush.bf16.msra.mxu1 %v1847_v13 }
  0x60   :  { %1181 = vmatpush.bf16.msra.mxu2 %v1855_v14 }
  0x61   :  { %1200 = vmatpush.bf16.msra.mxu3 %v1863_v15  ;;  %1144 = vmatmul.bf16.vlgmr.msra.gmra.mxu0 %v1278_v25 }
  0x62   :  { %1216 = vmatpush.bf16.msrb.mxu0 %v1874_v18  ;;  %1163 = vmatmul.bf16.vlgmr.msra.gmra.mxu1 %v1282_v26 }
  0x63   :  { %1875 = vmatpush.bf16.msrb.mxu1 %v1874_v18  ;;  %1182 = vmatmul.bf16.vlgmr.msra.gmra.mxu2 %v1286_v27 }
  0x64   :  { %1201 = vmatmul.bf16.vlgmr.msra.gmra.mxu3 %v1290_v28 }
  0x66   :  { %1217 = vmatpush.bf16.msrb.mxu0 %v1873_v29 }
  0x67   :  { %1876 = vmatpush.bf16.msrb.mxu1 %v1873_v29 }
  0x6a   :  { %1218 = vmatpush.bf16.msrb.mxu0 %v1872_v30 }
  0x6b   :  { %1877 = vmatpush.bf16.msrb.mxu1 %v1872_v30 }
  0x6e   :  { %1219 = vmatpush.bf16.msrb.mxu0 %v1871_v31 }
  0x6f   :  { %1878 = vmatpush.bf16.msrb.mxu1 %v1871_v31 }
  0x71   :  { %1149 = vmatmul.bf16.gmra.mxu0 %v1330_v40 }
  0x72   :  { %1168 = vmatmul.bf16.gmra.mxu1 %v1334_v41 }
  0x73   :  { %1187 = vmatmul.bf16.gmra.mxu2 %v1338_v42 }
  0x74   :  { %1206 = vmatmul.bf16.gmra.mxu3 %v1342_v43 }
  0x81   :  { %1747 = vmatmul.msk.bf16.vlgmr.msrb.gmra.mxu0 %vm977_vm0, %v1294_v48 }
  0x82   :  { %1748 = vmatmul.msk.bf16.vlgmr.msrb.gmra.mxu1 %vm977_vm0, %v1346_v49 }
  0x9e   :  { %v993_v51 = vpop.f32.mrf.mxu0 }
  0x9f   :  { %v1012_v52 = vpop.f32.mrf.mxu1  ;;  %v994_v53 = vadd.f32 %v1879_v50, %v993_v51 }
  0xa1   :  { %v1013_v54 = vadd.f32 %v1012_v52, %v994_v53 }
  0xa6   :  { %v1031_v55 = vpop.f32.mrf.mxu2  ;;  %v995_v57 = vpop.f32.mrf.mxu0 }
  0xa7   :  { %v1050_v56 = vpop.f32.mrf.mxu3  ;;  %v1014_v58 = vpop.f32.mrf.mxu1  ;;  %v996_v59 = vadd.f32 %v1879_v50, %v995_v57  ;;  %v1032_v27 = vadd.f32 %v1031_v55, %v1013_v54 }
  0xa9   :  { %v1015_v60 = vadd.f32 %v1014_v58, %v996_v59  ;;  %v1051_v30 = vadd.f32 %v1050_v56, %v1032_v27 }
  0xae   :  { %v1033_v61 = vpop.f32.mrf.mxu2  ;;  %v998_v63 = vpop.f32.mrf.mxu0 }
  0xaf   :  { %v1052_v62 = vpop.f32.mrf.mxu3  ;;  %v1017_v0 = vpop.f32.mrf.mxu1  ;;  %v999_v21 = vadd.f32 %v1879_v50, %v998_v63  ;;  %v1034_v39 = vadd.f32 %v1033_v61, %v1015_v60 }
  0xb1   :  { %v1018_v26 = vadd.f32 %v1017_v0, %v999_v21  ;;  %v1053_v43 = vadd.f32 %v1052_v62, %v1034_v39 }
  0xb6   :  { %v1036_v1 = vpop.f32.mrf.mxu2  ;;  %v1000_v3 = vpop.f32.mrf.mxu0 }
  0xb7   :  { %v1055_v2 = vpop.f32.mrf.mxu3  ;;  %v1019_v4 = vpop.f32.mrf.mxu1  ;;  %v1037_v28 = vadd.f32 %v1036_v1, %v1018_v26  ;;  %v1001_v29 = vadd.f32 %v1879_v50, %v1000_v3 }
  0xb9   :  { %v1056_v31 = vadd.f32 %v1055_v2, %v1037_v28  ;;  %v1020_v36 = vadd.f32 %v1019_v4, %v1001_v29 }
  0xbe   :  { %v1038_v5 = vpop.f32.mrf.mxu2  ;;  %v1069_v7 = vpop.f32.mrf.mxu0 }
  0xbf   :  { %v1057_v6 = vpop.f32.mrf.mxu3  ;;  %v1088_v8 = vpop.f32.mrf.mxu1  ;;  %v1070_v37 = vadd.f32 %v1069_v7, %v1051_v30  ;;  %v1039_v40 = vadd.f32 %v1038_v5, %v1020_v36 }
  0xc1   :  { %v1089_v41 = vadd.f32 %v1088_v8, %v1070_v37  ;;  %v1058_v44 = vadd.f32 %v1057_v6, %v1039_v40 }
  0xc6   :  { %v1107_v9 = vpop.f32.mrf.mxu2  ;;  %v1071_v11 = vpop.f32.mrf.mxu0 }
  0xc7   :  { %v1126_v10 = vpop.f32.mrf.mxu3  ;;  %v1090_v12 = vpop.f32.mrf.mxu1  ;;  %v1108_v45 = vadd.f32 %v1107_v9, %v1089_v41  ;;  %v1072_v50 = vadd.f32 %v1071_v11, %v1053_v43 }
  0xc9   :  { %v1127_v53 = vadd.f32 %v1126_v10, %v1108_v45  ;;  %v1091_v55 = vadd.f32 %v1090_v12, %v1072_v50 }
  0xce   :  { %v1109_v13 = vpop.f32.mrf.mxu2  ;;  %v1074_v15 = vpop.f32.mrf.mxu0 }
  0xcf   :  { %v1128_v14 = vpop.f32.mrf.mxu3  ;;  %v1093_v16 = vpop.f32.mrf.mxu1  ;;  %v1075_v38 = vadd.f32 %v1074_v15, %v1056_v31  ;;  %v1110_v59 = vadd.f32 %v1109_v13, %v1091_v55 }
  0xd1   :  { %v1094_v42 = vadd.f32 %v1093_v16, %v1075_v38  ;;  %v1129_v2 = vadd.f32 %v1128_v14, %v1110_v59 }
  0xd6   :  { %v1112_v17 = vpop.f32.mrf.mxu2  ;;  %v1076_v19 = vpop.f32.mrf.mxu0 }
  0xd7   :  { %v1131_v18 = vpop.f32.mrf.mxu3  ;;  %v1095_v20 = vpop.f32.mrf.mxu1  ;;  %v1113_v46 = vadd.f32 %v1112_v17, %v1094_v42  ;;  %v1077_v51 = vadd.f32 %v1076_v19, %v1058_v44 }
  0xd9   :  { %v1132_v54 = vadd.f32 %v1131_v18, %v1113_v46  ;;  %v1096_v56 = vadd.f32 %v1095_v20, %v1077_v51 }
  0xde   :  { %v1114_v22 = vpop.f32.mrf.mxu2  ;;  %v1145_v24 = vpop.f32.mrf.mxu0 }
  0xdf   :  { %v1133_v23 = vpop.f32.mrf.mxu3  ;;  %v1164_v25 = vpop.f32.mrf.mxu1  ;;  %v1146_v57 = vadd.f32 %v1145_v24, %v1127_v53  ;;  %v1115_v60 = vadd.f32 %v1114_v22, %v1096_v56 }
  0xe1   :  { %v1165_v0 = vadd.f32 %v1164_v25, %v1146_v57  ;;  %v1134_v3 = vadd.f32 %v1133_v23, %v1115_v60 }
  0xe6   :  { %v1183_v32 = vpop.f32.mrf.mxu2  ;;  %v1147_v34 = vpop.f32.mrf.mxu0 }
  0xe7   :  { %v1202_v33 = vpop.f32.mrf.mxu3  ;;  %v1166_v35 = vpop.f32.mrf.mxu1  ;;  %v1184_v4 = vadd.f32 %v1183_v32, %v1165_v0  ;;  %v1148_v7 = vadd.f32 %v1147_v34, %v1129_v2 }
  0xe9   :  { %v1203_v9 = vadd.f32 %v1202_v33, %v1184_v4  ;;  %v1167_v16 = vadd.f32 %v1166_v35, %v1148_v7 }
  0xee   :  { %v1185_v47 = vpop.f32.mrf.mxu2  ;;  %v1150_v48 = vpop.f32.mrf.mxu0 }
  0xef   :  { %v1169_v49 = vpop.f32.mrf.mxu1  ;;  %v1204_v52 = vpop.f32.mrf.mxu3  ;;  %v1151_v58 = vadd.f32 %v1150_v48, %v1132_v54  ;;  %v1186_v19 = vadd.f32 %v1185_v47, %v1167_v16 }
  0xf1   :  { %v1170_v1 = vadd.f32 %v1169_v49, %v1151_v58  ;;  %v1205_v21 = vadd.f32 %v1204_v52, %v1186_v19 }
  0xf6   :  { %v1188_v61 = vpop.f32.mrf.mxu2  ;;  %v1152_v63 = vpop.f32.mrf.mxu0 }
  0xf7   :  { %v1171_v62 = vpop.f32.mrf.mxu1  ;;  %v1189_v5 = vadd.f32 %v1188_v61, %v1170_v1  ;;  %v1207_v6 = vpop.f32.mrf.mxu3  ;;  %v1153_v8 = vadd.f32 %v1152_v63, %v1134_v3 }
  0xf9   :  { %v1208_v10 = vadd.f32 %v1207_v6, %v1189_v5  ;;  %v1172_v13 = vadd.f32 %v1171_v62, %v1153_v8 }
  0xfe   :  { %v1190_v11 = vpop.f32.mrf.mxu2  ;;  %v1221_v12 = vpop.f32.mrf.mxu0 }
  0xff   :  { %v1226_v15 = vpop.f32.mrf.mxu1  ;;  %v1222_v17 = vadd.f32 %v1221_v12, %v1203_v9  ;;  %v1191_v20 = vadd.f32 %v1190_v11, %v1172_v13  ;;  %v1209_v14 = vpop.f32.mrf.mxu3 }
 0x100   :  { %v1227_v18 = vadd.f32 %v1226_v15, %v1208_v10 }
 0x101   :  { %1880 = vtanh.f32 %v1222_v17  ;;  %v1210_v22 = vadd.f32 %v1209_v14, %v1191_v20 }
 0x102   :  { %1882 = vtanh.f32 %v1227_v18 }
 0x106   :  { %v1223_v23 = vpop.f32.mrf.mxu0 }
 0x107   :  { %v1228_v24 = vpop.f32.mrf.mxu1  ;;  %v1881_v25 = vpop.eup %1880  ;;  %v1224_v26 = vadd.f32 %v1223_v23, %v1205_v21 }
 0x108   :  { %v1229_v27 = vadd.f32 %v1228_v24, %v1210_v22  ;;  %v1883_v28 = vpop.eup %1882  ;;  %1235 = vst.msk [vmem:[%s2388_s3] sm:$0xff] %vm977_vm0, %v1881_v25 }
 0x109   :  { %1237 = vst.msk [vmem:[%s2388_s3 + $0x10] sm:$0xff] %vm977_vm0, %v1883_v28  ;;  %1884 = vtanh.f32 %v1224_v26 }
 0x10a   :  { %1886 = vtanh.f32 %v1229_v27 }
 0x10f   :  { %v1885_v29 = vpop.eup %1884 }
 0x110   :  { %v1887_v30 = vpop.eup %1886  ;;  %1236 = vst.msk [vmem:[%s2388_s3 + $0x8] sm:$0xff] %vm977_vm0, %v1885_v29 }
 0x111   :  { %1238 = vst.msk [vmem:[%s2388_s3 + $0x18] sm:$0xff] %vm977_vm0, %v1887_v30 }

// kernel: my_model_forward.10
= control target key start
LH: loop header
LB: loop body
LE: loop exit
PB: predicated region body
PF: predicated region fallthrough
CT: control target
= control target key end

     0   :  { %vm977_vm0 = vcmask 523264   ;;  %s2373_s1 = inlined_call_operand.vmem [shape: bf16[1600,64], index: 1, kind: input, shape index: {}]   ;;  %s2374_s0 = inlined_call_operand.vmem [shape: bf16[32,1600], index: 0, kind: input, shape index: {}]   ;;  %s2375_s2 = inlined_call_operand.vmem [shape: f32[1,64], index: 2, kind: input, shape index: {}]   ;;  %s2376_s3 = inlined_call_operand.vmem [shape: f32[32,64], index: 3, kind: output, shape index: {}]  }
   0x1   :  { %v1778_v0 = vld [vmem:[%s2373_s1 + $0x38] sm:$0xff]  ;;  %v1777_v4 = vld [vmem:[%s2373_s1 + $0x30] sm:$0xff]  ;;  %v1776_v8 = vld [vmem:[%s2373_s1 + $0x28] sm:$0xff] }
   0x2   :  { %v1786_v1 = vld [vmem:[%s2373_s1 + $0x78] sm:$0xff]  ;;  %984 = vmatpush.bf16.msra.mxu0 %v1778_v0  ;;  %v1785_v5 = vld [vmem:[%s2373_s1 + $0x70] sm:$0xff]  ;;  %v1784_v9 = vld [vmem:[%s2373_s1 + $0x68] sm:$0xff] }
   0x3   :  { %v1794_v2 = vld [vmem:[%s2373_s1 + $0xb8] sm:$0xff]  ;;  %1003 = vmatpush.bf16.msra.mxu1 %v1786_v1  ;;  %v1793_v6 = vld [vmem:[%s2373_s1 + $0xb0] sm:$0xff]  ;;  %v1792_v10 = vld [vmem:[%s2373_s1 + $0xa8] sm:$0xff] }
   0x4   :  { %v1802_v3 = vld [vmem:[%s2373_s1 + $0xf8] sm:$0xff]  ;;  %1022 = vmatpush.bf16.msra.mxu2 %v1794_v2  ;;  %v1801_v7 = vld [vmem:[%s2373_s1 + $0xf0] sm:$0xff]  ;;  %v1800_v11 = vld [vmem:[%s2373_s1 + $0xe8] sm:$0xff] }
   0x5   :  { %1041 = vmatpush.bf16.msra.mxu3 %v1802_v3  ;;  %v1775_v12 = vld [vmem:[%s2373_s1 + $0x20] sm:$0xff]  ;;  %v1774_v16 = vld [vmem:[%s2373_s1 + $0x18] sm:$0xff]  ;;  %v1773_v20 = vld [vmem:[%s2373_s1 + $0x10] sm:$0xff] }
   0x6   :  { %985 = vmatpush.bf16.msra.mxu0 %v1777_v4  ;;  %v1783_v13 = vld [vmem:[%s2373_s1 + $0x60] sm:$0xff]  ;;  %v1782_v17 = vld [vmem:[%s2373_s1 + $0x58] sm:$0xff]  ;;  %v1781_v21 = vld [vmem:[%s2373_s1 + $0x50] sm:$0xff] }
   0x7   :  { %1004 = vmatpush.bf16.msra.mxu1 %v1785_v5  ;;  %v1791_v14 = vld [vmem:[%s2373_s1 + $0xa0] sm:$0xff]  ;;  %v1790_v18 = vld [vmem:[%s2373_s1 + $0x98] sm:$0xff]  ;;  %v1789_v22 = vld [vmem:[%s2373_s1 + $0x90] sm:$0xff] }
   0x8   :  { %1023 = vmatpush.bf16.msra.mxu2 %v1793_v6  ;;  %v1799_v15 = vld [vmem:[%s2373_s1 + $0xe0] sm:$0xff]  ;;  %v1798_v19 = vld [vmem:[%s2373_s1 + $0xd8] sm:$0xff]  ;;  %v1797_v23 = vld [vmem:[%s2373_s1 + $0xd0] sm:$0xff] }
   0x9   :  { %1042 = vmatpush.bf16.msra.mxu3 %v1801_v7  ;;  %v1772_v24 = vld [vmem:[%s2373_s1 + $0x8] sm:$0xff]  ;;  %v1771_v28 = vld [vmem:[%s2373_s1] sm:$0xff]  ;;  %v1751_v33 = vld [vmem:[%s2374_s0 + $0x30] sm:$0xf0] }
   0xa   :  { %986 = vmatpush.bf16.msra.mxu0 %v1776_v8  ;;  %v1780_v25 = vld [vmem:[%s2373_s1 + $0x48] sm:$0xff]  ;;  %v1779_v29 = vld [vmem:[%s2373_s1 + $0x40] sm:$0xff]  ;;  %v1243_v35 = vld [vmem:[%s2374_s0 + $0x34] sm:$0xf0] }
   0xb   :  { %1005 = vmatpush.bf16.msra.mxu1 %v1784_v9  ;;  %v1788_v26 = vld [vmem:[%s2373_s1 + $0x88] sm:$0xff]  ;;  %v1787_v30 = vld [vmem:[%s2373_s1 + $0x80] sm:$0xff]  ;;  %v1752_v37 = vld [vmem:[%s2374_s0 + $0x38] sm:$0xf0] }
   0xc   :  { %1024 = vmatpush.bf16.msra.mxu2 %v1792_v10  ;;  %v1796_v27 = vld [vmem:[%s2373_s1 + $0xc8] sm:$0xff]  ;;  %v1795_v31 = vld [vmem:[%s2373_s1 + $0xc0] sm:$0xff]  ;;  %v1810_v40 = vld [vmem:[%s2373_s1 + $0x138] sm:$0xff] }
   0xd   :  { %1043 = vmatpush.bf16.msra.mxu3 %v1800_v11  ;;  %v1241_v32 = vld [vmem:[%s2374_s0] sm:$0xf]  ;;  %v1745_v34 = vld [vmem:[%s2374_s0 + $0x4] sm:$0xf]  ;;  %v1249_v36 = vld [vmem:[%s2374_s0 + $0x8] sm:$0xf] }
   0xe   :  { %987 = vmatpush.bf16.msra.mxu0 %v1775_v12  ;;  %v1746_v38 = vld [vmem:[%s2374_s0 + $0xc] sm:$0xf]  ;;  %v1251_v39 = vld [vmem:[%s2374_s0 + $0x3c] sm:$0xf0]  ;;  %v1818_v41 = vld [vmem:[%s2373_s1 + $0x178] sm:$0xff]  ;;  %v1242_v42 = vor.u32 %v1751_v33, %v1241_v32  ;;  %v1246_v43 = vor.u32 %v1745_v34, %v1243_v35  ;;  %v1250_v44 = vor.u32 %v1752_v37, %v1249_v36 }
   0xf   :  { %1006 = vmatpush.bf16.msra.mxu1 %v1783_v13  ;;  %v1254_v45 = vor.u32 %v1746_v38, %v1251_v39  ;;  %v1826_v46 = vld [vmem:[%s2373_s1 + $0x1b8] sm:$0xff]  ;;  %v1809_v48 = vld [vmem:[%s2373_s1 + $0x130] sm:$0xff]  ;;  %v1808_v52 = vld [vmem:[%s2373_s1 + $0x128] sm:$0xff] }
  0x10   :  { %1025 = vmatpush.bf16.msra.mxu2 %v1791_v14  ;;  %v1834_v47 = vld [vmem:[%s2373_s1 + $0x1f8] sm:$0xff]  ;;  %v1817_v49 = vld [vmem:[%s2373_s1 + $0x170] sm:$0xff]  ;;  %v1816_v53 = vld [vmem:[%s2373_s1 + $0x168] sm:$0xff] }
  0x11   :  { %1044 = vmatpush.bf16.msra.mxu3 %v1799_v15  ;;  %v1825_v50 = vld [vmem:[%s2373_s1 + $0x1b0] sm:$0xff]  ;;  %v1824_v54 = vld [vmem:[%s2373_s1 + $0x1a8] sm:$0xff]  ;;  %v1807_v56 = vld [vmem:[%s2373_s1 + $0x120] sm:$0xff] }
  0x12   :  { %988 = vmatpush.bf16.msra.mxu0 %v1774_v16  ;;  %v1833_v51 = vld [vmem:[%s2373_s1 + $0x1f0] sm:$0xff]  ;;  %v1832_v55 = vld [vmem:[%s2373_s1 + $0x1e8] sm:$0xff]  ;;  %v1815_v57 = vld [vmem:[%s2373_s1 + $0x160] sm:$0xff] }
  0x13   :  { %1007 = vmatpush.bf16.msra.mxu1 %v1782_v17  ;;  %v1823_v58 = vld [vmem:[%s2373_s1 + $0x1a0] sm:$0xff]  ;;  %v1293_v60 = vld [vmem:[%s2374_s0 + $0x68] sm:$0xf]  ;;  %v1764_v61 = vld [vmem:[%s2374_s0 + $0x98] sm:$0xf0] }
  0x14   :  { %1026 = vmatpush.bf16.msra.mxu2 %v1790_v18  ;;  %v1831_v59 = vld [vmem:[%s2373_s1 + $0x1e0] sm:$0xff]  ;;  %v1758_v62 = vld [vmem:[%s2374_s0 + $0x6c] sm:$0xf]  ;;  %v1301_v0 = vld [vmem:[%s2374_s0 + $0x70] sm:$0xf]  ;;  %v1294_v6 = vor.u32 %v1764_v61, %v1293_v60 }
  0x15   :  { %1045 = vmatpush.bf16.msra.mxu3 %v1798_v19  ;;  %v1295_v63 = vld [vmem:[%s2374_s0 + $0x9c] sm:$0xf0]  ;;  %v1765_v1 = vld [vmem:[%s2374_s0 + $0xa0] sm:$0xf0]  ;;  %v1759_v2 = vld [vmem:[%s2374_s0 + $0x74] sm:$0xf] }
  0x16   :  { %989 = vmatpush.bf16.msra.mxu0 %v1773_v20  ;;  %v1303_v3 = vld [vmem:[%s2374_s0 + $0xa4] sm:$0xf0]  ;;  %v1806_v4 = vld [vmem:[%s2373_s1 + $0x118] sm:$0xff]  ;;  %v1298_v7 = vor.u32 %v1758_v62, %v1295_v63  ;;  %v1302_v8 = vor.u32 %v1765_v1, %v1301_v0  ;;  %v1805_v12 = vld [vmem:[%s2373_s1 + $0x110] sm:$0xff] }
  0x17   :  { %1008 = vmatpush.bf16.msra.mxu1 %v1781_v21  ;;  %v1814_v5 = vld [vmem:[%s2373_s1 + $0x158] sm:$0xff]  ;;  %v1306_v9 = vor.u32 %v1759_v2, %v1303_v3  ;;  %v1813_v13 = vld [vmem:[%s2373_s1 + $0x150] sm:$0xff]  ;;  %v1804_v16 = vld [vmem:[%s2373_s1 + $0x108] sm:$0xff] }
  0x18   :  { %1027 = vmatpush.bf16.msra.mxu2 %v1789_v22  ;;  %v1822_v10 = vld [vmem:[%s2373_s1 + $0x198] sm:$0xff]  ;;  %v1821_v14 = vld [vmem:[%s2373_s1 + $0x190] sm:$0xff]  ;;  %v1812_v17 = vld [vmem:[%s2373_s1 + $0x148] sm:$0xff] }
  0x19   :  { %1046 = vmatpush.bf16.msra.mxu3 %v1797_v23  ;;  %v1830_v11 = vld [vmem:[%s2373_s1 + $0x1d8] sm:$0xff]  ;;  %v1829_v15 = vld [vmem:[%s2373_s1 + $0x1d0] sm:$0xff]  ;;  %v1820_v18 = vld [vmem:[%s2373_s1 + $0x188] sm:$0xff] }
  0x1a   :  { %990 = vmatpush.bf16.msra.mxu0 %v1772_v24  ;;  %v1828_v19 = vld [vmem:[%s2373_s1 + $0x1c8] sm:$0xff]  ;;  %v1803_v20 = vld [vmem:[%s2373_s1 + $0x100] sm:$0xff]  ;;  %v1257_v22 = vld [vmem:[%s2374_s0 + $0x10] sm:$0xf] }
  0x1b   :  { %1009 = vmatpush.bf16.msra.mxu1 %v1780_v25  ;;  %v1811_v21 = vld [vmem:[%s2373_s1 + $0x140] sm:$0xff]  ;;  %v1748_v32 = vld [vmem:[%s2374_s0 + $0x1c] sm:$0xf]  ;;  %v1267_v33 = vld [vmem:[%s2374_s0 + $0x4c] sm:$0xf0] }
  0x1c   :  { %1028 = vmatpush.bf16.msra.mxu2 %v1788_v26  ;;  %v1819_v23 = vld [vmem:[%s2373_s1 + $0x180] sm:$0xff]  ;;  %v1842_v26 = vld [vmem:[%s2373_s1 + $0x238] sm:$0xff]  ;;  %v1270_v39 = vor.u32 %v1748_v32, %v1267_v33  ;;  %v1325_v32 = vld [vmem:[%s2374_s0 + $0x88] sm:$0xf] }
  0x1d   :  { %1047 = vmatpush.bf16.msra.mxu3 %v1796_v27  ;;  %v1827_v24 = vld [vmem:[%s2373_s1 + $0x1c0] sm:$0xff]  ;;  %v1850_v27 = vld [vmem:[%s2373_s1 + $0x278] sm:$0xff] }
  0x1e   :  { %991 = vmatpush.bf16.msra.mxu0 %v1771_v28  ;;  %v1753_v25 = vld [vmem:[%s2374_s0 + $0x40] sm:$0xf0]  ;;  %v1747_v28 = vld [vmem:[%s2374_s0 + $0x14] sm:$0xf]  ;;  %v1858_v34 = vld [vmem:[%s2373_s1 + $0x2b8] sm:$0xff] }
  0x1f   :  { %1010 = vmatpush.bf16.msra.mxu1 %v1779_v29  ;;  %v1259_v29 = vld [vmem:[%s2374_s0 + $0x44] sm:$0xf0]  ;;  %v1866_v35 = vld [vmem:[%s2373_s1 + $0x2f8] sm:$0xff]  ;;  %v1258_v36 = vor.u32 %v1753_v25, %v1257_v22 }
  0x20   :  { %1029 = vmatpush.bf16.msra.mxu2 %v1787_v30  ;;  %v1265_v30 = vld [vmem:[%s2374_s0 + $0x18] sm:$0xf]  ;;  %v1262_v37 = vor.u32 %v1747_v28, %v1259_v29  ;;  %v1756_v22 = vld [vmem:[%s2374_s0 + $0x58] sm:$0xf0]  ;;  %v1869_v29 = vld [vmem:[%s2373_s1 + $0x310] sm:$0xff] }
  0x21   :  { %1048 = vmatpush.bf16.msra.mxu3 %v1795_v31  ;;  %992 = vmatmul.bf16.vlgmr.msra.gmra.mxu0 %v1242_v42  ;;  %v1754_v31 = vld [vmem:[%s2374_s0 + $0x48] sm:$0xf0]  ;;  %v1857_v42 = vld [vmem:[%s2373_s1 + $0x2b0] sm:$0xff]  ;;  %v1838_v60 = vld [vmem:[%s2373_s1 + $0x218] sm:$0xff] }
  0x22   :  { %1060 = vmatpush.bf16.msrb.mxu0 %v1810_v40  ;;  %1011 = vmatmul.bf16.vlgmr.msra.gmra.mxu1 %v1246_v43  ;;  %v1266_v38 = vor.u32 %v1754_v31, %v1265_v30  ;;  %v1841_v40 = vld [vmem:[%s2373_s1 + $0x230] sm:$0xff]  ;;  %v1846_v61 = vld [vmem:[%s2373_s1 + $0x258] sm:$0xff]  ;;  %v1868_v30 = vld [vmem:[%s2373_s1 + $0x308] sm:$0xff] }
  0x23   :  { %1079 = vmatpush.bf16.msrb.mxu1 %v1818_v41  ;;  %1030 = vmatmul.bf16.vlgmr.msra.gmra.mxu2 %v1250_v44  ;;  %v1849_v41 = vld [vmem:[%s2373_s1 + $0x270] sm:$0xff]  ;;  %v1840_v44 = vld [vmem:[%s2373_s1 + $0x228] sm:$0xff]  ;;  %v1854_v62 = vld [vmem:[%s2373_s1 + $0x298] sm:$0xff] }
  0x24   :  { %1049 = vmatmul.bf16.vlgmr.msra.gmra.mxu3 %v1254_v45  ;;  %1098 = vmatpush.bf16.msrb.mxu2 %v1826_v46  ;;  %v1865_v43 = vld [vmem:[%s2373_s1 + $0x2f0] sm:$0xff]  ;;  %v1848_v45 = vld [vmem:[%s2373_s1 + $0x268] sm:$0xff]  ;;  %v1862_v63 = vld [vmem:[%s2373_s1 + $0x2d8] sm:$0xff] }
  0x25   :  { %1117 = vmatpush.bf16.msrb.mxu3 %v1834_v47  ;;  %v1856_v46 = vld [vmem:[%s2373_s1 + $0x2a8] sm:$0xff]  ;;  %v1867_v31 = vld [vmem:[%s2373_s1 + $0x300] sm:$0xff]  ;;  %v1768_v33 = vld [vmem:[%s2374_s0 + $0xb8] sm:$0xf0] }
  0x26   :  { %1061 = vmatpush.bf16.msrb.mxu0 %v1809_v48  ;;  %v1864_v47 = vld [vmem:[%s2373_s1 + $0x2e8] sm:$0xff]  ;;  %v1839_v48 = vld [vmem:[%s2373_s1 + $0x220] sm:$0xff] }
  0x27   :  { %1080 = vmatpush.bf16.msrb.mxu1 %v1817_v49  ;;  %v1847_v49 = vld [vmem:[%s2373_s1 + $0x260] sm:$0xff] }
  0x28   :  { %1099 = vmatpush.bf16.msrb.mxu2 %v1825_v50  ;;  %v1855_v50 = vld [vmem:[%s2373_s1 + $0x2a0] sm:$0xff] }
  0x29   :  { %1118 = vmatpush.bf16.msrb.mxu3 %v1833_v51  ;;  %v1863_v51 = vld [vmem:[%s2373_s1 + $0x2e0] sm:$0xff] }
  0x2a   :  { %1062 = vmatpush.bf16.msrb.mxu0 %v1808_v52  ;;  %v1309_v52 = vld [vmem:[%s2374_s0 + $0x78] sm:$0xf] }
  0x2b   :  { %1081 = vmatpush.bf16.msrb.mxu1 %v1816_v53  ;;  %v1766_v53 = vld [vmem:[%s2374_s0 + $0xa8] sm:$0xf0] }
  0x2c   :  { %1100 = vmatpush.bf16.msrb.mxu2 %v1824_v54  ;;  %v1760_v54 = vld [vmem:[%s2374_s0 + $0x7c] sm:$0xf]  ;;  %v1310_v0 = vor.u32 %v1766_v53, %v1309_v52 }
  0x2d   :  { %1119 = vmatpush.bf16.msrb.mxu3 %v1832_v55  ;;  %v1311_v55 = vld [vmem:[%s2374_s0 + $0xac] sm:$0xf0] }
  0x2e   :  { %1063 = vmatpush.bf16.msrb.mxu0 %v1807_v56  ;;  %v1317_v56 = vld [vmem:[%s2374_s0 + $0x80] sm:$0xf]  ;;  %v1314_v1 = vor.u32 %v1760_v54, %v1311_v55 }
  0x2f   :  { %1082 = vmatpush.bf16.msrb.mxu1 %v1815_v57  ;;  %v1767_v57 = vld [vmem:[%s2374_s0 + $0xb0] sm:$0xf0] }
  0x30   :  { %1101 = vmatpush.bf16.msrb.mxu2 %v1823_v58  ;;  %v1761_v58 = vld [vmem:[%s2374_s0 + $0x84] sm:$0xf]  ;;  %v1318_v2 = vor.u32 %v1767_v57, %v1317_v56 }
  0x31   :  { %1120 = vmatpush.bf16.msrb.mxu3 %v1831_v59  ;;  %997 = vmatmul.bf16.gmra.mxu0 %v1294_v6  ;;  %v1319_v59 = vld [vmem:[%s2374_s0 + $0xb4] sm:$0xf0]  ;;  %v1853_v6 = vld [vmem:[%s2373_s1 + $0x290] sm:$0xff] }
  0x32   :  { %1064 = vmatpush.bf16.msrb.mxu0 %v1806_v4  ;;  %1016 = vmatmul.bf16.gmra.mxu1 %v1298_v7  ;;  %v1322_v3 = vor.u32 %v1761_v58, %v1319_v59  ;;  %v1837_v4 = vld [vmem:[%s2373_s1 + $0x210] sm:$0xff] }
  0x33   :  { %1083 = vmatpush.bf16.msrb.mxu1 %v1814_v5  ;;  %1035 = vmatmul.bf16.gmra.mxu2 %v1302_v8  ;;  %v1845_v5 = vld [vmem:[%s2373_s1 + $0x250] sm:$0xff]  ;;  %v1836_v8 = vld [vmem:[%s2373_s1 + $0x208] sm:$0xff] }
  0x34   :  { %1054 = vmatmul.bf16.gmra.mxu3 %v1306_v9  ;;  %1102 = vmatpush.bf16.msrb.mxu2 %v1822_v10  ;;  %v1861_v7 = vld [vmem:[%s2373_s1 + $0x2d0] sm:$0xff]  ;;  %v1844_v9 = vld [vmem:[%s2373_s1 + $0x248] sm:$0xff] }
  0x35   :  { %1121 = vmatpush.bf16.msrb.mxu3 %v1830_v11  ;;  %v1852_v10 = vld [vmem:[%s2373_s1 + $0x288] sm:$0xff] }
  0x36   :  { %1065 = vmatpush.bf16.msrb.mxu0 %v1805_v12  ;;  %v1860_v11 = vld [vmem:[%s2373_s1 + $0x2c8] sm:$0xff]  ;;  %v1835_v12 = vld [vmem:[%s2373_s1 + $0x200] sm:$0xff] }
  0x37   :  { %1084 = vmatpush.bf16.msrb.mxu1 %v1813_v13  ;;  %v1843_v13 = vld [vmem:[%s2373_s1 + $0x240] sm:$0xff] }
  0x38   :  { %1103 = vmatpush.bf16.msrb.mxu2 %v1821_v14  ;;  %v1851_v14 = vld [vmem:[%s2373_s1 + $0x280] sm:$0xff] }
  0x39   :  { %1122 = vmatpush.bf16.msrb.mxu3 %v1829_v15  ;;  %v1859_v15 = vld [vmem:[%s2373_s1 + $0x2c0] sm:$0xff] }
  0x3a   :  { %1066 = vmatpush.bf16.msrb.mxu0 %v1804_v16  ;;  %v1273_v16 = vld [vmem:[%s2374_s0 + $0x20] sm:$0xf] }
  0x3b   :  { %1085 = vmatpush.bf16.msrb.mxu1 %v1812_v17  ;;  %v1755_v17 = vld [vmem:[%s2374_s0 + $0x50] sm:$0xf0] }
  0x3c   :  { %1104 = vmatpush.bf16.msrb.mxu2 %v1820_v18  ;;  %v1870_v18 = vld [vmem:[%s2373_s1 + $0x318] sm:$0xff]  ;;  %v1274_v25 = vor.u32 %v1755_v17, %v1273_v16 }
  0x3d   :  { %1123 = vmatpush.bf16.msrb.mxu3 %v1828_v19  ;;  %v1749_v19 = vld [vmem:[%s2374_s0 + $0x24] sm:$0xf] }
  0x3e   :  { %1067 = vmatpush.bf16.msrb.mxu0 %v1803_v20  ;;  %v1275_v20 = vld [vmem:[%s2374_s0 + $0x54] sm:$0xf0] }
  0x3f   :  { %1086 = vmatpush.bf16.msrb.mxu1 %v1811_v21  ;;  %v1281_v21 = vld [vmem:[%s2374_s0 + $0x28] sm:$0xf] }
  0x40   :  { %1105 = vmatpush.bf16.msrb.mxu2 %v1819_v23  ;;  %v1750_v23 = vld [vmem:[%s2374_s0 + $0x2c] sm:$0xf] }
  0x41   :  { %1124 = vmatpush.bf16.msrb.mxu3 %v1827_v24  ;;  %1068 = vmatmul.bf16.vlgmr.msrb.gmra.mxu0 %v1258_v36  ;;  %v1283_v24 = vld [vmem:[%s2374_s0 + $0x5c] sm:$0xf0]  ;;  %v1333_v36 = vld [vmem:[%s2374_s0 + $0x90] sm:$0xf] }
  0x42   :  { %1136 = vmatpush.bf16.msra.mxu0 %v1842_v26  ;;  %1087 = vmatmul.bf16.vlgmr.msrb.gmra.mxu1 %v1262_v37  ;;  %v1278_v26 = vor.u32 %v1749_v19, %v1275_v20  ;;  %v1286_v28 = vor.u32 %v1750_v23, %v1283_v24  ;;  %v1769_v37 = vld [vmem:[%s2374_s0 + $0xc0] sm:$0xf0] }
  0x43   :  { %1155 = vmatpush.bf16.msra.mxu1 %v1850_v27  ;;  %1106 = vmatmul.bf16.vlgmr.msrb.gmra.mxu2 %v1266_v38  ;;  %v1282_v27 = vor.u32 %v1756_v22, %v1281_v21  ;;  %v1763_v38 = vld [vmem:[%s2374_s0 + $0x94] sm:$0xf] }
  0x44   :  { %1174 = vmatpush.bf16.msra.mxu2 %v1858_v34  ;;  %1125 = vmatmul.bf16.vlgmr.msrb.gmra.mxu3 %v1270_v39  ;;  %v1762_v34 = vld [vmem:[%s2374_s0 + $0x8c] sm:$0xf]  ;;  %v1335_v39 = vld [vmem:[%s2374_s0 + $0xc4] sm:$0xf0] }
  0x45   :  { %1193 = vmatpush.bf16.msra.mxu3 %v1866_v35  ;;  %v1327_v35 = vld [vmem:[%s2374_s0 + $0xbc] sm:$0xf0] }
  0x46   :  { %1137 = vmatpush.bf16.msra.mxu0 %v1841_v40  ;;  %v1326_v40 = vor.u32 %v1768_v33, %v1325_v32 }
  0x47   :  { %1156 = vmatpush.bf16.msra.mxu1 %v1849_v41  ;;  %v1330_v41 = vor.u32 %v1762_v34, %v1327_v35 }
  0x48   :  { %1175 = vmatpush.bf16.msra.mxu2 %v1857_v42  ;;  %v1334_v42 = vor.u32 %v1769_v37, %v1333_v36 }
  0x49   :  { %1194 = vmatpush.bf16.msra.mxu3 %v1865_v43  ;;  %v1338_v43 = vor.u32 %v1763_v38, %v1335_v39 }
  0x4a   :  { %1138 = vmatpush.bf16.msra.mxu0 %v1840_v44  ;;  %v1289_v44 = vld [vmem:[%s2374_s0 + $0x30] sm:$0xf] }
  0x4b   :  { %1157 = vmatpush.bf16.msra.mxu1 %v1848_v45  ;;  %v1757_v45 = vld [vmem:[%s2374_s0 + $0x60] sm:$0xf0] }
  0x4c   :  { %1176 = vmatpush.bf16.msra.mxu2 %v1856_v46  ;;  %v1341_v46 = vld [vmem:[%s2374_s0 + $0x98] sm:$0xf] }
  0x4d   :  { %1195 = vmatpush.bf16.msra.mxu3 %v1864_v47  ;;  %v1770_v47 = vld [vmem:[%s2374_s0 + $0xc8] sm:$0xf0] }
  0x4e   :  { %1139 = vmatpush.bf16.msra.mxu0 %v1839_v48  ;;  %v1290_v48 = vor.u32 %v1757_v45, %v1289_v44 }
  0x4f   :  { %1158 = vmatpush.bf16.msra.mxu1 %v1847_v49  ;;  %v1342_v49 = vor.u32 %v1770_v47, %v1341_v46 }
  0x50   :  { %1177 = vmatpush.bf16.msra.mxu2 %v1855_v50  ;;  %v1875_v50 = vld [vmem:[%s2375_s2] ss:$0 sm:$0xff] }
  0x51   :  { %1196 = vmatpush.bf16.msra.mxu3 %v1863_v51  ;;  %1073 = vmatmul.bf16.gmra.mxu0 %v1310_v0 }
  0x52   :  { %1140 = vmatpush.bf16.msra.mxu0 %v1838_v60  ;;  %1092 = vmatmul.bf16.gmra.mxu1 %v1314_v1 }
  0x53   :  { %1159 = vmatpush.bf16.msra.mxu1 %v1846_v61  ;;  %1111 = vmatmul.bf16.gmra.mxu2 %v1318_v2 }
  0x54   :  { %1178 = vmatpush.bf16.msra.mxu2 %v1854_v62  ;;  %1130 = vmatmul.bf16.gmra.mxu3 %v1322_v3 }
  0x55   :  { %1197 = vmatpush.bf16.msra.mxu3 %v1862_v63 }
  0x56   :  { %1141 = vmatpush.bf16.msra.mxu0 %v1837_v4 }
  0x57   :  { %1160 = vmatpush.bf16.msra.mxu1 %v1845_v5 }
  0x58   :  { %1179 = vmatpush.bf16.msra.mxu2 %v1853_v6 }
  0x59   :  { %1198 = vmatpush.bf16.msra.mxu3 %v1861_v7 }
  0x5a   :  { %1142 = vmatpush.bf16.msra.mxu0 %v1836_v8 }
  0x5b   :  { %1161 = vmatpush.bf16.msra.mxu1 %v1844_v9 }
  0x5c   :  { %1180 = vmatpush.bf16.msra.mxu2 %v1852_v10 }
  0x5d   :  { %1199 = vmatpush.bf16.msra.mxu3 %v1860_v11 }
  0x5e   :  { %1143 = vmatpush.bf16.msra.mxu0 %v1835_v12 }
  0x5f   :  { %1162 = vmatpush.bf16.msra.mxu1 %v1843_v13 }
  0x60   :  { %1181 = vmatpush.bf16.msra.mxu2 %v1851_v14 }
  0x61   :  { %1200 = vmatpush.bf16.msra.mxu3 %v1859_v15  ;;  %1144 = vmatmul.bf16.vlgmr.msra.gmra.mxu0 %v1274_v25 }
  0x62   :  { %1216 = vmatpush.bf16.msrb.mxu0 %v1870_v18  ;;  %1163 = vmatmul.bf16.vlgmr.msra.gmra.mxu1 %v1278_v26 }
  0x63   :  { %1871 = vmatpush.bf16.msrb.mxu1 %v1870_v18  ;;  %1182 = vmatmul.bf16.vlgmr.msra.gmra.mxu2 %v1282_v27 }
  0x64   :  { %1201 = vmatmul.bf16.vlgmr.msra.gmra.mxu3 %v1286_v28 }
  0x66   :  { %1217 = vmatpush.bf16.msrb.mxu0 %v1869_v29 }
  0x67   :  { %1872 = vmatpush.bf16.msrb.mxu1 %v1869_v29 }
  0x6a   :  { %1218 = vmatpush.bf16.msrb.mxu0 %v1868_v30 }
  0x6b   :  { %1873 = vmatpush.bf16.msrb.mxu1 %v1868_v30 }
  0x6e   :  { %1219 = vmatpush.bf16.msrb.mxu0 %v1867_v31 }
  0x6f   :  { %1874 = vmatpush.bf16.msrb.mxu1 %v1867_v31 }
  0x71   :  { %1149 = vmatmul.bf16.gmra.mxu0 %v1326_v40 }
  0x72   :  { %1168 = vmatmul.bf16.gmra.mxu1 %v1330_v41 }
  0x73   :  { %1187 = vmatmul.bf16.gmra.mxu2 %v1334_v42 }
  0x74   :  { %1206 = vmatmul.bf16.gmra.mxu3 %v1338_v43 }
  0x81   :  { %1743 = vmatmul.msk.bf16.vlgmr.msrb.gmra.mxu0 %vm977_vm0, %v1290_v48 }
  0x82   :  { %1744 = vmatmul.msk.bf16.vlgmr.msrb.gmra.mxu1 %vm977_vm0, %v1342_v49 }
  0x9e   :  { %v993_v51 = vpop.f32.mrf.mxu0 }
  0x9f   :  { %v1012_v52 = vpop.f32.mrf.mxu1  ;;  %v994_v53 = vadd.f32 %v1875_v50, %v993_v51 }
  0xa1   :  { %v1013_v54 = vadd.f32 %v1012_v52, %v994_v53 }
  0xa6   :  { %v1031_v55 = vpop.f32.mrf.mxu2  ;;  %v995_v57 = vpop.f32.mrf.mxu0 }
  0xa7   :  { %v1050_v56 = vpop.f32.mrf.mxu3  ;;  %v1014_v58 = vpop.f32.mrf.mxu1  ;;  %v996_v59 = vadd.f32 %v1875_v50, %v995_v57  ;;  %v1032_v27 = vadd.f32 %v1031_v55, %v1013_v54 }
  0xa9   :  { %v1015_v60 = vadd.f32 %v1014_v58, %v996_v59  ;;  %v1051_v30 = vadd.f32 %v1050_v56, %v1032_v27 }
  0xae   :  { %v1033_v61 = vpop.f32.mrf.mxu2  ;;  %v998_v63 = vpop.f32.mrf.mxu0 }
  0xaf   :  { %v1052_v62 = vpop.f32.mrf.mxu3  ;;  %v1017_v0 = vpop.f32.mrf.mxu1  ;;  %v999_v21 = vadd.f32 %v1875_v50, %v998_v63  ;;  %v1034_v39 = vadd.f32 %v1033_v61, %v1015_v60 }
  0xb1   :  { %v1018_v26 = vadd.f32 %v1017_v0, %v999_v21  ;;  %v1053_v43 = vadd.f32 %v1052_v62, %v1034_v39 }
  0xb6   :  { %v1036_v1 = vpop.f32.mrf.mxu2  ;;  %v1000_v3 = vpop.f32.mrf.mxu0 }
  0xb7   :  { %v1055_v2 = vpop.f32.mrf.mxu3  ;;  %v1019_v4 = vpop.f32.mrf.mxu1  ;;  %v1037_v28 = vadd.f32 %v1036_v1, %v1018_v26  ;;  %v1001_v29 = vadd.f32 %v1875_v50, %v1000_v3 }
  0xb9   :  { %v1056_v31 = vadd.f32 %v1055_v2, %v1037_v28  ;;  %v1020_v36 = vadd.f32 %v1019_v4, %v1001_v29 }
  0xbe   :  { %v1038_v5 = vpop.f32.mrf.mxu2  ;;  %v1069_v7 = vpop.f32.mrf.mxu0 }
  0xbf   :  { %v1057_v6 = vpop.f32.mrf.mxu3  ;;  %v1088_v8 = vpop.f32.mrf.mxu1  ;;  %v1070_v37 = vadd.f32 %v1069_v7, %v1051_v30  ;;  %v1039_v40 = vadd.f32 %v1038_v5, %v1020_v36 }
  0xc1   :  { %v1089_v41 = vadd.f32 %v1088_v8, %v1070_v37  ;;  %v1058_v44 = vadd.f32 %v1057_v6, %v1039_v40 }
  0xc6   :  { %v1107_v9 = vpop.f32.mrf.mxu2  ;;  %v1071_v11 = vpop.f32.mrf.mxu0 }
  0xc7   :  { %v1126_v10 = vpop.f32.mrf.mxu3  ;;  %v1090_v12 = vpop.f32.mrf.mxu1  ;;  %v1108_v45 = vadd.f32 %v1107_v9, %v1089_v41  ;;  %v1072_v50 = vadd.f32 %v1071_v11, %v1053_v43 }
  0xc9   :  { %v1127_v53 = vadd.f32 %v1126_v10, %v1108_v45  ;;  %v1091_v55 = vadd.f32 %v1090_v12, %v1072_v50 }
  0xce   :  { %v1109_v13 = vpop.f32.mrf.mxu2  ;;  %v1074_v15 = vpop.f32.mrf.mxu0 }
  0xcf   :  { %v1128_v14 = vpop.f32.mrf.mxu3  ;;  %v1093_v16 = vpop.f32.mrf.mxu1  ;;  %v1075_v38 = vadd.f32 %v1074_v15, %v1056_v31  ;;  %v1110_v59 = vadd.f32 %v1109_v13, %v1091_v55 }
  0xd1   :  { %v1094_v42 = vadd.f32 %v1093_v16, %v1075_v38  ;;  %v1129_v2 = vadd.f32 %v1128_v14, %v1110_v59 }
  0xd6   :  { %v1112_v17 = vpop.f32.mrf.mxu2  ;;  %v1076_v19 = vpop.f32.mrf.mxu0 }
  0xd7   :  { %v1131_v18 = vpop.f32.mrf.mxu3  ;;  %v1095_v20 = vpop.f32.mrf.mxu1  ;;  %v1113_v46 = vadd.f32 %v1112_v17, %v1094_v42  ;;  %v1077_v51 = vadd.f32 %v1076_v19, %v1058_v44 }
  0xd9   :  { %v1132_v54 = vadd.f32 %v1131_v18, %v1113_v46  ;;  %v1096_v56 = vadd.f32 %v1095_v20, %v1077_v51 }
  0xde   :  { %v1114_v22 = vpop.f32.mrf.mxu2  ;;  %v1145_v24 = vpop.f32.mrf.mxu0 }
  0xdf   :  { %v1133_v23 = vpop.f32.mrf.mxu3  ;;  %v1164_v25 = vpop.f32.mrf.mxu1  ;;  %v1146_v57 = vadd.f32 %v1145_v24, %v1127_v53  ;;  %v1115_v60 = vadd.f32 %v1114_v22, %v1096_v56 }
  0xe1   :  { %v1165_v0 = vadd.f32 %v1164_v25, %v1146_v57  ;;  %v1134_v3 = vadd.f32 %v1133_v23, %v1115_v60 }
  0xe6   :  { %v1183_v32 = vpop.f32.mrf.mxu2  ;;  %v1147_v34 = vpop.f32.mrf.mxu0 }
  0xe7   :  { %v1202_v33 = vpop.f32.mrf.mxu3  ;;  %v1166_v35 = vpop.f32.mrf.mxu1  ;;  %v1184_v4 = vadd.f32 %v1183_v32, %v1165_v0  ;;  %v1148_v7 = vadd.f32 %v1147_v34, %v1129_v2 }
  0xe9   :  { %v1203_v9 = vadd.f32 %v1202_v33, %v1184_v4  ;;  %v1167_v16 = vadd.f32 %v1166_v35, %v1148_v7 }
  0xee   :  { %v1185_v47 = vpop.f32.mrf.mxu2  ;;  %v1150_v48 = vpop.f32.mrf.mxu0 }
  0xef   :  { %v1169_v49 = vpop.f32.mrf.mxu1  ;;  %v1204_v52 = vpop.f32.mrf.mxu3  ;;  %v1151_v58 = vadd.f32 %v1150_v48, %v1132_v54  ;;  %v1186_v19 = vadd.f32 %v1185_v47, %v1167_v16 }
  0xf1   :  { %v1170_v1 = vadd.f32 %v1169_v49, %v1151_v58  ;;  %v1205_v21 = vadd.f32 %v1204_v52, %v1186_v19 }
  0xf6   :  { %v1188_v61 = vpop.f32.mrf.mxu2  ;;  %v1152_v63 = vpop.f32.mrf.mxu0 }
  0xf7   :  { %v1171_v62 = vpop.f32.mrf.mxu1  ;;  %v1189_v5 = vadd.f32 %v1188_v61, %v1170_v1  ;;  %v1207_v6 = vpop.f32.mrf.mxu3  ;;  %v1153_v8 = vadd.f32 %v1152_v63, %v1134_v3 }
  0xf9   :  { %v1208_v10 = vadd.f32 %v1207_v6, %v1189_v5  ;;  %v1172_v13 = vadd.f32 %v1171_v62, %v1153_v8 }
  0xfe   :  { %v1190_v11 = vpop.f32.mrf.mxu2  ;;  %v1221_v12 = vpop.f32.mrf.mxu0 }
  0xff   :  { %v1226_v15 = vpop.f32.mrf.mxu1  ;;  %v1222_v17 = vadd.f32 %v1221_v12, %v1203_v9  ;;  %v1191_v20 = vadd.f32 %v1190_v11, %v1172_v13  ;;  %v1209_v14 = vpop.f32.mrf.mxu3 }
 0x100   :  { %v1227_v18 = vadd.f32 %v1226_v15, %v1208_v10 }
 0x101   :  { %1231 = vst.msk [vmem:[%s2376_s3] sm:$0xff] %vm977_vm0, %v1222_v17  ;;  %v1210_v22 = vadd.f32 %v1209_v14, %v1191_v20 }
 0x102   :  { %1233 = vst.msk [vmem:[%s2376_s3 + $0x10] sm:$0xff] %vm977_vm0, %v1227_v18 }
 0x106   :  { %v1223_v23 = vpop.f32.mrf.mxu0 }
 0x107   :  { %v1228_v24 = vpop.f32.mrf.mxu1  ;;  %v1224_v25 = vadd.f32 %v1223_v23, %v1205_v21 }
 0x108   :  { %v1229_v26 = vadd.f32 %v1228_v24, %v1210_v22 }
 0x109   :  { %1232 = vst.msk [vmem:[%s2376_s3 + $0x8] sm:$0xff] %vm977_vm0, %v1224_v25 }
 0x10a   :  { %1234 = vst.msk [vmem:[%s2376_s3 + $0x18] sm:$0xff] %vm977_vm0, %v1229_v26 }

// kernel: my_model_forward.11
= control target key start
LH: loop header
LB: loop body
LE: loop exit
PB: predicated region body
PF: predicated region fallthrough
CT: control target
= control target key end

     0   :  { %s1059_s0 = inlined_call_operand.vmem [shape: f32[2,1344], index: 0, kind: input, shape index: {}]   ;;  %s1060_s1 = inlined_call_operand.vmem [shape: f32[1344,128], index: 1, kind: input, shape index: {}]   ;;  %s1061_s2 = inlined_call_operand.vmem [shape: f32[1,128], index: 2, kind: input, shape index: {}]   ;;  %s1062_s3 = inlined_call_operand.hbm [shape: f32[2,128], index: 3, kind: output, shape index: {}]  }
   0x1   :  { %v33_v0 = vld [vmem:[%s1060_s1 + $0x78] sm:$0xff]  ;;  %v32_v1 = vld [vmem:[%s1060_s1 + $0x70] sm:$0xff]  ;;  %v31_v4 = vld [vmem:[%s1060_s1 + $0x68] sm:$0xff] }
   0x2   :  { %v49_v2 = vld [vmem:[%s1060_s1 + $0xf8] sm:$0xff]  ;;  %221 = vmatpush.msra.mxu0 %v33_v0  ;;  %v48_v3 = vld [vmem:[%s1060_s1 + $0xf0] sm:$0xff]  ;;  %v47_v5 = vld [vmem:[%s1060_s1 + $0xe8] sm:$0xff] }
   0x3   :  { %241 = vmatpush.msra.mxu1 %v49_v2  ;;  %v65_v6 = vld [vmem:[%s1060_s1 + $0x178] sm:$0xff]  ;;  %v64_v7 = vld [vmem:[%s1060_s1 + $0x170] sm:$0xff]  ;;  %v30_v9 = vld [vmem:[%s1060_s1 + $0x60] sm:$0xff] }
   0x4   :  { %222 = vmatpush.msra.mxu0 %v32_v1  ;;  %v81_v8 = vld [vmem:[%s1060_s1 + $0x1f8] sm:$0xff]  ;;  %261 = vmatpush.msra.mxu2 %v65_v6  ;;  %v46_v10 = vld [vmem:[%s1060_s1 + $0xe0] sm:$0xff]  ;;  %v63_v11 = vld [vmem:[%s1060_s1 + $0x168] sm:$0xff] }
   0x5   :  { %242 = vmatpush.msra.mxu1 %v48_v3  ;;  %281 = vmatpush.msra.mxu3 %v81_v8  ;;  %v80_v12 = vld [vmem:[%s1060_s1 + $0x1f0] sm:$0xff]  ;;  %v29_v13 = vld [vmem:[%s1060_s1 + $0x58] sm:$0xff]  ;;  %v79_v15 = vld [vmem:[%s1060_s1 + $0x1e8] sm:$0xff] }
   0x6   :  { %223 = vmatpush.msra.mxu0 %v31_v4  ;;  %262 = vmatpush.msra.mxu2 %v64_v7  ;;  %v45_v14 = vld [vmem:[%s1060_s1 + $0xd8] sm:$0xff]  ;;  %v62_v16 = vld [vmem:[%s1060_s1 + $0x160] sm:$0xff]  ;;  %v28_v18 = vld [vmem:[%s1060_s1 + $0x50] sm:$0xff] }
   0x7   :  { %243 = vmatpush.msra.mxu1 %v47_v5  ;;  %282 = vmatpush.msra.mxu3 %v80_v12  ;;  %v78_v17 = vld [vmem:[%s1060_s1 + $0x1e0] sm:$0xff]  ;;  %v44_v19 = vld [vmem:[%s1060_s1 + $0xd0] sm:$0xff]  ;;  %v61_v20 = vld [vmem:[%s1060_s1 + $0x158] sm:$0xff] }
   0x8   :  { %224 = vmatpush.msra.mxu0 %v30_v9  ;;  %263 = vmatpush.msra.mxu2 %v63_v11  ;;  %v77_v21 = vld [vmem:[%s1060_s1 + $0x1d8] sm:$0xff]  ;;  %v27_v22 = vld [vmem:[%s1060_s1 + $0x48] sm:$0xff]  ;;  %v60_v24 = vld [vmem:[%s1060_s1 + $0x150] sm:$0xff] }
   0x9   :  { %244 = vmatpush.msra.mxu1 %v46_v10  ;;  %283 = vmatpush.msra.mxu3 %v79_v15  ;;  %v43_v23 = vld [vmem:[%s1060_s1 + $0xc8] sm:$0xff]  ;;  %v76_v25 = vld [vmem:[%s1060_s1 + $0x1d0] sm:$0xff]  ;;  %v26_v26 = vld [vmem:[%s1060_s1 + $0x40] sm:$0xff] }
   0xa   :  { %225 = vmatpush.msra.mxu0 %v29_v13  ;;  %264 = vmatpush.msra.mxu2 %v62_v16  ;;  %v42_v27 = vld [vmem:[%s1060_s1 + $0xc0] sm:$0xff]  ;;  %v59_v28 = vld [vmem:[%s1060_s1 + $0x148] sm:$0xff]  ;;  %v25_v30 = vld [vmem:[%s1060_s1 + $0x38] sm:$0xff] }
   0xb   :  { %245 = vmatpush.msra.mxu1 %v45_v14  ;;  %284 = vmatpush.msra.mxu3 %v78_v17  ;;  %v75_v29 = vld [vmem:[%s1060_s1 + $0x1c8] sm:$0xff]  ;;  %v41_v31 = vld [vmem:[%s1060_s1 + $0xb8] sm:$0xff]  ;;  %v58_v32 = vld [vmem:[%s1060_s1 + $0x140] sm:$0xff] }
   0xc   :  { %226 = vmatpush.msra.mxu0 %v28_v18  ;;  %265 = vmatpush.msra.mxu2 %v61_v20  ;;  %v74_v33 = vld [vmem:[%s1060_s1 + $0x1c0] sm:$0xff]  ;;  %v24_v34 = vld [vmem:[%s1060_s1 + $0x30] sm:$0xff]  ;;  %v57_v36 = vld [vmem:[%s1060_s1 + $0x138] sm:$0xff] }
   0xd   :  { %246 = vmatpush.msra.mxu1 %v44_v19  ;;  %285 = vmatpush.msra.mxu3 %v77_v21  ;;  %v40_v35 = vld [vmem:[%s1060_s1 + $0xb0] sm:$0xff]  ;;  %v73_v37 = vld [vmem:[%s1060_s1 + $0x1b8] sm:$0xff]  ;;  %v23_v38 = vld [vmem:[%s1060_s1 + $0x28] sm:$0xff] }
   0xe   :  { %227 = vmatpush.msra.mxu0 %v27_v22  ;;  %266 = vmatpush.msra.mxu2 %v60_v24  ;;  %v39_v39 = vld [vmem:[%s1060_s1 + $0xa8] sm:$0xff]  ;;  %v56_v40 = vld [vmem:[%s1060_s1 + $0x130] sm:$0xff]  ;;  %v22_v42 = vld [vmem:[%s1060_s1 + $0x20] sm:$0xff] }
   0xf   :  { %247 = vmatpush.msra.mxu1 %v43_v23  ;;  %286 = vmatpush.msra.mxu3 %v76_v25  ;;  %v72_v41 = vld [vmem:[%s1060_s1 + $0x1b0] sm:$0xff]  ;;  %v38_v43 = vld [vmem:[%s1060_s1 + $0xa0] sm:$0xff]  ;;  %v55_v44 = vld [vmem:[%s1060_s1 + $0x128] sm:$0xff] }
  0x10   :  { %228 = vmatpush.msra.mxu0 %v26_v26  ;;  %267 = vmatpush.msra.mxu2 %v59_v28  ;;  %v71_v45 = vld [vmem:[%s1060_s1 + $0x1a8] sm:$0xff]  ;;  %v21_v46 = vld [vmem:[%s1060_s1 + $0x18] sm:$0xff]  ;;  %v54_v48 = vld [vmem:[%s1060_s1 + $0x120] sm:$0xff] }
  0x11   :  { %248 = vmatpush.msra.mxu1 %v42_v27  ;;  %287 = vmatpush.msra.mxu3 %v75_v29  ;;  %v37_v47 = vld [vmem:[%s1060_s1 + $0x98] sm:$0xff]  ;;  %v70_v49 = vld [vmem:[%s1060_s1 + $0x1a0] sm:$0xff]  ;;  %v20_v50 = vld [vmem:[%s1060_s1 + $0x10] sm:$0xff] }
  0x12   :  { %229 = vmatpush.msra.mxu0 %v25_v30  ;;  %268 = vmatpush.msra.mxu2 %v58_v32  ;;  %v36_v51 = vld [vmem:[%s1060_s1 + $0x90] sm:$0xff]  ;;  %v53_v52 = vld [vmem:[%s1060_s1 + $0x118] sm:$0xff]  ;;  %v19_v54 = vld [vmem:[%s1060_s1 + $0x8] sm:$0xff] }
  0x13   :  { %249 = vmatpush.msra.mxu1 %v41_v31  ;;  %288 = vmatpush.msra.mxu3 %v74_v33  ;;  %v69_v53 = vld [vmem:[%s1060_s1 + $0x198] sm:$0xff]  ;;  %v35_v55 = vld [vmem:[%s1060_s1 + $0x88] sm:$0xff]  ;;  %v52_v56 = vld [vmem:[%s1060_s1 + $0x110] sm:$0xff] }
  0x14   :  { %230 = vmatpush.msra.mxu0 %v24_v34  ;;  %269 = vmatpush.msra.mxu2 %v57_v36  ;;  %v68_v57 = vld [vmem:[%s1060_s1 + $0x190] sm:$0xff]  ;;  %v18_v58 = vld [vmem:[%s1060_s1] sm:$0xff]  ;;  %v97_v60 = vld [vmem:[%s1060_s1 + $0x278] sm:$0xff] }
  0x15   :  { %250 = vmatpush.msra.mxu1 %v40_v35  ;;  %289 = vmatpush.msra.mxu3 %v73_v37  ;;  %v34_v59 = vld [vmem:[%s1060_s1 + $0x80] sm:$0xff]  ;;  %v113_v61 = vld [vmem:[%s1060_s1 + $0x2f8] sm:$0xff]  ;;  %v51_v62 = vld [vmem:[%s1060_s1 + $0x108] sm:$0xff] }
  0x16   :  { %231 = vmatpush.msra.mxu0 %v23_v38  ;;  %270 = vmatpush.msra.mxu2 %v56_v40  ;;  %v67_v63 = vld [vmem:[%s1060_s1 + $0x188] sm:$0xff]  ;;  %v96_v0 = vld [vmem:[%s1060_s1 + $0x270] sm:$0xff]  ;;  %v50_v2 = vld [vmem:[%s1060_s1 + $0x100] sm:$0xff] }
  0x17   :  { %251 = vmatpush.msra.mxu1 %v39_v39  ;;  %290 = vmatpush.msra.mxu3 %v72_v41  ;;  %v112_v1 = vld [vmem:[%s1060_s1 + $0x2f0] sm:$0xff]  ;;  %v66_v3 = vld [vmem:[%s1060_s1 + $0x180] sm:$0xff]  ;;  %v95_v4 = vld [vmem:[%s1060_s1 + $0x268] sm:$0xff] }
  0x18   :  { %232 = vmatpush.msra.mxu0 %v22_v42  ;;  %271 = vmatpush.msra.mxu2 %v55_v44  ;;  %v111_v5 = vld [vmem:[%s1060_s1 + $0x2e8] sm:$0xff]  ;;  %v129_v6 = vld [vmem:[%s1060_s1 + $0x378] sm:$0xff]  ;;  %v94_v8 = vld [vmem:[%s1060_s1 + $0x260] sm:$0xff] }
  0x19   :  { %252 = vmatpush.msra.mxu1 %v38_v43  ;;  %291 = vmatpush.msra.mxu3 %v71_v45  ;;  %v145_v7 = vld [vmem:[%s1060_s1 + $0x3f8] sm:$0xff]  ;;  %v110_v9 = vld [vmem:[%s1060_s1 + $0x2e0] sm:$0xff]  ;;  %v128_v10 = vld [vmem:[%s1060_s1 + $0x370] sm:$0xff] }
  0x1a   :  { %233 = vmatpush.msra.mxu0 %v21_v46  ;;  %272 = vmatpush.msra.mxu2 %v54_v48  ;;  %v144_v11 = vld [vmem:[%s1060_s1 + $0x3f0] sm:$0xff]  ;;  %v93_v12 = vld [vmem:[%s1060_s1 + $0x258] sm:$0xff]  ;;  %v127_v14 = vld [vmem:[%s1060_s1 + $0x368] sm:$0xff] }
  0x1b   :  { %253 = vmatpush.msra.mxu1 %v37_v47  ;;  %292 = vmatpush.msra.mxu3 %v70_v49  ;;  %v109_v13 = vld [vmem:[%s1060_s1 + $0x2d8] sm:$0xff]  ;;  %v143_v15 = vld [vmem:[%s1060_s1 + $0x3e8] sm:$0xff]  ;;  %v15_v16 = vld [vmem:[%s1059_s0] sm:$0xff] }
  0x1c   :  { %234 = vmatpush.msra.mxu0 %v20_v50  ;;  %273 = vmatpush.msra.mxu2 %v53_v52  ;;  %v92_v17 = vld [vmem:[%s1060_s1 + $0x250] sm:$0xff]  ;;  %193 = vst [vmem:[#allocation1] ss:$4 sm:$0xff] %v15_v16  ;;  %v126_v19 = vld [vmem:[%s1060_s1 + $0x360] sm:$0xff]  ;;  %v91_v21 = vld [vmem:[%s1060_s1 + $0x248] sm:$0xff] }
  0x1d   :  { %254 = vmatpush.msra.mxu1 %v36_v51  ;;  %293 = vmatpush.msra.mxu3 %v69_v53  ;;  %v108_v18 = vld [vmem:[%s1060_s1 + $0x2d0] sm:$0xff]  ;;  %v142_v20 = vld [vmem:[%s1060_s1 + $0x3e0] sm:$0xff]  ;;  %v107_v22 = vld [vmem:[%s1060_s1 + $0x2c8] sm:$0xff] }
  0x1e   :  { %235 = vmatpush.msra.mxu0 %v19_v54  ;;  %274 = vmatpush.msra.mxu2 %v52_v56  ;;  %v90_v23 = vld [vmem:[%s1060_s1 + $0x240] sm:$0xff]  ;;  %v125_v24 = vld [vmem:[%s1060_s1 + $0x358] sm:$0xff]  ;;  %v124_v28 = vld [vmem:[%s1060_s1 + $0x350] sm:$0xff] }
  0x1f   :  { %255 = vmatpush.msra.mxu1 %v35_v55  ;;  %294 = vmatpush.msra.mxu3 %v68_v57  ;;  %v141_v25 = vld [vmem:[%s1060_s1 + $0x3d8] sm:$0xff]  ;;  %v106_v27 = vld [vmem:[%s1060_s1 + $0x2c0] sm:$0xff]  ;;  %v123_v30 = vld [vmem:[%s1060_s1 + $0x348] sm:$0xff] }
  0x20   :  { %236 = vmatpush.msra.mxu0 %v18_v58  ;;  %275 = vmatpush.msra.mxu2 %v51_v62  ;;  %v89_v26 = vld [vmem:[%s1060_s1 + $0x238] sm:$0xff]  ;;  %v140_v31 = vld [vmem:[%s1060_s1 + $0x3d0] sm:$0xff]  ;;  %v16_v32 = vld [vmem:[%s1059_s0 + $0x8] sm:$0xff] }
  0x21   :  { %256 = vmatpush.msra.mxu1 %v34_v59  ;;  %295 = vmatpush.msra.mxu3 %v67_v63  ;;  %v105_v29 = vld [vmem:[%s1060_s1 + $0x2b8] sm:$0xff]  ;;  %v88_v33 = vld [vmem:[%s1060_s1 + $0x230] sm:$0xff]  ;;  %v139_v35 = vld [vmem:[%s1060_s1 + $0x3c8] sm:$0xff]  ;;  %195 = vst [vmem:[#allocation1 + $0x20] ss:$4 sm:$0xff] %v16_v32 }
  0x22   :  { %301 = vmatpush.msrb.mxu0 %v97_v60  ;;  %276 = vmatpush.msra.mxu2 %v50_v2  ;;  %v104_v34 = vld [vmem:[%s1060_s1 + $0x2b0] sm:$0xff]  ;;  %v122_v41 = vld [vmem:[%s1060_s1 + $0x340] sm:$0xff]  ;;  %v87_v43 = vld [vmem:[%s1060_s1 + $0x228] sm:$0xff] }
  0x23   :  { %321 = vmatpush.msrb.mxu1 %v113_v61  ;;  %296 = vmatpush.msra.mxu3 %v66_v3  ;;  %v17_v36 = vld [vmem:[%s1059_s0 + $0x10] sm:$0x3f]  ;;  %v196_v38 = vld.sshfl [vmem:[#allocation1] sm:$0xff pattern:$0x73625140]  ;;  %v103_v44 = vld [vmem:[%s1060_s1 + $0x2a8] sm:$0xff] }
  0x24   :  { %302 = vmatpush.msrb.mxu0 %v96_v0  ;;  %341 = vmatpush.msrb.mxu2 %v129_v6  ;;  %v198_v37 = vld.sshfl [vmem:[#allocation1 + $0x10] sm:$0xff pattern:$0x73625140]  ;;  %v199_v39 = vld.sshfl [vmem:[#allocation1 + $0x18] sm:$0xff pattern:$0x73625140] }
  0x25   :  { %322 = vmatpush.msrb.mxu1 %v112_v1  ;;  %361 = vmatpush.msrb.mxu3 %v145_v7  ;;  %v840_v40 = vld.sshfl [vmem:[#allocation1 + $0x8] sm:$0xff pattern:$0x73625140]  ;;  %v138_v42 = vld [vmem:[%s1060_s1 + $0x3c0] sm:$0xff]  ;;  %v121_v45 = vld [vmem:[%s1060_s1 + $0x338] sm:$0xff] }
  0x26   :  { %303 = vmatpush.msrb.mxu0 %v95_v4  ;;  %342 = vmatpush.msrb.mxu2 %v128_v10  ;;  %204 = vst [vmem:[#allocation1] ss:$4 sm:$0xff] %v17_v36  ;;  %v137_v46 = vld [vmem:[%s1060_s1 + $0x3b8] sm:$0xff]  ;;  %v86_v47 = vld [vmem:[%s1060_s1 + $0x220] sm:$0xff]  ;;  %v120_v49 = vld [vmem:[%s1060_s1 + $0x330] sm:$0xff] }
  0x27   :  { %323 = vmatpush.msrb.mxu1 %v111_v5  ;;  %362 = vmatpush.msrb.mxu3 %v144_v11  ;;  %v102_v48 = vld [vmem:[%s1060_s1 + $0x2a0] sm:$0xff]  ;;  %v136_v50 = vld [vmem:[%s1060_s1 + $0x3b0] sm:$0xff]  ;;  %v85_v51 = vld [vmem:[%s1060_s1 + $0x218] sm:$0xff] }
  0x28   :  { %304 = vmatpush.msrb.mxu0 %v94_v8  ;;  %343 = vmatpush.msrb.mxu2 %v127_v14  ;;  %v101_v52 = vld [vmem:[%s1060_s1 + $0x298] sm:$0xff]  ;;  %v119_v53 = vld [vmem:[%s1060_s1 + $0x328] sm:$0xff]  ;;  %v84_v55 = vld [vmem:[%s1060_s1 + $0x210] sm:$0xff] }
  0x29   :  { %324 = vmatpush.msrb.mxu1 %v110_v9  ;;  %363 = vmatpush.msrb.mxu3 %v143_v15  ;;  %v135_v54 = vld [vmem:[%s1060_s1 + $0x3a8] sm:$0xff]  ;;  %v100_v56 = vld [vmem:[%s1060_s1 + $0x290] sm:$0xff]  ;;  %v118_v57 = vld [vmem:[%s1060_s1 + $0x320] sm:$0xff] }
  0x2a   :  { %305 = vmatpush.msrb.mxu0 %v93_v12  ;;  %344 = vmatpush.msrb.mxu2 %v126_v19  ;;  %v134_v58 = vld [vmem:[%s1060_s1 + $0x3a0] sm:$0xff]  ;;  %v83_v59 = vld [vmem:[%s1060_s1 + $0x208] sm:$0xff]  ;;  %v117_v61 = vld [vmem:[%s1060_s1 + $0x318] sm:$0xff] }
  0x2b   :  { %325 = vmatpush.msrb.mxu1 %v109_v13  ;;  %364 = vmatpush.msrb.mxu3 %v142_v20  ;;  %v99_v60 = vld [vmem:[%s1060_s1 + $0x288] sm:$0xff]  ;;  %v82_v62 = vld [vmem:[%s1060_s1 + $0x200] sm:$0xff] }
  0x2c   :  { %306 = vmatpush.msrb.mxu0 %v92_v17  ;;  %345 = vmatpush.msrb.mxu2 %v125_v24 }
  0x2d   :  { %326 = vmatpush.msrb.mxu1 %v108_v18  ;;  %365 = vmatpush.msrb.mxu3 %v141_v25 }
  0x2e   :  { %307 = vmatpush.msrb.mxu0 %v91_v21  ;;  %346 = vmatpush.msrb.mxu2 %v124_v28 }
  0x2f   :  { %327 = vmatpush.msrb.mxu1 %v107_v22  ;;  %366 = vmatpush.msrb.mxu3 %v140_v31 }
  0x30   :  { %308 = vmatpush.msrb.mxu0 %v90_v23  ;;  %347 = vmatpush.msrb.mxu2 %v123_v30 }
  0x31   :  { %328 = vmatpush.msrb.mxu1 %v106_v27  ;;  %367 = vmatpush.msrb.mxu3 %v139_v35 }
  0x32   :  { %309 = vmatpush.msrb.mxu0 %v89_v26  ;;  %348 = vmatpush.msrb.mxu2 %v122_v41 }
  0x33   :  { %329 = vmatpush.msrb.mxu1 %v105_v29  ;;  %368 = vmatpush.msrb.mxu3 %v138_v42 }
  0x34   :  { %310 = vmatpush.msrb.mxu0 %v88_v33  ;;  %349 = vmatpush.msrb.mxu2 %v121_v45 }
  0x35   :  { %330 = vmatpush.msrb.mxu1 %v104_v34  ;;  %369 = vmatpush.msrb.mxu3 %v137_v46 }
  0x36   :  { %311 = vmatpush.msrb.mxu0 %v87_v43  ;;  %350 = vmatpush.msrb.mxu2 %v120_v49 }
  0x37   :  { %331 = vmatpush.msrb.mxu1 %v103_v44  ;;  %370 = vmatpush.msrb.mxu3 %v136_v50 }
  0x38   :  { %312 = vmatpush.msrb.mxu0 %v86_v47  ;;  %351 = vmatpush.msrb.mxu2 %v119_v53 }
  0x39   :  { %332 = vmatpush.msrb.mxu1 %v102_v48  ;;  %371 = vmatpush.msrb.mxu3 %v135_v54 }
  0x3a   :  { %313 = vmatpush.msrb.mxu0 %v85_v51  ;;  %352 = vmatpush.msrb.mxu2 %v118_v57 }
  0x3b   :  { %333 = vmatpush.msrb.mxu1 %v101_v52  ;;  %372 = vmatpush.msrb.mxu3 %v134_v58 }
  0x3c   :  { %314 = vmatpush.msrb.mxu0 %v84_v55 }
  0x3d   :  { %334 = vmatpush.msrb.mxu1 %v100_v56 }
  0x3e   :  { %8 = vsyncpa [#allocation3], 0  ;;  %315 = vmatpush.msrb.mxu0 %v83_v59  ;;  %277 = vmatmul.f32.vlgmr.msra.gmra.mxu2 %v198_v37  ;;  %v98_v63 = vld [vmem:[%s1060_s1 + $0x280] sm:$0xff]  ;;  %v161_v0 = vld [vmem:[%s1060_s1 + $0x478] sm:$0xff]  ;;  %vm218_vm0 = vcmask 523264   ;;  %vm441_vm1 = vcmask 1041408  }
  0x3f   :  { %335 = vmatpush.msrb.mxu1 %v99_v60  ;;  %353 = vmatpush.msrb.mxu2 %v117_v61  ;;  %v116_v1 = vld [vmem:[%s1060_s1 + $0x310] sm:$0xff]  ;;  %v133_v2 = vld [vmem:[%s1060_s1 + $0x398] sm:$0xff]  ;;  %v115_v5 = vld [vmem:[%s1060_s1 + $0x308] sm:$0xff]  ;;  %s474_s0 = sshll.u32 %s1062_s3, 4  ;;  %s475_s0 = int_to_ptr.hbm [resolvable:$true] %s474_s0 }
  0x40   :  { %316 = vmatpush.msrb.mxu0 %v82_v62  ;;  %297 = vmatmul.f32.vlgmr.msra.gmra.mxu3 %v199_v39  ;;  %v160_v3 = vld [vmem:[%s1060_s1 + $0x470] sm:$0xff]  ;;  %v177_v4 = vld [vmem:[%s1060_s1 + $0x4f8] sm:$0xff]  ;;  %v159_v7 = vld [vmem:[%s1060_s1 + $0x468] sm:$0xff] }
  0x41   :  { %237 = vmatmul.f32.vlgmr.msra.gmra.mxu0 %v196_v38  ;;  %336 = vmatpush.msrb.mxu1 %v98_v63  ;;  %v132_v6 = vld [vmem:[%s1060_s1 + $0x390] sm:$0xff]  ;;  %v114_v9 = vld [vmem:[%s1060_s1 + $0x300] sm:$0xff]  ;;  %v131_v10 = vld [vmem:[%s1060_s1 + $0x388] sm:$0xff] }
  0x42   :  { %381 = vmatpush.msra.mxu0 %v161_v0  ;;  %354 = vmatpush.msrb.mxu2 %v116_v1  ;;  %v176_v8 = vld [vmem:[%s1060_s1 + $0x4f0] sm:$0xff]  ;;  %v158_v12 = vld [vmem:[%s1060_s1 + $0x460] sm:$0xff]  ;;  %v175_v13 = vld [vmem:[%s1060_s1 + $0x4e8] sm:$0xff] }
  0x43   :  { %373 = vmatpush.msrb.mxu3 %v133_v2  ;;  %257 = vmatmul.f32.vlgmr.msra.gmra.mxu1 %v840_v40  ;;  %v202_v11 = vld.sshfl [vmem:[#allocation1 + $0x30] sm:$0xff pattern:$0x73625140]  ;;  %v130_v14 = vld [vmem:[%s1060_s1 + $0x380] sm:$0xff]  ;;  %v157_v17 = vld [vmem:[%s1060_s1 + $0x458] sm:$0xff] }
  0x44   :  { %382 = vmatpush.msra.mxu0 %v160_v3  ;;  %401 = vmatpush.msra.mxu1 %v177_v4  ;;  %v200_v15 = vld.sshfl [vmem:[#allocation1 + $0x20] sm:$0xff pattern:$0x73625140]  ;;  %v203_v16 = vld.sshfl [vmem:[#allocation1 + $0x38] sm:$0xff pattern:$0x73625140] }
  0x45   :  { %355 = vmatpush.msrb.mxu2 %v115_v5  ;;  %374 = vmatpush.msrb.mxu3 %v132_v6  ;;  %v174_v18 = vld [vmem:[%s1060_s1 + $0x4e0] sm:$0xff]  ;;  %v201_v19 = vld.sshfl [vmem:[#allocation1 + $0x28] sm:$0xff pattern:$0x73625140]  ;;  %v185_v20 = vld [vmem:[%s1060_s1 + $0x538] sm:$0xff] }
  0x46   :  { %383 = vmatpush.msra.mxu0 %v159_v7  ;;  %402 = vmatpush.msra.mxu1 %v176_v8  ;;  %v156_v21 = vld [vmem:[%s1060_s1 + $0x450] sm:$0xff]  ;;  %v173_v22 = vld [vmem:[%s1060_s1 + $0x4d8] sm:$0xff]  ;;  %v155_v24 = vld [vmem:[%s1060_s1 + $0x448] sm:$0xff] }
  0x47   :  { %356 = vmatpush.msrb.mxu2 %v114_v9  ;;  %375 = vmatpush.msrb.mxu3 %v131_v10  ;;  %v184_v23 = vld [vmem:[%s1060_s1 + $0x530] sm:$0xff]  ;;  %v183_v26 = vld [vmem:[%s1060_s1 + $0x528] sm:$0xff]  ;;  %v154_v27 = vld [vmem:[%s1060_s1 + $0x440] sm:$0xff] }
  0x48   :  { %357 = vmatmul.f32.vlgmr.msrb.gmra.mxu2 %v202_v11  ;;  %384 = vmatpush.msra.mxu0 %v158_v12  ;;  %v172_v25 = vld [vmem:[%s1060_s1 + $0x4d0] sm:$0xff]  ;;  %v171_v28 = vld [vmem:[%s1060_s1 + $0x4c8] sm:$0xff]  ;;  %v182_v29 = vld [vmem:[%s1060_s1 + $0x520] sm:$0xff] }
  0x49   :  { %403 = vmatpush.msra.mxu1 %v175_v13  ;;  %376 = vmatpush.msrb.mxu3 %v130_v14  ;;  %v153_v30 = vld [vmem:[%s1060_s1 + $0x438] sm:$0xff]  ;;  %v170_v31 = vld [vmem:[%s1060_s1 + $0x4c0] sm:$0xff]  ;;  %v152_v33 = vld [vmem:[%s1060_s1 + $0x430] sm:$0xff] }
  0x4a   :  { %317 = vmatmul.f32.vlgmr.msrb.gmra.mxu0 %v200_v15  ;;  %377 = vmatmul.f32.vlgmr.msrb.gmra.mxu3 %v203_v16  ;;  %v181_v32 = vld [vmem:[%s1060_s1 + $0x518] sm:$0xff]  ;;  %v180_v35 = vld [vmem:[%s1060_s1 + $0x510] sm:$0xff]  ;;  %v151_v36 = vld [vmem:[%s1060_s1 + $0x428] sm:$0xff] }
  0x4b   :  { %385 = vmatpush.msra.mxu0 %v157_v17  ;;  %404 = vmatpush.msra.mxu1 %v174_v18  ;;  %v169_v34 = vld [vmem:[%s1060_s1 + $0x4b8] sm:$0xff]  ;;  %v168_v37 = vld [vmem:[%s1060_s1 + $0x4b0] sm:$0xff]  ;;  %v179_v38 = vld [vmem:[%s1060_s1 + $0x508] sm:$0xff] }
  0x4c   :  { %337 = vmatmul.f32.vlgmr.msrb.gmra.mxu1 %v201_v19  ;;  %429 = vmatpush.msra.mxu2 %v185_v20  ;;  %v150_v39 = vld [vmem:[%s1060_s1 + $0x420] sm:$0xff]  ;;  %v167_v40 = vld [vmem:[%s1060_s1 + $0x4a8] sm:$0xff]  ;;  %v149_v42 = vld [vmem:[%s1060_s1 + $0x418] sm:$0xff] }
  0x4d   :  { %386 = vmatpush.msra.mxu0 %v156_v21  ;;  %405 = vmatpush.msra.mxu1 %v173_v22  ;;  %v178_v41 = vld [vmem:[%s1060_s1 + $0x500] sm:$0xff]  ;;  %v207_v44 = vld.sshfl [vmem:[#allocation1 + $0x10] sm:$0xff pattern:$0x73625140]  ;;  %v165_v46 = vld [vmem:[%s1060_s1 + $0x498] sm:$0xff] }
  0x4e   :  { %430 = vmatpush.msra.mxu2 %v184_v23  ;;  %v166_v43 = vld [vmem:[%s1060_s1 + $0x4a0] sm:$0xff]  ;;  %v148_v45 = vld [vmem:[%s1060_s1 + $0x410] sm:$0xff]  ;;  %v147_v47 = vld [vmem:[%s1060_s1 + $0x408] sm:$0xff] }
  0x4f   :  { %387 = vmatpush.msra.mxu0 %v155_v24  ;;  %406 = vmatpush.msra.mxu1 %v172_v25  ;;  %v164_v48 = vld [vmem:[%s1060_s1 + $0x490] sm:$0xff]  ;;  %v146_v49 = vld [vmem:[%s1060_s1 + $0x400] sm:$0xff]  ;;  %v163_v50 = vld [vmem:[%s1060_s1 + $0x488] sm:$0xff] }
  0x50   :  { %431 = vmatpush.msra.mxu2 %v183_v26  ;;  %v205_v51 = vld.sshfl [vmem:[#allocation1] sm:$0xff pattern:$0x73625140]  ;;  %v206_v53 = vld.sshfl [vmem:[#allocation1 + $0x8] sm:$0xff pattern:$0x73625140] }
  0x51   :  { %388 = vmatpush.msra.mxu0 %v154_v27  ;;  %407 = vmatpush.msra.mxu1 %v171_v28  ;;  %v162_v52 = vld [vmem:[%s1060_s1 + $0x480] sm:$0xff]  ;;  %s516_s1 = smov [#allocation2]  }
  0x52   :  { %432 = vmatpush.msra.mxu2 %v182_v29  ;;  %v485_v54 = vld [vmem:[%s1061_s2] ss:$0 sm:$0xff]  ;;  %s472_s2 = sshll.u32 %s516_s1, 4  ;;  %s473_s2 = int_to_ptr.vmem [resolvable:$true] %s472_s2 }
  0x53   :  { %389 = vmatpush.msra.mxu0 %v153_v30  ;;  %408 = vmatpush.msra.mxu1 %v170_v31 }
  0x54   :  { %433 = vmatpush.msra.mxu2 %v181_v32 }
  0x55   :  { %390 = vmatpush.msra.mxu0 %v152_v33  ;;  %409 = vmatpush.msra.mxu1 %v169_v34 }
  0x56   :  { %434 = vmatpush.msra.mxu2 %v180_v35 }
  0x57   :  { %391 = vmatpush.msra.mxu0 %v151_v36  ;;  %410 = vmatpush.msra.mxu1 %v168_v37 }
  0x58   :  { %435 = vmatpush.msra.mxu2 %v179_v38 }
  0x59   :  { %392 = vmatpush.msra.mxu0 %v150_v39  ;;  %411 = vmatpush.msra.mxu1 %v167_v40 }
  0x5a   :  { %436 = vmatpush.msra.mxu2 %v178_v41 }
  0x5b   :  { %393 = vmatpush.msra.mxu0 %v149_v42  ;;  %412 = vmatpush.msra.mxu1 %v166_v43 }
  0x5c   :  { %483 = vmatmul.msk.f32.vlgmr.msra.gmra.mxu2 %vm218_vm0, %v207_v44 }
  0x5d   :  { %394 = vmatpush.msra.mxu0 %v148_v45  ;;  %413 = vmatpush.msra.mxu1 %v165_v46 }
  0x5f   :  { %395 = vmatpush.msra.mxu0 %v147_v47  ;;  %414 = vmatpush.msra.mxu1 %v164_v48 }
  0x61   :  { %396 = vmatpush.msra.mxu0 %v146_v49  ;;  %415 = vmatpush.msra.mxu1 %v163_v50 }
  0x62   :  { %397 = vmatmul.f32.vlgmr.msra.gmra.mxu0 %v205_v51 }
  0x63   :  { %416 = vmatpush.msra.mxu1 %v162_v52 }
  0x64   :  { %417 = vmatmul.f32.vlgmr.msra.gmra.mxu1 %v206_v53 }
  0xbe   :  { %v238_v55 = vpop.f32.mrf.mxu0 }
  0xbf   :  { %v239_v56 = vadd.f32 %v485_v54, %v238_v55 }
  0xc0   :  { %v258_v57 = vpop.f32.mrf.mxu1 }
  0xc1   :  { %v259_v58 = vadd.f32 %v258_v57, %v239_v56  ;;  %v278_v59 = vpop.f32.mrf.mxu2 }
  0xc3   :  { %v279_v60 = vadd.f32 %v278_v59, %v259_v58  ;;  %v298_v61 = vpop.f32.mrf.mxu3 }
  0xc5   :  { %v299_v62 = vadd.f32 %v298_v61, %v279_v60 }
  0xc7   :  { %v318_v63 = vpop.f32.mrf.mxu0 }
  0xc8   :  { %v319_v0 = vadd.f32 %v318_v63, %v299_v62 }
  0xc9   :  { %v338_v1 = vpop.f32.mrf.mxu1 }
  0xca   :  { %v339_v2 = vadd.f32 %v338_v1, %v319_v0 }
  0xcb   :  { %v358_v3 = vpop.f32.mrf.mxu2 }
  0xcc   :  { %v359_v4 = vadd.f32 %v358_v3, %v339_v2 }
  0xcd   :  { %v378_v5 = vpop.f32.mrf.mxu3 }
  0xce   :  { %v379_v6 = vadd.f32 %v378_v5, %v359_v4 }
  0xdf   :  { %v398_v7 = vpop.f32.mrf.mxu0  ;;  %v438_v10 = vpop.f32.mrf.mxu2 }
  0xe0   :  { %v399_v8 = vadd.f32 %v398_v7, %v379_v6 }
  0xe1   :  { %v418_v9 = vpop.f32.mrf.mxu1 }
  0xe2   :  { %v419_v11 = vadd.f32 %v418_v9, %v399_v8 }
  0xe4   :  { %v439_v12 = vadd.f32 %v438_v10, %v419_v11 }
  0xe6   :  { %v442_v13 = vsel %vm441_vm1, %v439_v12, -inf }
  0xe7   :  { %443 = vmax.xlane.f32.xlu0 %v442_v13 }
 0x15a   :  { %v444_v14 = vpop.xlane.xlu0 %443 }
 0x15b   :  { %v445_v15 = vsub.f32 %v439_v12, %v444_v14 }
 0x15d   :  { %v446_v16 = vmul.f32 1.442695, %v445_v15 }
 0x15f   :  { %486 = vpow2.f32 %v446_v16 }
 0x165   :  { %v487_v17 = vpop.eup %486 }
 0x166   :  { %v448_v18 = vsel %vm441_vm1, %v487_v17, 0.0 }
 0x167   :  { %449 = vadd.xlane.f32.xlu0 %v448_v18 }
 0x1da   :  { %v450_v19 = vpop.xlane.xlu0 %449 }
 0x1db   :  { %488 = vrcp.f32 %v450_v19  ;;  %v462_v23 = vand.u32 2147483648, %v450_v19  ;;  %v460_v25 = vand.u32 2147483647, %v450_v19  ;;  %vm456_vm3 = vweird.f32 %v450_v19 }
 0x1dd   :  { %v463_v27 = vor.u32 1.1754944e-38, %v462_v23  ;;  %vm461_vm5 = vcmp.eq.f32.partialorder %v460_v25, 8.507059e+37 }
 0x1e1   :  { %v489_v20 = vpop.eup %488 }
 0x1e2   :  { %v452_v21 = vmul.f32 %v489_v20, %v450_v19  ;;  %vm457_vm2 = vweird.f32 %v489_v20 }
 0x1e3   :  { %vm458_vm4 = vmor %vm456_vm3, %vm457_vm2 }
 0x1e4   :  { %v453_v22 = vsub.f32 1.0, %v452_v21 }
 0x1e6   :  { %v454_v24 = vmul.f32 %v489_v20, %v453_v22 }
 0x1e8   :  { %v455_v26 = vadd.f32 %v489_v20, %v454_v24 }
 0x1ea   :  { %v459_v28 = vsel %vm458_vm4, %v489_v20, %v455_v26 }
 0x1eb   :  { %v464_v29 = vsel %vm461_vm5, %v463_v27, %v459_v28 }
 0x1ec   :  { %v465_v30 = vmul.f32 %v487_v17, %v464_v29 }
 0x1ee   :  { %466 = vst [vmem:[#allocation2] sm:$0x3] %v465_v30 }
 0x1ef   :  { %477 = dma.vmem_to_hbm [thread:$0]  %s473_s2, 32, %s475_s0, [#allocation3]  }
 0x1f0   :  { %514 = dma.done.wait [#allocation3], 32  }
 0x1f1   :  { %515 = vsyncadd [#allocation3], 4294967264 }
 0x1f2   :  { %482 = vsyncpa [#allocation3], 1 }

</bundles_post_ra>
